<compile_context>
chip_gen: v5e
topology: v5e:2x2
jax: 0.10.0
libtpu: 0.0.40
codegen_flags: <defaults>
</compile_context>

<pallas_src>
import functools
import numpy as np

import jax
import jax.numpy as jnp
from jax.experimental import pallas as pl
from jax.experimental.pallas import tpu as pltpu


# Set to jnp.bfloat16 on v6e / v7x to feed the MXU bf16 operands (accumulation stays
# f32 via preferred_element_type; softmax / LayerNorm / GELU math stays f32).
# Kept float32 here for exact parity with the float32 PyTorch reference (and for v5e).
MATMUL_DTYPE = jnp.float32


# ----------------------------------------------------------------------------
# Sinusoid positional table (exact replica of the reference numpy code)
# ----------------------------------------------------------------------------
def get_sinusoid_encoding_table(n_seq, d_hidn):
    def cal_angle(position, i_hidn):
        return position / np.power(10000, 2 * (i_hidn // 2) / d_hidn)

    def get_posi_angle_vec(position):
        return [cal_angle(position, i_hidn) for i_hidn in range(d_hidn)]

    sinusoid_table = np.array([get_posi_angle_vec(i) for i in range(n_seq)])
    sinusoid_table[:, 0::2] = np.sin(sinusoid_table[:, 0::2])
    sinusoid_table[:, 1::2] = np.cos(sinusoid_table[:, 1::2])
    return sinusoid_table.astype(np.float32)


# ----------------------------------------------------------------------------
# In-kernel helpers (pure jnp, traced inside the Pallas kernels)
# ----------------------------------------------------------------------------
def _dot(a, b):
    return jnp.dot(a.astype(MATMUL_DTYPE), b.astype(MATMUL_DTYPE),
                   preferred_element_type=jnp.float32)


def _bmm(spec, a, b):
    return jnp.einsum(spec, a.astype(MATMUL_DTYPE), b.astype(MATMUL_DTYPE),
                      preferred_element_type=jnp.float32)


def _layer_norm(z, gamma, beta, eps):
    mean = jnp.mean(z, axis=-1, keepdims=True)
    c = z - mean
    var = jnp.mean(c * c, axis=-1, keepdims=True)
    return c * jax.lax.rsqrt(var + eps) * gamma + beta


def _gelu(x):
    # exact (erf) GELU, matching torch.nn.functional.gelu default
    return 0.5 * x * (1.0 + jax.lax.erf(x * 0.7071067811865476))


def _ffn(x, w1, b1, w2, b2):
    h = _dot(x, w1) + b1
    h = _gelu(h)
    return _dot(h, w2) + b2


def _mha_core(q, k, v, mask, wo, bo, *, n_head, d_head, scale):
    """All-heads scaled-dot-product attention + output projection.

    q: (Sq, H*dh), k, v: (Sk, H*dh), mask: bool broadcastable to (H, Sq, Sk)
    (True = masked). Returns (att (Sq, D) f32, prob (H, Sq, Sk) f32).
    """
    def split_heads(t):              # (S, H*dh) -> (H, S, dh)
        return jnp.stack([t[:, h * d_head:(h + 1) * d_head] for h in range(n_head)],
                         axis=0)

    q3, k3, v3 = split_heads(q), split_heads(k), split_heads(v)

    scores = _bmm('hqd,hkd->hqk', q3, k3) * scale                    # (H, Sq, Sk)
    scores = jnp.where(mask, jnp.float32(-1e9), scores)
    m = jnp.max(scores, axis=-1, keepdims=True)
    e = jnp.exp(scores - m)
    inv_denom = pl.reciprocal(jnp.sum(e, axis=-1, keepdims=True), approx=False)
    prob = e * inv_denom                                             # (H, Sq, Sk)

    ctx3 = _bmm('hqk,hkd->hqd', prob, v3)                            # (H, Sq, dh)
    ctx = jnp.concatenate([ctx3[h] for h in range(n_head)], axis=-1)  # (Sq, H*dh)
    att = _dot(ctx, wo) + bo                                         # one K=H*dh matmul
    return att, prob


def _self_mha(x, mask, wqkv, bqkv, wo, bo, *, n_head, d_head, scale):
    """Self attention with a single fused QKV projection matmul."""
    hd = n_head * d_head
    qkv = _dot(x, wqkv) + bqkv                # (S, 3*H*dh) -> one wide MXU matmul
    q = qkv[:, :hd]
    k = qkv[:, hd:2 * hd]
    v = qkv[:, 2 * hd:]
    return _mha_core(q, k, v, mask, wo, bo, n_head=n_head, d_head=d_head, scale=scale)


def _cross_mha(xq, xkv, mask, wq, bq, wkv, bkv, wo, bo, *, n_head, d_head, scale):
    """Cross attention: separate Q projection, fused K/V projection matmul."""
    hd = n_head * d_head
    q = _dot(xq, wq) + bq                     # (Sq, H*dh)
    kv = _dot(xkv, wkv) + bkv                 # (Sk, 2*H*dh)
    k = kv[:, :hd]
    v = kv[:, hd:]
    return _mha_core(q, k, v, mask, wo, bo, n_head=n_head, d_head=d_head, scale=scale)


# ----------------------------------------------------------------------------
# Fused per-layer Pallas kernels (grid=(B,))
# ----------------------------------------------------------------------------
def enc_layer_kernel(x_ref, kpad_ref,
                     wqkv_ref, bqkv_ref, wo_ref, bo_ref,
                     fw1_ref, fb1_ref, fw2_ref, fb2_ref,
                     out_ref, prob_ref, *, n_head, d_head, scale, eps):
    x = x_ref[0]                               # (S, D)
    kmask = (kpad_ref[0] > 0.0)[None]          # (1, 1, S): True where key is PAD

    att, prob = _self_mha(x, kmask,
                          wqkv_ref[...], bqkv_ref[...], wo_ref[...], bo_ref[...],
                          n_head=n_head, d_head=d_head, scale=scale)
    prob_ref[0] = prob

    # Encoder LN = fresh keras LayerNormalization(eps=1e-6): gamma=1, beta=0.
    h1 = _layer_norm(x + att, 1.0, 0.0, eps)
    ff = _ffn(h1, fw1_ref[...], fb1_ref[...], fw2_ref[...], fb2_ref[...])
    out_ref[0] = _layer_norm(ff + h1, 1.0, 0.0, eps)


def dec_layer_kernel(dx_ref, enc_ref, dpad_ref, epad_ref,
                     swqkv_ref, sbqkv_ref, swo_ref, sbo_ref,
                     cwq_ref, cbq_ref, cwkv_ref, cbkv_ref, cwo_ref, cbo_ref,
                     fw1_ref, fb1_ref, fw2_ref, fb2_ref,
                     g1_ref, be1_ref, g2_ref, be2_ref, g3_ref, be3_ref,
                     out_ref, sprob_ref, cprob_ref, *, n_head, d_head, scale, eps):
    dx = dx_ref[0]                             # (Sd, D)
    enc = enc_ref[0]                           # (Se, D)
    Sd = dx.shape[0]

    dpad = dpad_ref[0] > 0.0                   # (1, Sd)
    epad = epad_ref[0] > 0.0                   # (1, Se)
    row = jax.lax.broadcasted_iota(jnp.int32, (Sd, Sd), 0)
    col = jax.lax.broadcasted_iota(jnp.int32, (Sd, Sd), 1)
    self_mask = jnp.logical_or(dpad, col > row)[None]    # (1, Sd, Sd)  pad | causal
    cross_mask = epad[None]                               # (1, 1, Se)

    # --- masked self attention + add & LN ---
    sa, sprob = _self_mha(dx, self_mask,
                          swqkv_ref[...], sbqkv_ref[...], swo_ref[...], sbo_ref[...],
                          n_head=n_head, d_head=d_head, scale=scale)
    sprob_ref[0] = sprob
    h1 = _layer_norm(dx + sa, g1_ref[...], be1_ref[...], eps)

    # --- decoder-encoder cross attention + add & LN ---
    ca, cprob = _cross_mha(h1, enc, cross_mask,
                           cwq_ref[...], cbq_ref[...], cwkv_ref[...], cbkv_ref[...],
                           cwo_ref[...], cbo_ref[...],
                           n_head=n_head, d_head=d_head, scale=scale)
    cprob_ref[0] = cprob
    h2 = _layer_norm(h1 + ca, g2_ref[...], be2_ref[...], eps)

    # --- position-wise FFN + add & LN ---
    ff = _ffn(h2, fw1_ref[...], fb1_ref[...], fw2_ref[...], fb2_ref[...])
    out_ref[0] = _layer_norm(h2 + ff, g3_ref[...], be3_ref[...], eps)


# ----------------------------------------------------------------------------
# pallas_call wrappers
# ----------------------------------------------------------------------------
def _rep(shape):
    """BlockSpec for a grid-invariant (broadcast) parameter (DMA'd once per call)."""
    n = len(shape)
    return pl.BlockSpec(shape, lambda b: (0,) * n)


def encoder_layer(x, kpad, mha_p, ffn_p, cfg):
    B, S, D = x.shape
    H, dh = cfg['n_head'], cfg['d_head']
    HD, Dff = H * dh, cfg['d_ff']
    kernel = functools.partial(enc_layer_kernel, n_head=H, d_head=dh,
                               scale=1.0 / (dh ** 0.5), eps=1e-6)
    out, prob = pl.pallas_call(
        kernel,
        out_shape=(jax.ShapeDtypeStruct((B, S, D), jnp.float32),
                   jax.ShapeDtypeStruct((B, H, S, S), jnp.float32)),
        grid=(B,),
        in_specs=[
            pl.BlockSpec((1, S, D), lambda b: (b, 0, 0)),
            pl.BlockSpec((1, 1, S), lambda b: (b, 0, 0)),
            _rep((D, 3 * HD)), _rep((1, 3 * HD)), _rep((HD, D)), _rep((1, D)),
            _rep((D, Dff)), _rep((1, Dff)), _rep((Dff, D)), _rep((1, D)),
        ],
        out_specs=(pl.BlockSpec((1, S, D), lambda b: (b, 0, 0)),
                   pl.BlockSpec((1, H, S, S), lambda b: (b, 0, 0, 0))),
        compiler_params=pltpu.CompilerParams(dimension_semantics=("parallel",)),
    )(x, kpad,
      mha_p['wqkv'], mha_p['bqkv'], mha_p['wo'], mha_p['bo'],
      ffn_p['w1'], ffn_p['b1'], ffn_p['w2'], ffn_p['b2'])
    return out, prob


def decoder_layer(dx, enc_out, dpad, epad, lp, cfg):
    B, Sd, D = dx.shape
    Se = enc_out.shape[1]
    H, dh = cfg['n_head'], cfg['d_head']
    HD, Dff = H * dh, cfg['d_ff']
    kernel = functools.partial(dec_layer_kernel, n_head=H, d_head=dh,
                               scale=1.0 / (dh ** 0.5), eps=cfg['layer_norm_epsilon'])
    out, sprob, cprob = pl.pallas_call(
        kernel,
        out_shape=(jax.ShapeDtypeStruct((B, Sd, D), jnp.float32),
                   jax.ShapeDtypeStruct((B, H, Sd, Sd), jnp.float32),
                   jax.ShapeDtypeStruct((B, H, Sd, Se), jnp.float32)),
        grid=(B,),
        in_specs=[
            pl.BlockSpec((1, Sd, D), lambda b: (b, 0, 0)),
            pl.BlockSpec((1, Se, D), lambda b: (b, 0, 0)),
            pl.BlockSpec((1, 1, Sd), lambda b: (b, 0, 0)),
            pl.BlockSpec((1, 1, Se), lambda b: (b, 0, 0)),
            # self-attention weights (fused QKV)
            _rep((D, 3 * HD)), _rep((1, 3 * HD)), _rep((HD, D)), _rep((1, D)),
            # cross-attention weights (Q separate, fused KV)
            _rep((D, HD)), _rep((1, HD)), _rep((D, 2 * HD)), _rep((1, 2 * HD)),
            _rep((HD, D)), _rep((1, D)),
            # FFN weights
            _rep((D, Dff)), _rep((1, Dff)), _rep((Dff, D)), _rep((1, D)),
            # LayerNorm affine params
            _rep((1, D)), _rep((1, D)), _rep((1, D)),
            _rep((1, D)), _rep((1, D)), _rep((1, D)),
        ],
        out_specs=(pl.BlockSpec((1, Sd, D), lambda b: (b, 0, 0)),
                   pl.BlockSpec((1, H, Sd, Sd), lambda b: (b, 0, 0, 0)),
                   pl.BlockSpec((1, H, Sd, Se), lambda b: (b, 0, 0, 0))),
        compiler_params=pltpu.CompilerParams(dimension_semantics=("parallel",)),
    )(dx, enc_out, dpad, epad,
      lp['self_mha']['wqkv'], lp['self_mha']['bqkv'],
      lp['self_mha']['wo'], lp['self_mha']['bo'],
      lp['cross_mha']['wq'], lp['cross_mha']['bq'],
      lp['cross_mha']['wkv'], lp['cross_mha']['bkv'],
      lp['cross_mha']['wo'], lp['cross_mha']['bo'],
      lp['ffn']['w1'], lp['ffn']['b1'], lp['ffn']['w2'], lp['ffn']['b2'],
      lp['ln1_g'], lp['ln1_b'], lp['ln2_g'], lp['ln2_b'], lp['ln3_g'], lp['ln3_b'])
    return out, sprob, cprob


# ----------------------------------------------------------------------------
# Parameter init (deterministic, synthetic)
# ----------------------------------------------------------------------------
def init_linear(key, din, dout, scale=0.02):
    kw, kb = jax.random.split(key)
    w = jax.random.normal(kw, (din, dout), jnp.float32) * scale
    b = jax.random.normal(kb, (1, dout), jnp.float32) * scale
    return w, b


def init_self_mha_params(key, D, HD):
    ks = jax.random.split(key, 2)
    wqkv, bqkv = init_linear(ks[0], D, 3 * HD)   # fused W_Q|W_K|W_V
    wo, bo = init_linear(ks[1], HD, D)
    return dict(wqkv=wqkv, bqkv=bqkv, wo=wo, bo=bo)


def init_cross_mha_params(key, D, HD):
    ks = jax.random.split(key, 3)
    wq, bq = init_linear(ks[0], D, HD)
    wkv, bkv = init_linear(ks[1], D, 2 * HD)     # fused W_K|W_V
    wo, bo = init_linear(ks[2], HD, D)
    return dict(wq=wq, bq=bq, wkv=wkv, bkv=bkv, wo=wo, bo=bo)


def init_ffn_params(key, D, Dff):
    k1, k2 = jax.random.split(key)
    w1, b1 = init_linear(k1, D, Dff)   # Conv1d(D -> Dff, k=1) == Linear
    w2, b2 = init_linear(k2, Dff, D)   # Conv1d(Dff -> D, k=1) == Linear
    return dict(w1=w1, b1=b1, w2=w2, b2=b2)


def init_params(key, cfg):
    D = cfg['d_hidn']
    HD = cfg['n_head'] * cfg['d_head']
    Dff = cfg['d_ff']
    L = cfg['n_layer']
    keys = jax.random.split(key, 2 + 2 * L + 3 * L)

    params = {}
    params['enc_emb'] = jax.random.normal(keys[0], (cfg['n_enc_vocab'], D), jnp.float32) * 0.02
    params['dec_emb'] = jax.random.normal(keys[1], (cfg['n_dec_vocab'], D), jnp.float32) * 0.02
    params['enc_pos'] = jnp.asarray(get_sinusoid_encoding_table(cfg['n_enc_seq'] + 1, D))
    params['dec_pos'] = jnp.asarray(get_sinusoid_encoding_table(cfg['n_dec_seq'] + 1, D))

    ki = 2
    enc_layers = []
    for _ in range(L):
        enc_layers.append(dict(
            mha=init_self_mha_params(keys[ki], D, HD),
            ffn=init_ffn_params(keys[ki + 1], D, Dff),
        ))
        ki += 2
    dec_layers = []
    for _ in range(L):
        dec_layers.append(dict(
            self_mha=init_self_mha_params(keys[ki], D, HD),
            cross_mha=init_cross_mha_params(keys[ki + 1], D, HD),
            ffn=init_ffn_params(keys[ki + 2], D, Dff),
            ln1_g=jnp.ones((1, D), jnp.float32), ln1_b=jnp.zeros((1, D), jnp.float32),
            ln2_g=jnp.ones((1, D), jnp.float32), ln2_b=jnp.zeros((1, D), jnp.float32),
            ln3_g=jnp.ones((1, D), jnp.float32), ln3_b=jnp.zeros((1, D), jnp.float32),
        ))
        ki += 3
    params['enc_layers'] = enc_layers
    params['dec_layers'] = dec_layers
    return params


# ----------------------------------------------------------------------------
# Full Transformer forward (embedding/gather glue in plain JAX, layers in Pallas)
# ----------------------------------------------------------------------------
def transformer_forward(enc_inputs, dec_inputs, params, cfg):
    pad = cfg['i_pad']
    B, Se = enc_inputs.shape
    _, Sd = dec_inputs.shape

    # ----- Encoder -----
    pos_e = jnp.broadcast_to(jnp.arange(Se, dtype=enc_inputs.dtype) + 1, (B, Se))
    pos_e = jnp.where(enc_inputs == pad, 0, pos_e)
    enc_x = params['enc_emb'][enc_inputs] + params['enc_pos'][pos_e]
    enc_kpad = (enc_inputs == pad).astype(jnp.float32)[:, None, :]   # (B, 1, Se)

    enc_self_attn_probs = []
    for lp in params['enc_layers']:
        enc_x, prob = encoder_layer(enc_x, enc_kpad, lp['mha'], lp['ffn'], cfg)
        enc_self_attn_probs.append(prob)
    enc_outputs = enc_x

    # ----- Decoder -----
    pos_d = jnp.broadcast_to(jnp.arange(Sd, dtype=dec_inputs.dtype) + 1, (B, Sd))
    pos_d = jnp.where(dec_inputs == pad, 0, pos_d)
    dec_x = params['dec_emb'][dec_inputs] + params['dec_pos'][pos_d]
    dec_kpad = (dec_inputs == pad).astype(jnp.float32)[:, None, :]   # (B, 1, Sd)

    dec_self_attn_probs, dec_enc_attn_probs = [], []
    for lp in params['dec_layers']:
        dec_x, sp, cp = decoder_layer(dec_x, enc_outputs, dec_kpad, enc_kpad, lp, cfg)
        dec_self_attn_probs.append(sp)
        dec_enc_attn_probs.append(cp)

    return dec_x, enc_self_attn_probs, dec_self_attn_probs, dec_enc_attn_probs


# ----------------------------------------------------------------------------
# Demo
# ----------------------------------------------------------------------------
if __name__ == "__main__":
    cfg = dict(n_enc_vocab=16, n_dec_vocab=16, n_enc_seq=8, n_dec_seq=8,
               n_layer=2, d_hidn=32, i_pad=0, d_ff=64, n_head=4, d_head=8,
               dropout=0.1, layer_norm_epsilon=1e-12)

    key = jax.random.PRNGKey(0)
    k_par, k_enc, k_dec = jax.random.split(key, 3)

    params = init_params(k_par, cfg)

    B, Se, Sd = 2, cfg['n_enc_seq'], cfg['n_dec_seq']
    enc_inputs = jax.random.randint(k_enc, (B, Se), 1, cfg['n_enc_vocab'], dtype=jnp.int32)
    dec_inputs = jax.random.randint(k_dec, (B, Sd), 1, cfg['n_dec_vocab'], dtype=jnp.int32)
    # introduce some padding tokens to exercise the pad masks
    enc_inputs = enc_inputs.at[:, -2:].set(cfg['i_pad'])
    dec_inputs = dec_inputs.at[:, -1:].set(cfg['i_pad'])

    fwd = jax.jit(lambda e, d, p: transformer_forward(e, d, p, cfg))
    dec_out, enc_probs, dec_sprobs, dec_cprobs = fwd(enc_inputs, dec_inputs, params)

    jax.block_until_ready(dec_out)
    for p in enc_probs + dec_sprobs + dec_cprobs:
        jax.block_until_ready(p)

    assert dec_out.shape == (B, Sd, cfg['d_hidn'])
    assert enc_probs[0].shape == (B, cfg['n_head'], Se, Se)
    assert dec_sprobs[0].shape == (B, cfg['n_head'], Sd, Sd)
    assert dec_cprobs[0].shape == (B, cfg['n_head'], Sd, Se)
    assert bool(jnp.all(jnp.isfinite(dec_out)))

    print("KERNEL_OK")
</pallas_src>

<mosaic_0001>
module attributes {stable_mosaic.version = 11 : i64} {
  func.func @enc_layer_kernel(%arg0: i32, %arg1: memref<1x8x32xf32, #tpu.memory_space<vmem>>, %arg2: memref<1x1x8xf32, #tpu.memory_space<vmem>>, %arg3: memref<32x96xf32, #tpu.memory_space<vmem>>, %arg4: memref<1x96xf32, #tpu.memory_space<vmem>>, %arg5: memref<32x32xf32, #tpu.memory_space<vmem>>, %arg6: memref<1x32xf32, #tpu.memory_space<vmem>>, %arg7: memref<32x64xf32, #tpu.memory_space<vmem>>, %arg8: memref<1x64xf32, #tpu.memory_space<vmem>>, %arg9: memref<64x32xf32, #tpu.memory_space<vmem>>, %arg10: memref<1x32xf32, #tpu.memory_space<vmem>>, %arg11: memref<1x8x32xf32, #tpu.memory_space<vmem>>, %arg12: memref<1x4x8x8xf32, #tpu.memory_space<vmem>>) attributes {dimension_semantics = [#tpu.dimension_semantics<parallel>], iteration_bounds = array<i64: 2>, scalar_prefetch = 0 : i64, scratch_operands = 0 : i64, tpu.core_type = #tpu.core_type<tc>, window_params = [{transform_indices = @transform_0, window_bounds = array<i64: 1, 8, 32>}, {transform_indices = @transform_1, window_bounds = array<i64: 1, 1, 8>}, {pipeline_mode = #tpu.pipeline_mode<synchronous>, transform_indices = @transform_2, window_bounds = array<i64: 32, 96>}, {pipeline_mode = #tpu.pipeline_mode<synchronous>, transform_indices = @transform_3, window_bounds = array<i64: 1, 96>}, {pipeline_mode = #tpu.pipeline_mode<synchronous>, transform_indices = @transform_4, window_bounds = array<i64: 32, 32>}, {pipeline_mode = #tpu.pipeline_mode<synchronous>, transform_indices = @transform_5, window_bounds = array<i64: 1, 32>}, {pipeline_mode = #tpu.pipeline_mode<synchronous>, transform_indices = @transform_6, window_bounds = array<i64: 32, 64>}, {pipeline_mode = #tpu.pipeline_mode<synchronous>, transform_indices = @transform_7, window_bounds = array<i64: 1, 64>}, {pipeline_mode = #tpu.pipeline_mode<synchronous>, transform_indices = @transform_8, window_bounds = array<i64: 64, 32>}, {pipeline_mode = #tpu.pipeline_mode<synchronous>, transform_indices = @transform_9, window_bounds = array<i64: 1, 32>}, {transform_indices = @transform_10, window_bounds = array<i64: 1, 8, 32>}, {transform_indices = @transform_11, window_bounds = array<i64: 1, 4, 8, 8>}]} {
    %c0 = arith.constant 0 : index
    %c0_0 = arith.constant 0 : index
    %c0_1 = arith.constant 0 : index
    %0 = vector.load %arg1[%c0, %c0_0, %c0_1] : memref<1x8x32xf32, #tpu.memory_space<vmem>>, vector<1x8x32xf32>
    %1 = vector.shape_cast %0 : vector<1x8x32xf32> to vector<8x32xf32>
    %c0_2 = arith.constant 0 : index
    %c0_3 = arith.constant 0 : index
    %c0_4 = arith.constant 0 : index
    %2 = vector.load %arg2[%c0_2, %c0_3, %c0_4] : memref<1x1x8xf32, #tpu.memory_space<vmem>>, vector<1x1x8xf32>
    %3 = vector.shape_cast %2 : vector<1x1x8xf32> to vector<1x8xf32>
    %cst = arith.constant 0.000000e+00 : f32
    %4 = vector.broadcast %cst : f32 to vector<1x8xf32>
    %5 = arith.cmpf ogt, %3, %4 : vector<1x8xf32>
    %6 = vector.shape_cast %5 : vector<1x8xi1> to vector<1x1x8xi1>
    %c0_5 = arith.constant 0 : index
    %c0_6 = arith.constant 0 : index
    %7 = vector.load %arg3[%c0_5, %c0_6] : memref<32x96xf32, #tpu.memory_space<vmem>>, vector<32x96xf32>
    %c0_7 = arith.constant 0 : index
    %c0_8 = arith.constant 0 : index
    %8 = vector.load %arg4[%c0_7, %c0_8] : memref<1x96xf32, #tpu.memory_space<vmem>>, vector<1x96xf32>
    %c0_9 = arith.constant 0 : index
    %c0_10 = arith.constant 0 : index
    %9 = vector.load %arg5[%c0_9, %c0_10] : memref<32x32xf32, #tpu.memory_space<vmem>>, vector<32x32xf32>
    %c0_11 = arith.constant 0 : index
    %c0_12 = arith.constant 0 : index
    %10 = vector.load %arg6[%c0_11, %c0_12] : memref<1x32xf32, #tpu.memory_space<vmem>>, vector<1x32xf32>
    %cst_13 = arith.constant dense<0.000000e+00> : vector<8x96xf32>
    %11 = tpu.matmul %1, %7, %cst_13 {dimension_numbers = #tpu.dot_dimension_numbers<[1], [0], [0], [1], [0, 0, 1, 1], [], []>} : vector<8x32xf32>, vector<32x96xf32>, vector<8x96xf32> -> vector<8x96xf32>
    %12 = vector.broadcast %8 : vector<1x96xf32> to vector<8x96xf32>
    %13 = arith.addf %11, %12 : vector<8x96xf32>
    %14 = vector.extract_strided_slice %13 {offsets = [0, 0], sizes = [8, 32], strides = [1, 1]} : vector<8x96xf32> to vector<8x32xf32>
    %15 = vector.extract_strided_slice %13 {offsets = [0, 32], sizes = [8, 32], strides = [1, 1]} : vector<8x96xf32> to vector<8x32xf32>
    %16 = vector.extract_strided_slice %13 {offsets = [0, 64], sizes = [8, 32], strides = [1, 1]} : vector<8x96xf32> to vector<8x32xf32>
    %17 = vector.extract_strided_slice %14 {offsets = [0, 0], sizes = [8, 8], strides = [1, 1]} : vector<8x32xf32> to vector<8x8xf32>
    %18 = vector.extract_strided_slice %14 {offsets = [0, 8], sizes = [8, 8], strides = [1, 1]} : vector<8x32xf32> to vector<8x8xf32>
    %19 = vector.extract_strided_slice %14 {offsets = [0, 16], sizes = [8, 8], strides = [1, 1]} : vector<8x32xf32> to vector<8x8xf32>
    %20 = vector.extract_strided_slice %14 {offsets = [0, 24], sizes = [8, 8], strides = [1, 1]} : vector<8x32xf32> to vector<8x8xf32>
    %21 = vector.shape_cast %17 : vector<8x8xf32> to vector<1x8x8xf32>
    %22 = vector.shape_cast %18 : vector<8x8xf32> to vector<1x8x8xf32>
    %23 = vector.shape_cast %19 : vector<8x8xf32> to vector<1x8x8xf32>
    %24 = vector.shape_cast %20 : vector<8x8xf32> to vector<1x8x8xf32>
    %25 = tpu.concatenate %21, %22, %23, %24 in 0 : vector<1x8x8xf32>, vector<1x8x8xf32>, vector<1x8x8xf32>, vector<1x8x8xf32> -> vector<4x8x8xf32>
    %26 = vector.extract_strided_slice %15 {offsets = [0, 0], sizes = [8, 8], strides = [1, 1]} : vector<8x32xf32> to vector<8x8xf32>
    %27 = vector.extract_strided_slice %15 {offsets = [0, 8], sizes = [8, 8], strides = [1, 1]} : vector<8x32xf32> to vector<8x8xf32>
    %28 = vector.extract_strided_slice %15 {offsets = [0, 16], sizes = [8, 8], strides = [1, 1]} : vector<8x32xf32> to vector<8x8xf32>
    %29 = vector.extract_strided_slice %15 {offsets = [0, 24], sizes = [8, 8], strides = [1, 1]} : vector<8x32xf32> to vector<8x8xf32>
    %30 = vector.shape_cast %26 : vector<8x8xf32> to vector<1x8x8xf32>
    %31 = vector.shape_cast %27 : vector<8x8xf32> to vector<1x8x8xf32>
    %32 = vector.shape_cast %28 : vector<8x8xf32> to vector<1x8x8xf32>
    %33 = vector.shape_cast %29 : vector<8x8xf32> to vector<1x8x8xf32>
    %34 = tpu.concatenate %30, %31, %32, %33 in 0 : vector<1x8x8xf32>, vector<1x8x8xf32>, vector<1x8x8xf32>, vector<1x8x8xf32> -> vector<4x8x8xf32>
    %35 = vector.extract_strided_slice %16 {offsets = [0, 0], sizes = [8, 8], strides = [1, 1]} : vector<8x32xf32> to vector<8x8xf32>
    %36 = vector.extract_strided_slice %16 {offsets = [0, 8], sizes = [8, 8], strides = [1, 1]} : vector<8x32xf32> to vector<8x8xf32>
    %37 = vector.extract_strided_slice %16 {offsets = [0, 16], sizes = [8, 8], strides = [1, 1]} : vector<8x32xf32> to vector<8x8xf32>
    %38 = vector.extract_strided_slice %16 {offsets = [0, 24], sizes = [8, 8], strides = [1, 1]} : vector<8x32xf32> to vector<8x8xf32>
    %39 = vector.shape_cast %35 : vector<8x8xf32> to vector<1x8x8xf32>
    %40 = vector.shape_cast %36 : vector<8x8xf32> to vector<1x8x8xf32>
    %41 = vector.shape_cast %37 : vector<8x8xf32> to vector<1x8x8xf32>
    %42 = vector.shape_cast %38 : vector<8x8xf32> to vector<1x8x8xf32>
    %43 = tpu.concatenate %39, %40, %41, %42 in 0 : vector<1x8x8xf32>, vector<1x8x8xf32>, vector<1x8x8xf32>, vector<1x8x8xf32> -> vector<4x8x8xf32>
    "tpu.trace_start"() <{level = 10 : i32, message = "hqd,hkd->hqk"}> : () -> ()
    %cst_14 = arith.constant dense<0.000000e+00> : vector<4x8x8xf32>
    %44 = tpu.matmul %25, %34, %cst_14 {dimension_numbers = #tpu.dot_dimension_numbers<[2], [2], [1], [1], [0, 0, 0, 1, 1, 1], [0], [0]>} : vector<4x8x8xf32>, vector<4x8x8xf32>, vector<4x8x8xf32> -> vector<4x8x8xf32>
    "tpu.trace_stop"() : () -> ()
    %cst_15 = arith.constant 0.353553385 : f32
    %45 = vector.broadcast %cst_15 : f32 to vector<4x8x8xf32>
    %46 = arith.mulf %44, %45 : vector<4x8x8xf32>
    %cst_16 = arith.constant -1.000000e+09 : f32
    %47 = vector.shape_cast %6 : vector<1x1x8xi1> to vector<1x1x8xi1>
    %48 = vector.broadcast %47 : vector<1x1x8xi1> to vector<4x8x8xi1>
    %49 = vector.broadcast %cst_16 : f32 to vector<4x8x8xf32>
    %50 = arith.select %48, %49, %46 : vector<4x8x8xi1>, vector<4x8x8xf32>
    %cst_17 = arith.constant dense<0xFF800000> : vector<4x8xf32>
    %51 = vector.multi_reduction <maximumf>, %50, %cst_17 [2] : vector<4x8x8xf32> to vector<4x8xf32>
    %52 = vector.shape_cast %51 : vector<4x8xf32> to vector<4x8x1xf32>
    %53 = vector.broadcast %52 : vector<4x8x1xf32> to vector<4x8x8xf32>
    %54 = arith.subf %50, %53 : vector<4x8x8xf32>
    %55 = math.exp %54 : vector<4x8x8xf32>
    %cst_18 = arith.constant dense<0.000000e+00> : vector<4x8xf32>
    %56 = vector.multi_reduction <add>, %55, %cst_18 [2] : vector<4x8x8xf32> to vector<4x8xf32>
    %57 = vector.shape_cast %56 : vector<4x8xf32> to vector<4x8x1xf32>
    %58 = tpu.reciprocal %57 : vector<4x8x1xf32> -> vector<4x8x1xf32>
    %59 = vector.broadcast %58 : vector<4x8x1xf32> to vector<4x8x8xf32>
    %60 = arith.mulf %55, %59 : vector<4x8x8xf32>
    "tpu.trace_start"() <{level = 10 : i32, message = "hqk,hkd->hqd"}> : () -> ()
    %cst_19 = arith.constant dense<0.000000e+00> : vector<4x8x8xf32>
    %61 = tpu.matmul %60, %43, %cst_19 {dimension_numbers = #tpu.dot_dimension_numbers<[2], [1], [1], [2], [0, 0, 0, 1, 1, 2], [0], [0]>} : vector<4x8x8xf32>, vector<4x8x8xf32>, vector<4x8x8xf32> -> vector<4x8x8xf32>
    "tpu.trace_stop"() : () -> ()
    %62 = vector.extract_strided_slice %61 {offsets = [0, 0, 0], sizes = [1, 8, 8], strides = [1, 1, 1]} : vector<4x8x8xf32> to vector<1x8x8xf32>
    %63 = vector.shape_cast %62 : vector<1x8x8xf32> to vector<8x8xf32>
    %64 = vector.extract_strided_slice %61 {offsets = [1, 0, 0], sizes = [1, 8, 8], strides = [1, 1, 1]} : vector<4x8x8xf32> to vector<1x8x8xf32>
    %65 = vector.shape_cast %64 : vector<1x8x8xf32> to vector<8x8xf32>
    %66 = vector.extract_strided_slice %61 {offsets = [2, 0, 0], sizes = [1, 8, 8], strides = [1, 1, 1]} : vector<4x8x8xf32> to vector<1x8x8xf32>
    %67 = vector.shape_cast %66 : vector<1x8x8xf32> to vector<8x8xf32>
    %68 = vector.extract_strided_slice %61 {offsets = [3, 0, 0], sizes = [1, 8, 8], strides = [1, 1, 1]} : vector<4x8x8xf32> to vector<1x8x8xf32>
    %69 = vector.shape_cast %68 : vector<1x8x8xf32> to vector<8x8xf32>
    %70 = tpu.concatenate %63, %65, %67, %69 in 1 : vector<8x8xf32>, vector<8x8xf32>, vector<8x8xf32>, vector<8x8xf32> -> vector<8x32xf32>
    %cst_20 = arith.constant dense<0.000000e+00> : vector<8x32xf32>
    %71 = tpu.matmul %70, %9, %cst_20 {dimension_numbers = #tpu.dot_dimension_numbers<[1], [0], [0], [1], [0, 0, 1, 1], [], []>} : vector<8x32xf32>, vector<32x32xf32>, vector<8x32xf32> -> vector<8x32xf32>
    %72 = vector.broadcast %10 : vector<1x32xf32> to vector<8x32xf32>
    %73 = arith.addf %71, %72 : vector<8x32xf32>
    %c0_21 = arith.constant 0 : index
    %c0_22 = arith.constant 0 : index
    %c0_23 = arith.constant 0 : index
    %c0_24 = arith.constant 0 : index
    %74 = vector.load %arg12[%c0_21, %c0_22, %c0_23, %c0_24] : memref<1x4x8x8xf32, #tpu.memory_space<vmem>>, vector<1x4x8x8xf32>
    %75 = vector.shape_cast %74 : vector<1x4x8x8xf32> to vector<4x8x8xf32>
    %76 = vector.shape_cast %60 : vector<4x8x8xf32> to vector<1x4x8x8xf32>
    tpu.vector_store %arg12[%c0_21, %c0_22, %c0_23, %c0_24], %76 {strides = array<i32>} : memref<1x4x8x8xf32, #tpu.memory_space<vmem>>, vector<1x4x8x8xf32>,
    %77 = arith.addf %1, %73 : vector<8x32xf32>
    %cst_25 = arith.constant dense<0.000000e+00> : vector<8xf32>
    %78 = vector.multi_reduction <add>, %77, %cst_25 [1] : vector<8x32xf32> to vector<8xf32>
    %79 = vector.shape_cast %78 : vector<8xf32> to vector<8x1xf32>
    %cst_26 = arith.constant 3.200000e+01 : f32
    %80 = vector.broadcast %cst_26 : f32 to vector<8x1xf32>
    %81 = arith.divf %79, %80 : vector<8x1xf32>
    %82 = vector.broadcast %81 : vector<8x1xf32> to vector<8x32xf32>
    %83 = arith.subf %77, %82 : vector<8x32xf32>
    %84 = arith.mulf %83, %83 : vector<8x32xf32>
    %cst_27 = arith.constant dense<0.000000e+00> : vector<8xf32>
    %85 = vector.multi_reduction <add>, %84, %cst_27 [1] : vector<8x32xf32> to vector<8xf32>
    %86 = vector.shape_cast %85 : vector<8xf32> to vector<8x1xf32>
    %cst_28 = arith.constant 3.200000e+01 : f32
    %87 = vector.broadcast %cst_28 : f32 to vector<8x1xf32>
    %88 = arith.divf %86, %87 : vector<8x1xf32>
    %cst_29 = arith.constant 9.99999997E-7 : f32
    %89 = vector.broadcast %cst_29 : f32 to vector<8x1xf32>
    %90 = arith.addf %88, %89 : vector<8x1xf32>
    %91 = math.rsqrt %90 : vector<8x1xf32>
    %92 = vector.broadcast %91 : vector<8x1xf32> to vector<8x32xf32>
    %93 = arith.mulf %83, %92 : vector<8x32xf32>
    %cst_30 = arith.constant 1.000000e+00 : f32
    %94 = vector.broadcast %cst_30 : f32 to vector<8x32xf32>
    %95 = arith.mulf %93, %94 : vector<8x32xf32>
    %cst_31 = arith.constant 0.000000e+00 : f32
    %96 = vector.broadcast %cst_31 : f32 to vector<8x32xf32>
    %97 = arith.addf %95, %96 : vector<8x32xf32>
    %c0_32 = arith.constant 0 : index
    %c0_33 = arith.constant 0 : index
    %98 = vector.load %arg7[%c0_32, %c0_33] : memref<32x64xf32, #tpu.memory_space<vmem>>, vector<32x64xf32>
    %c0_34 = arith.constant 0 : index
    %c0_35 = arith.constant 0 : index
    %99 = vector.load %arg8[%c0_34, %c0_35] : memref<1x64xf32, #tpu.memory_space<vmem>>, vector<1x64xf32>
    %c0_36 = arith.constant 0 : index
    %c0_37 = arith.constant 0 : index
    %100 = vector.load %arg9[%c0_36, %c0_37] : memref<64x32xf32, #tpu.memory_space<vmem>>, vector<64x32xf32>
    %c0_38 = arith.constant 0 : index
    %c0_39 = arith.constant 0 : index
    %101 = vector.load %arg10[%c0_38, %c0_39] : memref<1x32xf32, #tpu.memory_space<vmem>>, vector<1x32xf32>
    %cst_40 = arith.constant dense<0.000000e+00> : vector<8x64xf32>
    %102 = tpu.matmul %97, %98, %cst_40 {dimension_numbers = #tpu.dot_dimension_numbers<[1], [0], [0], [1], [0, 0, 1, 1], [], []>} : vector<8x32xf32>, vector<32x64xf32>, vector<8x64xf32> -> vector<8x64xf32>
    %103 = vector.broadcast %99 : vector<1x64xf32> to vector<8x64xf32>
    %104 = arith.addf %102, %103 : vector<8x64xf32>
    %cst_41 = arith.constant 5.000000e-01 : f32
    %105 = vector.broadcast %cst_41 : f32 to vector<8x64xf32>
    %106 = arith.mulf %105, %104 : vector<8x64xf32>
    %cst_42 = arith.constant 0.707106769 : f32
    %107 = vector.broadcast %cst_42 : f32 to vector<8x64xf32>
    %108 = arith.mulf %104, %107 : vector<8x64xf32>
    %109 = math.erf %108 : vector<8x64xf32>
    %cst_43 = arith.constant 1.000000e+00 : f32
    %110 = vector.broadcast %cst_43 : f32 to vector<8x64xf32>
    %111 = arith.addf %110, %109 : vector<8x64xf32>
    %112 = arith.mulf %106, %111 : vector<8x64xf32>
    %cst_44 = arith.constant dense<0.000000e+00> : vector<8x32xf32>
    %113 = tpu.matmul %112, %100, %cst_44 {dimension_numbers = #tpu.dot_dimension_numbers<[1], [0], [0], [1], [0, 0, 1, 1], [], []>} : vector<8x64xf32>, vector<64x32xf32>, vector<8x32xf32> -> vector<8x32xf32>
    %114 = vector.broadcast %101 : vector<1x32xf32> to vector<8x32xf32>
    %115 = arith.addf %113, %114 : vector<8x32xf32>
    %116 = arith.addf %115, %97 : vector<8x32xf32>
    %cst_45 = arith.constant dense<0.000000e+00> : vector<8xf32>
    %117 = vector.multi_reduction <add>, %116, %cst_45 [1] : vector<8x32xf32> to vector<8xf32>
    %118 = vector.shape_cast %117 : vector<8xf32> to vector<8x1xf32>
    %cst_46 = arith.constant 3.200000e+01 : f32
    %119 = vector.broadcast %cst_46 : f32 to vector<8x1xf32>
    %120 = arith.divf %118, %119 : vector<8x1xf32>
    %121 = vector.broadcast %120 : vector<8x1xf32> to vector<8x32xf32>
    %122 = arith.subf %116, %121 : vector<8x32xf32>
    %123 = arith.mulf %122, %122 : vector<8x32xf32>
    %cst_47 = arith.constant dense<0.000000e+00> : vector<8xf32>
    %124 = vector.multi_reduction <add>, %123, %cst_47 [1] : vector<8x32xf32> to vector<8xf32>
    %125 = vector.shape_cast %124 : vector<8xf32> to vector<8x1xf32>
    %cst_48 = arith.constant 3.200000e+01 : f32
    %126 = vector.broadcast %cst_48 : f32 to vector<8x1xf32>
    %127 = arith.divf %125, %126 : vector<8x1xf32>
    %cst_49 = arith.constant 9.99999997E-7 : f32
    %128 = vector.broadcast %cst_49 : f32 to vector<8x1xf32>
    %129 = arith.addf %127, %128 : vector<8x1xf32>
    %130 = math.rsqrt %129 : vector<8x1xf32>
    %131 = vector.broadcast %130 : vector<8x1xf32> to vector<8x32xf32>
    %132 = arith.mulf %122, %131 : vector<8x32xf32>
    %cst_50 = arith.constant 1.000000e+00 : f32
    %133 = vector.broadcast %cst_50 : f32 to vector<8x32xf32>
    %134 = arith.mulf %132, %133 : vector<8x32xf32>
    %cst_51 = arith.constant 0.000000e+00 : f32
    %135 = vector.broadcast %cst_51 : f32 to vector<8x32xf32>
    %136 = arith.addf %134, %135 : vector<8x32xf32>
    %c0_52 = arith.constant 0 : index
    %c0_53 = arith.constant 0 : index
    %c0_54 = arith.constant 0 : index
    %137 = vector.load %arg11[%c0_52, %c0_53, %c0_54] : memref<1x8x32xf32, #tpu.memory_space<vmem>>, vector<1x8x32xf32>
    %138 = vector.shape_cast %137 : vector<1x8x32xf32> to vector<8x32xf32>
    %139 = vector.shape_cast %136 : vector<8x32xf32> to vector<1x8x32xf32>
    tpu.vector_store %arg11[%c0_52, %c0_53, %c0_54], %139 {strides = array<i32>} : memref<1x8x32xf32, #tpu.memory_space<vmem>>, vector<1x8x32xf32>,
    return
  }
  func.func @transform_0(%arg0: i32) -> (i32, i32, i32) {
    %c0_i32 = arith.constant 0 : i32
    %c0_i32_0 = arith.constant 0 : i32
    %c0_i32_1 = arith.constant 0 : i32
    return %arg0, %c0_i32, %c0_i32_0 : i32, i32, i32
  }
  func.func @transform_1(%arg0: i32) -> (i32, i32, i32) {
    %c0_i32 = arith.constant 0 : i32
    %c0_i32_0 = arith.constant 0 : i32
    %c0_i32_1 = arith.constant 0 : i32
    return %arg0, %c0_i32, %c0_i32_0 : i32, i32, i32
  }
  func.func @transform_2(%arg0: i32) -> (i32, i32) {
    %c0_i32 = arith.constant 0 : i32
    %c0_i32_0 = arith.constant 0 : i32
    %c0_i32_1 = arith.constant 0 : i32
    return %c0_i32, %c0_i32_0 : i32, i32
  }
  func.func @transform_3(%arg0: i32) -> (i32, i32) {
    %c0_i32 = arith.constant 0 : i32
    %c0_i32_0 = arith.constant 0 : i32
    %c0_i32_1 = arith.constant 0 : i32
    return %c0_i32, %c0_i32_0 : i32, i32
  }
  func.func @transform_4(%arg0: i32) -> (i32, i32) {
    %c0_i32 = arith.constant 0 : i32
    %c0_i32_0 = arith.constant 0 : i32
    %c0_i32_1 = arith.constant 0 : i32
    return %c0_i32, %c0_i32_0 : i32, i32
  }
  func.func @transform_5(%arg0: i32) -> (i32, i32) {
    %c0_i32 = arith.constant 0 : i32
    %c0_i32_0 = arith.constant 0 : i32
    %c0_i32_1 = arith.constant 0 : i32
    return %c0_i32, %c0_i32_0 : i32, i32
  }
  func.func @transform_6(%arg0: i32) -> (i32, i32) {
    %c0_i32 = arith.constant 0 : i32
    %c0_i32_0 = arith.constant 0 : i32
    %c0_i32_1 = arith.constant 0 : i32
    return %c0_i32, %c0_i32_0 : i32, i32
  }
  func.func @transform_7(%arg0: i32) -> (i32, i32) {
    %c0_i32 = arith.constant 0 : i32
    %c0_i32_0 = arith.constant 0 : i32
    %c0_i32_1 = arith.constant 0 : i32
    return %c0_i32, %c0_i32_0 : i32, i32
  }
  func.func @transform_8(%arg0: i32) -> (i32, i32) {
    %c0_i32 = arith.constant 0 : i32
    %c0_i32_0 = arith.constant 0 : i32
    %c0_i32_1 = arith.constant 0 : i32
    return %c0_i32, %c0_i32_0 : i32, i32
  }
  func.func @transform_9(%arg0: i32) -> (i32, i32) {
    %c0_i32 = arith.constant 0 : i32
    %c0_i32_0 = arith.constant 0 : i32
    %c0_i32_1 = arith.constant 0 : i32
    return %c0_i32, %c0_i32_0 : i32, i32
  }
  func.func @transform_10(%arg0: i32) -> (i32, i32, i32) {
    %c0_i32 = arith.constant 0 : i32
    %c0_i32_0 = arith.constant 0 : i32
    %c0_i32_1 = arith.constant 0 : i32
    return %arg0, %c0_i32, %c0_i32_0 : i32, i32, i32
  }
  func.func @transform_11(%arg0: i32) -> (i32, i32, i32, i32) {
    %c0_i32 = arith.constant 0 : i32
    %c0_i32_0 = arith.constant 0 : i32
    %c0_i32_1 = arith.constant 0 : i32
    %c0_i32_2 = arith.constant 0 : i32
    return %arg0, %c0_i32, %c0_i32_0, %c0_i32_1 : i32, i32, i32, i32
  }
}

module attributes {stable_mosaic.version = 11 : i64} {
  func.func @dec_layer_kernel(%arg0: i32, %arg1: memref<1x8x32xf32, #tpu.memory_space<vmem>>, %arg2: memref<1x8x32xf32, #tpu.memory_space<vmem>>, %arg3: memref<1x1x8xf32, #tpu.memory_space<vmem>>, %arg4: memref<1x1x8xf32, #tpu.memory_space<vmem>>, %arg5: memref<32x96xf32, #tpu.memory_space<vmem>>, %arg6: memref<1x96xf32, #tpu.memory_space<vmem>>, %arg7: memref<32x32xf32, #tpu.memory_space<vmem>>, %arg8: memref<1x32xf32, #tpu.memory_space<vmem>>, %arg9: memref<32x32xf32, #tpu.memory_space<vmem>>, %arg10: memref<1x32xf32, #tpu.memory_space<vmem>>, %arg11: memref<32x64xf32, #tpu.memory_space<vmem>>, %arg12: memref<1x64xf32, #tpu.memory_space<vmem>>, %arg13: memref<32x32xf32, #tpu.memory_space<vmem>>, %arg14: memref<1x32xf32, #tpu.memory_space<vmem>>, %arg15: memref<32x64xf32, #tpu.memory_space<vmem>>, %arg16: memref<1x64xf32, #tpu.memory_space<vmem>>, %arg17: memref<64x32xf32, #tpu.memory_space<vmem>>, %arg18: memref<1x32xf32, #tpu.memory_space<vmem>>, %arg19: memref<1x32xf32, #tpu.memory_space<vmem>>, %arg20: memref<1x32xf32, #tpu.memory_space<vmem>>, %arg21: memref<1x32xf32, #tpu.memory_space<vmem>>, %arg22: memref<1x32xf32, #tpu.memory_space<vmem>>, %arg23: memref<1x32xf32, #tpu.memory_space<vmem>>, %arg24: memref<1x32xf32, #tpu.memory_space<vmem>>, %arg25: memref<1x8x32xf32, #tpu.memory_space<vmem>>, %arg26: memref<1x4x8x8xf32, #tpu.memory_space<vmem>>, %arg27: memref<1x4x8x8xf32, #tpu.memory_space<vmem>>) attributes {dimension_semantics = [#tpu.dimension_semantics<parallel>], iteration_bounds = array<i64: 2>, scalar_prefetch = 0 : i64, scratch_operands = 0 : i64, tpu.core_type = #tpu.core_type<tc>, window_params = [{transform_indices = @transform_0, window_bounds = array<i64: 1, 8, 32>}, {transform_indices = @transform_1, window_bounds = array<i64: 1, 8, 32>}, {transform_indices = @transform_2, window_bounds = array<i64: 1, 1, 8>}, {transform_indices = @transform_3, window_bounds = array<i64: 1, 1, 8>}, {pipeline_mode = #tpu.pipeline_mode<synchronous>, transform_indices = @transform_4, window_bounds = array<i64: 32, 96>}, {pipeline_mode = #tpu.pipeline_mode<synchronous>, transform_indices = @transform_5, window_bounds = array<i64: 1, 96>}, {pipeline_mode = #tpu.pipeline_mode<synchronous>, transform_indices = @transform_6, window_bounds = array<i64: 32, 32>}, {pipeline_mode = #tpu.pipeline_mode<synchronous>, transform_indices = @transform_7, window_bounds = array<i64: 1, 32>}, {pipeline_mode = #tpu.pipeline_mode<synchronous>, transform_indices = @transform_8, window_bounds = array<i64: 32, 32>}, {pipeline_mode = #tpu.pipeline_mode<synchronous>, transform_indices = @transform_9, window_bounds = array<i64: 1, 32>}, {pipeline_mode = #tpu.pipeline_mode<synchronous>, transform_indices = @transform_10, window_bounds = array<i64: 32, 64>}, {pipeline_mode = #tpu.pipeline_mode<synchronous>, transform_indices = @transform_11, window_bounds = array<i64: 1, 64>}, {pipeline_mode = #tpu.pipeline_mode<synchronous>, transform_indices = @transform_12, window_bounds = array<i64: 32, 32>}, {pipeline_mode = #tpu.pipeline_mode<synchronous>, transform_indices = @transform_13, window_bounds = array<i64: 1, 32>}, {pipeline_mode = #tpu.pipeline_mode<synchronous>, transform_indices = @transform_14, window_bounds = array<i64: 32, 64>}, {pipeline_mode = #tpu.pipeline_mode<synchronous>, transform_indices = @transform_15, window_bounds = array<i64: 1, 64>}, {pipeline_mode = #tpu.pipeline_mode<synchronous>, transform_indices = @transform_16, window_bounds = array<i64: 64, 32>}, {pipeline_mode = #tpu.pipeline_mode<synchronous>, transform_indices = @transform_17, window_bounds = array<i64: 1, 32>}, {pipeline_mode = #tpu.pipeline_mode<synchronous>, transform_indices = @transform_18, window_bounds = array<i64: 1, 32>}, {pipeline_mode = #tpu.pipeline_mode<synchronous>, transform_indices = @transform_19, window_bounds = array<i64: 1, 32>}, {pipeline_mode = #tpu.pipeline_mode<synchronous>, transform_indices = @transform_20, window_bounds = array<i64: 1, 32>}, {pipeline_mode = #tpu.pipeline_mode<synchronous>, transform_indices = @transform_21, window_bounds = array<i64: 1, 32>}, {pipeline_mode = #tpu.pipeline_mode<synchronous>, transform_indices = @transform_22, window_bounds = array<i64: 1, 32>}, {pipeline_mode = #tpu.pipeline_mode<synchronous>, transform_indices = @transform_23, window_bounds = array<i64: 1, 32>}, {transform_indices = @transform_24, window_bounds = array<i64: 1, 8, 32>}, {transform_indices = @transform_25, window_bounds = array<i64: 1, 4, 8, 8>}, {transform_indices = @transform_26, window_bounds = array<i64: 1, 4, 8, 8>}]} {
    %c0 = arith.constant 0 : index
    %c0_0 = arith.constant 0 : index
    %c0_1 = arith.constant 0 : index
    %0 = vector.load %arg1[%c0, %c0_0, %c0_1] : memref<1x8x32xf32, #tpu.memory_space<vmem>>, vector<1x8x32xf32>
    %1 = vector.shape_cast %0 : vector<1x8x32xf32> to vector<8x32xf32>
    %c0_2 = arith.constant 0 : index
    %c0_3 = arith.constant 0 : index
    %c0_4 = arith.constant 0 : index
    %2 = vector.load %arg2[%c0_2, %c0_3, %c0_4] : memref<1x8x32xf32, #tpu.memory_space<vmem>>, vector<1x8x32xf32>
    %3 = vector.shape_cast %2 : vector<1x8x32xf32> to vector<8x32xf32>
    %c0_5 = arith.constant 0 : index
    %c0_6 = arith.constant 0 : index
    %c0_7 = arith.constant 0 : index
    %4 = vector.load %arg3[%c0_5, %c0_6, %c0_7] : memref<1x1x8xf32, #tpu.memory_space<vmem>>, vector<1x1x8xf32>
    %5 = vector.shape_cast %4 : vector<1x1x8xf32> to vector<1x8xf32>
    %cst = arith.constant 0.000000e+00 : f32
    %6 = vector.broadcast %cst : f32 to vector<1x8xf32>
    %7 = arith.cmpf ogt, %5, %6 : vector<1x8xf32>
    %c0_8 = arith.constant 0 : index
    %c0_9 = arith.constant 0 : index
    %c0_10 = arith.constant 0 : index
    %8 = vector.load %arg4[%c0_8, %c0_9, %c0_10] : memref<1x1x8xf32, #tpu.memory_space<vmem>>, vector<1x1x8xf32>
    %9 = vector.shape_cast %8 : vector<1x1x8xf32> to vector<1x8xf32>
    %cst_11 = arith.constant 0.000000e+00 : f32
    %10 = vector.broadcast %cst_11 : f32 to vector<1x8xf32>
    %11 = arith.cmpf ogt, %9, %10 : vector<1x8xf32>
    %12 = tpu.iota {dimensions = array<i32: 0>} : vector<8x8xi32>
    %13 = tpu.iota {dimensions = array<i32: 1>} : vector<8x8xi32>
    %14 = arith.cmpi sgt, %13, %12 : vector<8x8xi32>
    %15 = vector.broadcast %7 : vector<1x8xi1> to vector<8x8xi1>
    %16 = arith.ori %15, %14 : vector<8x8xi1>
    %17 = vector.shape_cast %16 : vector<8x8xi1> to vector<1x8x8xi1>
    %18 = vector.shape_cast %11 : vector<1x8xi1> to vector<1x1x8xi1>
    %c0_12 = arith.constant 0 : index
    %c0_13 = arith.constant 0 : index
    %19 = vector.load %arg5[%c0_12, %c0_13] : memref<32x96xf32, #tpu.memory_space<vmem>>, vector<32x96xf32>
    %c0_14 = arith.constant 0 : index
    %c0_15 = arith.constant 0 : index
    %20 = vector.load %arg6[%c0_14, %c0_15] : memref<1x96xf32, #tpu.memory_space<vmem>>, vector<1x96xf32>
    %c0_16 = arith.constant 0 : index
    %c0_17 = arith.constant 0 : index
    %21 = vector.load %arg7[%c0_16, %c0_17] : memref<32x32xf32, #tpu.memory_space<vmem>>, vector<32x32xf32>
    %c0_18 = arith.constant 0 : index
    %c0_19 = arith.constant 0 : index
    %22 = vector.load %arg8[%c0_18, %c0_19] : memref<1x32xf32, #tpu.memory_space<vmem>>, vector<1x32xf32>
    %cst_20 = arith.constant dense<0.000000e+00> : vector<8x96xf32>
    %23 = tpu.matmul %1, %19, %cst_20 {dimension_numbers = #tpu.dot_dimension_numbers<[1], [0], [0], [1], [0, 0, 1, 1], [], []>} : vector<8x32xf32>, vector<32x96xf32>, vector<8x96xf32> -> vector<8x96xf32>
    %24 = vector.broadcast %20 : vector<1x96xf32> to vector<8x96xf32>
    %25 = arith.addf %23, %24 : vector<8x96xf32>
    %26 = vector.extract_strided_slice %25 {offsets = [0, 0], sizes = [8, 32], strides = [1, 1]} : vector<8x96xf32> to vector<8x32xf32>
    %27 = vector.extract_strided_slice %25 {offsets = [0, 32], sizes = [8, 32], strides = [1, 1]} : vector<8x96xf32> to vector<8x32xf32>
    %28 = vector.extract_strided_slice %25 {offsets = [0, 64], sizes = [8, 32], strides = [1, 1]} : vector<8x96xf32> to vector<8x32xf32>
    %29 = vector.extract_strided_slice %26 {offsets = [0, 0], sizes = [8, 8], strides = [1, 1]} : vector<8x32xf32> to vector<8x8xf32>
    %30 = vector.extract_strided_slice %26 {offsets = [0, 8], sizes = [8, 8], strides = [1, 1]} : vector<8x32xf32> to vector<8x8xf32>
    %31 = vector.extract_strided_slice %26 {offsets = [0, 16], sizes = [8, 8], strides = [1, 1]} : vector<8x32xf32> to vector<8x8xf32>
    %32 = vector.extract_strided_slice %26 {offsets = [0, 24], sizes = [8, 8], strides = [1, 1]} : vector<8x32xf32> to vector<8x8xf32>
    %33 = vector.shape_cast %29 : vector<8x8xf32> to vector<1x8x8xf32>
    %34 = vector.shape_cast %30 : vector<8x8xf32> to vector<1x8x8xf32>
    %35 = vector.shape_cast %31 : vector<8x8xf32> to vector<1x8x8xf32>
    %36 = vector.shape_cast %32 : vector<8x8xf32> to vector<1x8x8xf32>
    %37 = tpu.concatenate %33, %34, %35, %36 in 0 : vector<1x8x8xf32>, vector<1x8x8xf32>, vector<1x8x8xf32>, vector<1x8x8xf32> -> vector<4x8x8xf32>
    %38 = vector.extract_strided_slice %27 {offsets = [0, 0], sizes = [8, 8], strides = [1, 1]} : vector<8x32xf32> to vector<8x8xf32>
    %39 = vector.extract_strided_slice %27 {offsets = [0, 8], sizes = [8, 8], strides = [1, 1]} : vector<8x32xf32> to vector<8x8xf32>
    %40 = vector.extract_strided_slice %27 {offsets = [0, 16], sizes = [8, 8], strides = [1, 1]} : vector<8x32xf32> to vector<8x8xf32>
    %41 = vector.extract_strided_slice %27 {offsets = [0, 24], sizes = [8, 8], strides = [1, 1]} : vector<8x32xf32> to vector<8x8xf32>
    %42 = vector.shape_cast %38 : vector<8x8xf32> to vector<1x8x8xf32>
    %43 = vector.shape_cast %39 : vector<8x8xf32> to vector<1x8x8xf32>
    %44 = vector.shape_cast %40 : vector<8x8xf32> to vector<1x8x8xf32>
    %45 = vector.shape_cast %41 : vector<8x8xf32> to vector<1x8x8xf32>
    %46 = tpu.concatenate %42, %43, %44, %45 in 0 : vector<1x8x8xf32>, vector<1x8x8xf32>, vector<1x8x8xf32>, vector<1x8x8xf32> -> vector<4x8x8xf32>
    %47 = vector.extract_strided_slice %28 {offsets = [0, 0], sizes = [8, 8], strides = [1, 1]} : vector<8x32xf32> to vector<8x8xf32>
    %48 = vector.extract_strided_slice %28 {offsets = [0, 8], sizes = [8, 8], strides = [1, 1]} : vector<8x32xf32> to vector<8x8xf32>
    %49 = vector.extract_strided_slice %28 {offsets = [0, 16], sizes = [8, 8], strides = [1, 1]} : vector<8x32xf32> to vector<8x8xf32>
    %50 = vector.extract_strided_slice %28 {offsets = [0, 24], sizes = [8, 8], strides = [1, 1]} : vector<8x32xf32> to vector<8x8xf32>
    %51 = vector.shape_cast %47 : vector<8x8xf32> to vector<1x8x8xf32>
    %52 = vector.shape_cast %48 : vector<8x8xf32> to vector<1x8x8xf32>
    %53 = vector.shape_cast %49 : vector<8x8xf32> to vector<1x8x8xf32>
    %54 = vector.shape_cast %50 : vector<8x8xf32> to vector<1x8x8xf32>
    %55 = tpu.concatenate %51, %52, %53, %54 in 0 : vector<1x8x8xf32>, vector<1x8x8xf32>, vector<1x8x8xf32>, vector<1x8x8xf32> -> vector<4x8x8xf32>
    "tpu.trace_start"() <{level = 10 : i32, message = "hqd,hkd->hqk"}> : () -> ()
    %cst_21 = arith.constant dense<0.000000e+00> : vector<4x8x8xf32>
    %56 = tpu.matmul %37, %46, %cst_21 {dimension_numbers = #tpu.dot_dimension_numbers<[2], [2], [1], [1], [0, 0, 0, 1, 1, 1], [0], [0]>} : vector<4x8x8xf32>, vector<4x8x8xf32>, vector<4x8x8xf32> -> vector<4x8x8xf32>
    "tpu.trace_stop"() : () -> ()
    %cst_22 = arith.constant 0.353553385 : f32
    %57 = vector.broadcast %cst_22 : f32 to vector<4x8x8xf32>
    %58 = arith.mulf %56, %57 : vector<4x8x8xf32>
    %cst_23 = arith.constant -1.000000e+09 : f32
    %59 = vector.shape_cast %17 : vector<1x8x8xi1> to vector<1x8x8xi1>
    %60 = vector.broadcast %59 : vector<1x8x8xi1> to vector<4x8x8xi1>
    %61 = vector.broadcast %cst_23 : f32 to vector<4x8x8xf32>
    %62 = arith.select %60, %61, %58 : vector<4x8x8xi1>, vector<4x8x8xf32>
    %cst_24 = arith.constant dense<0xFF800000> : vector<4x8xf32>
    %63 = vector.multi_reduction <maximumf>, %62, %cst_24 [2] : vector<4x8x8xf32> to vector<4x8xf32>
    %64 = vector.shape_cast %63 : vector<4x8xf32> to vector<4x8x1xf32>
    %65 = vector.broadcast %64 : vector<4x8x1xf32> to vector<4x8x8xf32>
    %66 = arith.subf %62, %65 : vector<4x8x8xf32>
    %67 = math.exp %66 : vector<4x8x8xf32>
    %cst_25 = arith.constant dense<0.000000e+00> : vector<4x8xf32>
    %68 = vector.multi_reduction <add>, %67, %cst_25 [2] : vector<4x8x8xf32> to vector<4x8xf32>
    %69 = vector.shape_cast %68 : vector<4x8xf32> to vector<4x8x1xf32>
    %70 = tpu.reciprocal %69 : vector<4x8x1xf32> -> vector<4x8x1xf32>
    %71 = vector.broadcast %70 : vector<4x8x1xf32> to vector<4x8x8xf32>
    %72 = arith.mulf %67, %71 : vector<4x8x8xf32>
    "tpu.trace_start"() <{level = 10 : i32, message = "hqk,hkd->hqd"}> : () -> ()
    %cst_26 = arith.constant dense<0.000000e+00> : vector<4x8x8xf32>
    %73 = tpu.matmul %72, %55, %cst_26 {dimension_numbers = #tpu.dot_dimension_numbers<[2], [1], [1], [2], [0, 0, 0, 1, 1, 2], [0], [0]>} : vector<4x8x8xf32>, vector<4x8x8xf32>, vector<4x8x8xf32> -> vector<4x8x8xf32>
    "tpu.trace_stop"() : () -> ()
    %74 = vector.extract_strided_slice %73 {offsets = [0, 0, 0], sizes = [1, 8, 8], strides = [1, 1, 1]} : vector<4x8x8xf32> to vector<1x8x8xf32>
    %75 = vector.shape_cast %74 : vector<1x8x8xf32> to vector<8x8xf32>
    %76 = vector.extract_strided_slice %73 {offsets = [1, 0, 0], sizes = [1, 8, 8], strides = [1, 1, 1]} : vector<4x8x8xf32> to vector<1x8x8xf32>
    %77 = vector.shape_cast %76 : vector<1x8x8xf32> to vector<8x8xf32>
    %78 = vector.extract_strided_slice %73 {offsets = [2, 0, 0], sizes = [1, 8, 8], strides = [1, 1, 1]} : vector<4x8x8xf32> to vector<1x8x8xf32>
    %79 = vector.shape_cast %78 : vector<1x8x8xf32> to vector<8x8xf32>
    %80 = vector.extract_strided_slice %73 {offsets = [3, 0, 0], sizes = [1, 8, 8], strides = [1, 1, 1]} : vector<4x8x8xf32> to vector<1x8x8xf32>
    %81 = vector.shape_cast %80 : vector<1x8x8xf32> to vector<8x8xf32>
    %82 = tpu.concatenate %75, %77, %79, %81 in 1 : vector<8x8xf32>, vector<8x8xf32>, vector<8x8xf32>, vector<8x8xf32> -> vector<8x32xf32>
    %cst_27 = arith.constant dense<0.000000e+00> : vector<8x32xf32>
    %83 = tpu.matmul %82, %21, %cst_27 {dimension_numbers = #tpu.dot_dimension_numbers<[1], [0], [0], [1], [0, 0, 1, 1], [], []>} : vector<8x32xf32>, vector<32x32xf32>, vector<8x32xf32> -> vector<8x32xf32>
    %84 = vector.broadcast %22 : vector<1x32xf32> to vector<8x32xf32>
    %85 = arith.addf %83, %84 : vector<8x32xf32>
    %c0_28 = arith.constant 0 : index
    %c0_29 = arith.constant 0 : index
    %c0_30 = arith.constant 0 : index
    %c0_31 = arith.constant 0 : index
    %86 = vector.load %arg26[%c0_28, %c0_29, %c0_30, %c0_31] : memref<1x4x8x8xf32, #tpu.memory_space<vmem>>, vector<1x4x8x8xf32>
    %87 = vector.shape_cast %86 : vector<1x4x8x8xf32> to vector<4x8x8xf32>
    %88 = vector.shape_cast %72 : vector<4x8x8xf32> to vector<1x4x8x8xf32>
    tpu.vector_store %arg26[%c0_28, %c0_29, %c0_30, %c0_31], %88 {strides = array<i32>} : memref<1x4x8x8xf32, #tpu.memory_space<vmem>>, vector<1x4x8x8xf32>,
    %89 = arith.addf %1, %85 : vector<8x32xf32>
    %c0_32 = arith.constant 0 : index
    %c0_33 = arith.constant 0 : index
    %90 = vector.load %arg19[%c0_32, %c0_33] : memref<1x32xf32, #tpu.memory_space<vmem>>, vector<1x32xf32>
    %c0_34 = arith.constant 0 : index
    %c0_35 = arith.constant 0 : index
    %91 = vector.load %arg20[%c0_34, %c0_35] : memref<1x32xf32, #tpu.memory_space<vmem>>, vector<1x32xf32>
    %cst_36 = arith.constant dense<0.000000e+00> : vector<8xf32>
    %92 = vector.multi_reduction <add>, %89, %cst_36 [1] : vector<8x32xf32> to vector<8xf32>
    %93 = vector.shape_cast %92 : vector<8xf32> to vector<8x1xf32>
    %cst_37 = arith.constant 3.200000e+01 : f32
    %94 = vector.broadcast %cst_37 : f32 to vector<8x1xf32>
    %95 = arith.divf %93, %94 : vector<8x1xf32>
    %96 = vector.broadcast %95 : vector<8x1xf32> to vector<8x32xf32>
    %97 = arith.subf %89, %96 : vector<8x32xf32>
    %98 = arith.mulf %97, %97 : vector<8x32xf32>
    %cst_38 = arith.constant dense<0.000000e+00> : vector<8xf32>
    %99 = vector.multi_reduction <add>, %98, %cst_38 [1] : vector<8x32xf32> to vector<8xf32>
    %100 = vector.shape_cast %99 : vector<8xf32> to vector<8x1xf32>
    %cst_39 = arith.constant 3.200000e+01 : f32
    %101 = vector.broadcast %cst_39 : f32 to vector<8x1xf32>
    %102 = arith.divf %100, %101 : vector<8x1xf32>
    %cst_40 = arith.constant 9.99999996E-13 : f32
    %103 = vector.broadcast %cst_40 : f32 to vector<8x1xf32>
    %104 = arith.addf %102, %103 : vector<8x1xf32>
    %105 = math.rsqrt %104 : vector<8x1xf32>
    %106 = vector.broadcast %105 : vector<8x1xf32> to vector<8x32xf32>
    %107 = arith.mulf %97, %106 : vector<8x32xf32>
    %108 = vector.broadcast %90 : vector<1x32xf32> to vector<8x32xf32>
    %109 = arith.mulf %107, %108 : vector<8x32xf32>
    %110 = vector.broadcast %91 : vector<1x32xf32> to vector<8x32xf32>
    %111 = arith.addf %109, %110 : vector<8x32xf32>
    %c0_41 = arith.constant 0 : index
    %c0_42 = arith.constant 0 : index
    %112 = vector.load %arg9[%c0_41, %c0_42] : memref<32x32xf32, #tpu.memory_space<vmem>>, vector<32x32xf32>
    %c0_43 = arith.constant 0 : index
    %c0_44 = arith.constant 0 : index
    %113 = vector.load %arg10[%c0_43, %c0_44] : memref<1x32xf32, #tpu.memory_space<vmem>>, vector<1x32xf32>
    %c0_45 = arith.constant 0 : index
    %c0_46 = arith.constant 0 : index
    %114 = vector.load %arg11[%c0_45, %c0_46] : memref<32x64xf32, #tpu.memory_space<vmem>>, vector<32x64xf32>
    %c0_47 = arith.constant 0 : index
    %c0_48 = arith.constant 0 : index
    %115 = vector.load %arg12[%c0_47, %c0_48] : memref<1x64xf32, #tpu.memory_space<vmem>>, vector<1x64xf32>
    %c0_49 = arith.constant 0 : index
    %c0_50 = arith.constant 0 : index
    %116 = vector.load %arg13[%c0_49, %c0_50] : memref<32x32xf32, #tpu.memory_space<vmem>>, vector<32x32xf32>
    %c0_51 = arith.constant 0 : index
    %c0_52 = arith.constant 0 : index
    %117 = vector.load %arg14[%c0_51, %c0_52] : memref<1x32xf32, #tpu.memory_space<vmem>>, vector<1x32xf32>
    %cst_53 = arith.constant dense<0.000000e+00> : vector<8x32xf32>
    %118 = tpu.matmul %111, %112, %cst_53 {dimension_numbers = #tpu.dot_dimension_numbers<[1], [0], [0], [1], [0, 0, 1, 1], [], []>} : vector<8x32xf32>, vector<32x32xf32>, vector<8x32xf32> -> vector<8x32xf32>
    %119 = vector.broadcast %113 : vector<1x32xf32> to vector<8x32xf32>
    %120 = arith.addf %118, %119 : vector<8x32xf32>
    %cst_54 = arith.constant dense<0.000000e+00> : vector<8x64xf32>
    %121 = tpu.matmul %3, %114, %cst_54 {dimension_numbers = #tpu.dot_dimension_numbers<[1], [0], [0], [1], [0, 0, 1, 1], [], []>} : vector<8x32xf32>, vector<32x64xf32>, vector<8x64xf32> -> vector<8x64xf32>
    %122 = vector.broadcast %115 : vector<1x64xf32> to vector<8x64xf32>
    %123 = arith.addf %121, %122 : vector<8x64xf32>
    %124 = vector.extract_strided_slice %123 {offsets = [0, 0], sizes = [8, 32], strides = [1, 1]} : vector<8x64xf32> to vector<8x32xf32>
    %125 = vector.extract_strided_slice %123 {offsets = [0, 32], sizes = [8, 32], strides = [1, 1]} : vector<8x64xf32> to vector<8x32xf32>
    %126 = vector.extract_strided_slice %120 {offsets = [0, 0], sizes = [8, 8], strides = [1, 1]} : vector<8x32xf32> to vector<8x8xf32>
    %127 = vector.extract_strided_slice %120 {offsets = [0, 8], sizes = [8, 8], strides = [1, 1]} : vector<8x32xf32> to vector<8x8xf32>
    %128 = vector.extract_strided_slice %120 {offsets = [0, 16], sizes = [8, 8], strides = [1, 1]} : vector<8x32xf32> to vector<8x8xf32>
    %129 = vector.extract_strided_slice %120 {offsets = [0, 24], sizes = [8, 8], strides = [1, 1]} : vector<8x32xf32> to vector<8x8xf32>
    %130 = vector.shape_cast %126 : vector<8x8xf32> to vector<1x8x8xf32>
    %131 = vector.shape_cast %127 : vector<8x8xf32> to vector<1x8x8xf32>
    %132 = vector.shape_cast %128 : vector<8x8xf32> to vector<1x8x8xf32>
    %133 = vector.shape_cast %129 : vector<8x8xf32> to vector<1x8x8xf32>
    %134 = tpu.concatenate %130, %131, %132, %133 in 0 : vector<1x8x8xf32>, vector<1x8x8xf32>, vector<1x8x8xf32>, vector<1x8x8xf32> -> vector<4x8x8xf32>
    %135 = vector.extract_strided_slice %124 {offsets = [0, 0], sizes = [8, 8], strides = [1, 1]} : vector<8x32xf32> to vector<8x8xf32>
    %136 = vector.extract_strided_slice %124 {offsets = [0, 8], sizes = [8, 8], strides = [1, 1]} : vector<8x32xf32> to vector<8x8xf32>
    %137 = vector.extract_strided_slice %124 {offsets = [0, 16], sizes = [8, 8], strides = [1, 1]} : vector<8x32xf32> to vector<8x8xf32>
    %138 = vector.extract_strided_slice %124 {offsets = [0, 24], sizes = [8, 8], strides = [1, 1]} : vector<8x32xf32> to vector<8x8xf32>
    %139 = vector.shape_cast %135 : vector<8x8xf32> to vector<1x8x8xf32>
    %140 = vector.shape_cast %136 : vector<8x8xf32> to vector<1x8x8xf32>
    %141 = vector.shape_cast %137 : vector<8x8xf32> to vector<1x8x8xf32>
    %142 = vector.shape_cast %138 : vector<8x8xf32> to vector<1x8x8xf32>
    %143 = tpu.concatenate %139, %140, %141, %142 in 0 : vector<1x8x8xf32>, vector<1x8x8xf32>, vector<1x8x8xf32>, vector<1x8x8xf32> -> vector<4x8x8xf32>
    %144 = vector.extract_strided_slice %125 {offsets = [0, 0], sizes = [8, 8], strides = [1, 1]} : vector<8x32xf32> to vector<8x8xf32>
    %145 = vector.extract_strided_slice %125 {offsets = [0, 8], sizes = [8, 8], strides = [1, 1]} : vector<8x32xf32> to vector<8x8xf32>
    %146 = vector.extract_strided_slice %125 {offsets = [0, 16], sizes = [8, 8], strides = [1, 1]} : vector<8x32xf32> to vector<8x8xf32>
    %147 = vector.extract_strided_slice %125 {offsets = [0, 24], sizes = [8, 8], strides = [1, 1]} : vector<8x32xf32> to vector<8x8xf32>
    %148 = vector.shape_cast %144 : vector<8x8xf32> to vector<1x8x8xf32>
    %149 = vector.shape_cast %145 : vector<8x8xf32> to vector<1x8x8xf32>
    %150 = vector.shape_cast %146 : vector<8x8xf32> to vector<1x8x8xf32>
    %151 = vector.shape_cast %147 : vector<8x8xf32> to vector<1x8x8xf32>
    %152 = tpu.concatenate %148, %149, %150, %151 in 0 : vector<1x8x8xf32>, vector<1x8x8xf32>, vector<1x8x8xf32>, vector<1x8x8xf32> -> vector<4x8x8xf32>
    "tpu.trace_start"() <{level = 10 : i32, message = "hqd,hkd->hqk"}> : () -> ()
    %cst_55 = arith.constant dense<0.000000e+00> : vector<4x8x8xf32>
    %153 = tpu.matmul %134, %143, %cst_55 {dimension_numbers = #tpu.dot_dimension_numbers<[2], [2], [1], [1], [0, 0, 0, 1, 1, 1], [0], [0]>} : vector<4x8x8xf32>, vector<4x8x8xf32>, vector<4x8x8xf32> -> vector<4x8x8xf32>
    "tpu.trace_stop"() : () -> ()
    %cst_56 = arith.constant 0.353553385 : f32
    %154 = vector.broadcast %cst_56 : f32 to vector<4x8x8xf32>
    %155 = arith.mulf %153, %154 : vector<4x8x8xf32>
    %cst_57 = arith.constant -1.000000e+09 : f32
    %156 = vector.shape_cast %18 : vector<1x1x8xi1> to vector<1x1x8xi1>
    %157 = vector.broadcast %156 : vector<1x1x8xi1> to vector<4x8x8xi1>
    %158 = vector.broadcast %cst_57 : f32 to vector<4x8x8xf32>
    %159 = arith.select %157, %158, %155 : vector<4x8x8xi1>, vector<4x8x8xf32>
    %cst_58 = arith.constant dense<0xFF800000> : vector<4x8xf32>
    %160 = vector.multi_reduction <maximumf>, %159, %cst_58 [2] : vector<4x8x8xf32> to vector<4x8xf32>
    %161 = vector.shape_cast %160 : vector<4x8xf32> to vector<4x8x1xf32>
    %162 = vector.broadcast %161 : vector<4x8x1xf32> to vector<4x8x8xf32>
    %163 = arith.subf %159, %162 : vector<4x8x8xf32>
    %164 = math.exp %163 : vector<4x8x8xf32>
    %cst_59 = arith.constant dense<0.000000e+00> : vector<4x8xf32>
    %165 = vector.multi_reduction <add>, %164, %cst_59 [2] : vector<4x8x8xf32> to vector<4x8xf32>
    %166 = vector.shape_cast %165 : vector<4x8xf32> to vector<4x8x1xf32>
    %167 = tpu.reciprocal %166 : vector<4x8x1xf32> -> vector<4x8x1xf32>
    %168 = vector.broadcast %167 : vector<4x8x1xf32> to vector<4x8x8xf32>
    %169 = arith.mulf %164, %168 : vector<4x8x8xf32>
    "tpu.trace_start"() <{level = 10 : i32, message = "hqk,hkd->hqd"}> : () -> ()
    %cst_60 = arith.constant dense<0.000000e+00> : vector<4x8x8xf32>
    %170 = tpu.matmul %169, %152, %cst_60 {dimension_numbers = #tpu.dot_dimension_numbers<[2], [1], [1], [2], [0, 0, 0, 1, 1, 2], [0], [0]>} : vector<4x8x8xf32>, vector<4x8x8xf32>, vector<4x8x8xf32> -> vector<4x8x8xf32>
    "tpu.trace_stop"() : () -> ()
    %171 = vector.extract_strided_slice %170 {offsets = [0, 0, 0], sizes = [1, 8, 8], strides = [1, 1, 1]} : vector<4x8x8xf32> to vector<1x8x8xf32>
    %172 = vector.shape_cast %171 : vector<1x8x8xf32> to vector<8x8xf32>
    %173 = vector.extract_strided_slice %170 {offsets = [1, 0, 0], sizes = [1, 8, 8], strides = [1, 1, 1]} : vector<4x8x8xf32> to vector<1x8x8xf32>
    %174 = vector.shape_cast %173 : vector<1x8x8xf32> to vector<8x8xf32>
    %175 = vector.extract_strided_slice %170 {offsets = [2, 0, 0], sizes = [1, 8, 8], strides = [1, 1, 1]} : vector<4x8x8xf32> to vector<1x8x8xf32>
    %176 = vector.shape_cast %175 : vector<1x8x8xf32> to vector<8x8xf32>
    %177 = vector.extract_strided_slice %170 {offsets = [3, 0, 0], sizes = [1, 8, 8], strides = [1, 1, 1]} : vector<4x8x8xf32> to vector<1x8x8xf32>
    %178 = vector.shape_cast %177 : vector<1x8x8xf32> to vector<8x8xf32>
    %179 = tpu.concatenate %172, %174, %176, %178 in 1 : vector<8x8xf32>, vector<8x8xf32>, vector<8x8xf32>, vector<8x8xf32> -> vector<8x32xf32>
    %cst_61 = arith.constant dense<0.000000e+00> : vector<8x32xf32>
    %180 = tpu.matmul %179, %116, %cst_61 {dimension_numbers = #tpu.dot_dimension_numbers<[1], [0], [0], [1], [0, 0, 1, 1], [], []>} : vector<8x32xf32>, vector<32x32xf32>, vector<8x32xf32> -> vector<8x32xf32>
    %181 = vector.broadcast %117 : vector<1x32xf32> to vector<8x32xf32>
    %182 = arith.addf %180, %181 : vector<8x32xf32>
    %c0_62 = arith.constant 0 : index
    %c0_63 = arith.constant 0 : index
    %c0_64 = arith.constant 0 : index
    %c0_65 = arith.constant 0 : index
    %183 = vector.load %arg27[%c0_62, %c0_63, %c0_64, %c0_65] : memref<1x4x8x8xf32, #tpu.memory_space<vmem>>, vector<1x4x8x8xf32>
    %184 = vector.shape_cast %183 : vector<1x4x8x8xf32> to vector<4x8x8xf32>
    %185 = vector.shape_cast %169 : vector<4x8x8xf32> to vector<1x4x8x8xf32>
    tpu.vector_store %arg27[%c0_62, %c0_63, %c0_64, %c0_65], %185 {strides = array<i32>} : memref<1x4x8x8xf32, #tpu.memory_space<vmem>>, vector<1x4x8x8xf32>,
    %186 = arith.addf %111, %182 : vector<8x32xf32>
    %c0_66 = arith.constant 0 : index
    %c0_67 = arith.constant 0 : index
    %187 = vector.load %arg21[%c0_66, %c0_67] : memref<1x32xf32, #tpu.memory_space<vmem>>, vector<1x32xf32>
    %c0_68 = arith.constant 0 : index
    %c0_69 = arith.constant 0 : index
    %188 = vector.load %arg22[%c0_68, %c0_69] : memref<1x32xf32, #tpu.memory_space<vmem>>, vector<1x32xf32>
    %cst_70 = arith.constant dense<0.000000e+00> : vector<8xf32>
    %189 = vector.multi_reduction <add>, %186, %cst_70 [1] : vector<8x32xf32> to vector<8xf32>
    %190 = vector.shape_cast %189 : vector<8xf32> to vector<8x1xf32>
    %cst_71 = arith.constant 3.200000e+01 : f32
    %191 = vector.broadcast %cst_71 : f32 to vector<8x1xf32>
    %192 = arith.divf %190, %191 : vector<8x1xf32>
    %193 = vector.broadcast %192 : vector<8x1xf32> to vector<8x32xf32>
    %194 = arith.subf %186, %193 : vector<8x32xf32>
    %195 = arith.mulf %194, %194 : vector<8x32xf32>
    %cst_72 = arith.constant dense<0.000000e+00> : vector<8xf32>
    %196 = vector.multi_reduction <add>, %195, %cst_72 [1] : vector<8x32xf32> to vector<8xf32>
    %197 = vector.shape_cast %196 : vector<8xf32> to vector<8x1xf32>
    %cst_73 = arith.constant 3.200000e+01 : f32
    %198 = vector.broadcast %cst_73 : f32 to vector<8x1xf32>
    %199 = arith.divf %197, %198 : vector<8x1xf32>
    %cst_74 = arith.constant 9.99999996E-13 : f32
    %200 = vector.broadcast %cst_74 : f32 to vector<8x1xf32>
    %201 = arith.addf %199, %200 : vector<8x1xf32>
    %202 = math.rsqrt %201 : vector<8x1xf32>
    %203 = vector.broadcast %202 : vector<8x1xf32> to vector<8x32xf32>
    %204 = arith.mulf %194, %203 : vector<8x32xf32>
    %205 = vector.broadcast %187 : vector<1x32xf32> to vector<8x32xf32>
    %206 = arith.mulf %204, %205 : vector<8x32xf32>
    %207 = vector.broadcast %188 : vector<1x32xf32> to vector<8x32xf32>
    %208 = arith.addf %206, %207 : vector<8x32xf32>
    %c0_75 = arith.constant 0 : index
    %c0_76 = arith.constant 0 : index
    %209 = vector.load %arg15[%c0_75, %c0_76] : memref<32x64xf32, #tpu.memory_space<vmem>>, vector<32x64xf32>
    %c0_77 = arith.constant 0 : index
    %c0_78 = arith.constant 0 : index
    %210 = vector.load %arg16[%c0_77, %c0_78] : memref<1x64xf32, #tpu.memory_space<vmem>>, vector<1x64xf32>
    %c0_79 = arith.constant 0 : index
    %c0_80 = arith.constant 0 : index
    %211 = vector.load %arg17[%c0_79, %c0_80] : memref<64x32xf32, #tpu.memory_space<vmem>>, vector<64x32xf32>
    %c0_81 = arith.constant 0 : index
    %c0_82 = arith.constant 0 : index
    %212 = vector.load %arg18[%c0_81, %c0_82] : memref<1x32xf32, #tpu.memory_space<vmem>>, vector<1x32xf32>
    %cst_83 = arith.constant dense<0.000000e+00> : vector<8x64xf32>
    %213 = tpu.matmul %208, %209, %cst_83 {dimension_numbers = #tpu.dot_dimension_numbers<[1], [0], [0], [1], [0, 0, 1, 1], [], []>} : vector<8x32xf32>, vector<32x64xf32>, vector<8x64xf32> -> vector<8x64xf32>
    %214 = vector.broadcast %210 : vector<1x64xf32> to vector<8x64xf32>
    %215 = arith.addf %213, %214 : vector<8x64xf32>
    %cst_84 = arith.constant 5.000000e-01 : f32
    %216 = vector.broadcast %cst_84 : f32 to vector<8x64xf32>
    %217 = arith.mulf %216, %215 : vector<8x64xf32>
    %cst_85 = arith.constant 0.707106769 : f32
    %218 = vector.broadcast %cst_85 : f32 to vector<8x64xf32>
    %219 = arith.mulf %215, %218 : vector<8x64xf32>
    %220 = math.erf %219 : vector<8x64xf32>
    %cst_86 = arith.constant 1.000000e+00 : f32
    %221 = vector.broadcast %cst_86 : f32 to vector<8x64xf32>
    %222 = arith.addf %221, %220 : vector<8x64xf32>
    %223 = arith.mulf %217, %222 : vector<8x64xf32>
    %cst_87 = arith.constant dense<0.000000e+00> : vector<8x32xf32>
    %224 = tpu.matmul %223, %211, %cst_87 {dimension_numbers = #tpu.dot_dimension_numbers<[1], [0], [0], [1], [0, 0, 1, 1], [], []>} : vector<8x64xf32>, vector<64x32xf32>, vector<8x32xf32> -> vector<8x32xf32>
    %225 = vector.broadcast %212 : vector<1x32xf32> to vector<8x32xf32>
    %226 = arith.addf %224, %225 : vector<8x32xf32>
    %227 = arith.addf %208, %226 : vector<8x32xf32>
    %c0_88 = arith.constant 0 : index
    %c0_89 = arith.constant 0 : index
    %228 = vector.load %arg23[%c0_88, %c0_89] : memref<1x32xf32, #tpu.memory_space<vmem>>, vector<1x32xf32>
    %c0_90 = arith.constant 0 : index
    %c0_91 = arith.constant 0 : index
    %229 = vector.load %arg24[%c0_90, %c0_91] : memref<1x32xf32, #tpu.memory_space<vmem>>, vector<1x32xf32>
    %cst_92 = arith.constant dense<0.000000e+00> : vector<8xf32>
    %230 = vector.multi_reduction <add>, %227, %cst_92 [1] : vector<8x32xf32> to vector<8xf32>
    %231 = vector.shape_cast %230 : vector<8xf32> to vector<8x1xf32>
    %cst_93 = arith.constant 3.200000e+01 : f32
    %232 = vector.broadcast %cst_93 : f32 to vector<8x1xf32>
    %233 = arith.divf %231, %232 : vector<8x1xf32>
    %234 = vector.broadcast %233 : vector<8x1xf32> to vector<8x32xf32>
    %235 = arith.subf %227, %234 : vector<8x32xf32>
    %236 = arith.mulf %235, %235 : vector<8x32xf32>
    %cst_94 = arith.constant dense<0.000000e+00> : vector<8xf32>
    %237 = vector.multi_reduction <add>, %236, %cst_94 [1] : vector<8x32xf32> to vector<8xf32>
    %238 = vector.shape_cast %237 : vector<8xf32> to vector<8x1xf32>
    %cst_95 = arith.constant 3.200000e+01 : f32
    %239 = vector.broadcast %cst_95 : f32 to vector<8x1xf32>
    %240 = arith.divf %238, %239 : vector<8x1xf32>
    %cst_96 = arith.constant 9.99999996E-13 : f32
    %241 = vector.broadcast %cst_96 : f32 to vector<8x1xf32>
    %242 = arith.addf %240, %241 : vector<8x1xf32>
    %243 = math.rsqrt %242 : vector<8x1xf32>
    %244 = vector.broadcast %243 : vector<8x1xf32> to vector<8x32xf32>
    %245 = arith.mulf %235, %244 : vector<8x32xf32>
    %246 = vector.broadcast %228 : vector<1x32xf32> to vector<8x32xf32>
    %247 = arith.mulf %245, %246 : vector<8x32xf32>
    %248 = vector.broadcast %229 : vector<1x32xf32> to vector<8x32xf32>
    %249 = arith.addf %247, %248 : vector<8x32xf32>
    %c0_97 = arith.constant 0 : index
    %c0_98 = arith.constant 0 : index
    %c0_99 = arith.constant 0 : index
    %250 = vector.load %arg25[%c0_97, %c0_98, %c0_99] : memref<1x8x32xf32, #tpu.memory_space<vmem>>, vector<1x8x32xf32>
    %251 = vector.shape_cast %250 : vector<1x8x32xf32> to vector<8x32xf32>
    %252 = vector.shape_cast %249 : vector<8x32xf32> to vector<1x8x32xf32>
    tpu.vector_store %arg25[%c0_97, %c0_98, %c0_99], %252 {strides = array<i32>} : memref<1x8x32xf32, #tpu.memory_space<vmem>>, vector<1x8x32xf32>,
    return
  }
  func.func @transform_0(%arg0: i32) -> (i32, i32, i32) {
    %c0_i32 = arith.constant 0 : i32
    %c0_i32_0 = arith.constant 0 : i32
    %c0_i32_1 = arith.constant 0 : i32
    return %arg0, %c0_i32, %c0_i32_0 : i32, i32, i32
  }
  func.func @transform_1(%arg0: i32) -> (i32, i32, i32) {
    %c0_i32 = arith.constant 0 : i32
    %c0_i32_0 = arith.constant 0 : i32
    %c0_i32_1 = arith.constant 0 : i32
    return %arg0, %c0_i32, %c0_i32_0 : i32, i32, i32
  }
  func.func @transform_2(%arg0: i32) -> (i32, i32, i32) {
    %c0_i32 = arith.constant 0 : i32
    %c0_i32_0 = arith.constant 0 : i32
    %c0_i32_1 = arith.constant 0 : i32
    return %arg0, %c0_i32, %c0_i32_0 : i32, i32, i32
  }
  func.func @transform_3(%arg0: i32) -> (i32, i32, i32) {
    %c0_i32 = arith.constant 0 : i32
    %c0_i32_0 = arith.constant 0 : i32
    %c0_i32_1 = arith.constant 0 : i32
    return %arg0, %c0_i32, %c0_i32_0 : i32, i32, i32
  }
  func.func @transform_4(%arg0: i32) -> (i32, i32) {
    %c0_i32 = arith.constant 0 : i32
    %c0_i32_0 = arith.constant 0 : i32
    %c0_i32_1 = arith.constant 0 : i32
    return %c0_i32, %c0_i32_0 : i32, i32
  }
  func.func @transform_5(%arg0: i32) -> (i32, i32) {
    %c0_i32 = arith.constant 0 : i32
    %c0_i32_0 = arith.constant 0 : i32
    %c0_i32_1 = arith.constant 0 : i32
    return %c0_i32, %c0_i32_0 : i32, i32
  }
  func.func @transform_6(%arg0: i32) -> (i32, i32) {
    %c0_i32 = arith.constant 0 : i32
    %c0_i32_0 = arith.constant 0 : i32
    %c0_i32_1 = arith.constant 0 : i32
    return %c0_i32, %c0_i32_0 : i32, i32
  }
  func.func @transform_7(%arg0: i32) -> (i32, i32) {
    %c0_i32 = arith.constant 0 : i32
    %c0_i32_0 = arith.constant 0 : i32
    %c0_i32_1 = arith.constant 0 : i32
    return %c0_i32, %c0_i32_0 : i32, i32
  }
  func.func @transform_8(%arg0: i32) -> (i32, i32) {
    %c0_i32 = arith.constant 0 : i32
    %c0_i32_0 = arith.constant 0 : i32
    %c0_i32_1 = arith.constant 0 : i32
    return %c0_i32, %c0_i32_0 : i32, i32
  }
  func.func @transform_9(%arg0: i32) -> (i32, i32) {
    %c0_i32 = arith.constant 0 : i32
    %c0_i32_0 = arith.constant 0 : i32
    %c0_i32_1 = arith.constant 0 : i32
    return %c0_i32, %c0_i32_0 : i32, i32
  }
  func.func @transform_10(%arg0: i32) -> (i32, i32) {
    %c0_i32 = arith.constant 0 : i32
    %c0_i32_0 = arith.constant 0 : i32
    %c0_i32_1 = arith.constant 0 : i32
    return %c0_i32, %c0_i32_0 : i32, i32
  }
  func.func @transform_11(%arg0: i32) -> (i32, i32) {
    %c0_i32 = arith.constant 0 : i32
    %c0_i32_0 = arith.constant 0 : i32
    %c0_i32_1 = arith.constant 0 : i32
    return %c0_i32, %c0_i32_0 : i32, i32
  }
  func.func @transform_12(%arg0: i32) -> (i32, i32) {
    %c0_i32 = arith.constant 0 : i32
    %c0_i32_0 = arith.constant 0 : i32
    %c0_i32_1 = arith.constant 0 : i32
    return %c0_i32, %c0_i32_0 : i32, i32
  }
  func.func @transform_13(%arg0: i32) -> (i32, i32) {
    %c0_i32 = arith.constant 0 : i32
    %c0_i32_0 = arith.constant 0 : i32
    %c0_i32_1 = arith.constant 0 : i32
    return %c0_i32, %c0_i32_0 : i32, i32
  }
  func.func @transform_14(%arg0: i32) -> (i32, i32) {
    %c0_i32 = arith.constant 0 : i32
    %c0_i32_0 = arith.constant 0 : i32
    %c0_i32_1 = arith.constant 0 : i32
    return %c0_i32, %c0_i32_0 : i32, i32
  }
  func.func @transform_15(%arg0: i32) -> (i32, i32) {
    %c0_i32 = arith.constant 0 : i32
    %c0_i32_0 = arith.constant 0 : i32
    %c0_i32_1 = arith.constant 0 : i32
    return %c0_i32, %c0_i32_0 : i32, i32
  }
  func.func @transform_16(%arg0: i32) -> (i32, i32) {
    %c0_i32 = arith.constant 0 : i32
    %c0_i32_0 = arith.constant 0 : i32
    %c0_i32_1 = arith.constant 0 : i32
    return %c0_i32, %c0_i32_0 : i32, i32
  }
  func.func @transform_17(%arg0: i32) -> (i32, i32) {
    %c0_i32 = arith.constant 0 : i32
    %c0_i32_0 = arith.constant 0 : i32
    %c0_i32_1 = arith.constant 0 : i32
    return %c0_i32, %c0_i32_0 : i32, i32
  }
  func.func @transform_18(%arg0: i32) -> (i32, i32) {
    %c0_i32 = arith.constant 0 : i32
    %c0_i32_0 = arith.constant 0 : i32
    %c0_i32_1 = arith.constant 0 : i32
    return %c0_i32, %c0_i32_0 : i32, i32
  }
  func.func @transform_19(%arg0: i32) -> (i32, i32) {
    %c0_i32 = arith.constant 0 : i32
    %c0_i32_0 = arith.constant 0 : i32
    %c0_i32_1 = arith.constant 0 : i32
    return %c0_i32, %c0_i32_0 : i32, i32
  }
  func.func @transform_20(%arg0: i32) -> (i32, i32) {
    %c0_i32 = arith.constant 0 : i32
    %c0_i32_0 = arith.constant 0 : i32
    %c0_i32_1 = arith.constant 0 : i32
    return %c0_i32, %c0_i32_0 : i32, i32
  }
  func.func @transform_21(%arg0: i32) -> (i32, i32) {
    %c0_i32 = arith.constant 0 : i32
    %c0_i32_0 = arith.constant 0 : i32
    %c0_i32_1 = arith.constant 0 : i32
    return %c0_i32, %c0_i32_0 : i32, i32
  }
  func.func @transform_22(%arg0: i32) -> (i32, i32) {
    %c0_i32 = arith.constant 0 : i32
    %c0_i32_0 = arith.constant 0 : i32
    %c0_i32_1 = arith.constant 0 : i32
    return %c0_i32, %c0_i32_0 : i32, i32
  }
  func.func @transform_23(%arg0: i32) -> (i32, i32) {
    %c0_i32 = arith.constant 0 : i32
    %c0_i32_0 = arith.constant 0 : i32
    %c0_i32_1 = arith.constant 0 : i32
    return %c0_i32, %c0_i32_0 : i32, i32
  }
  func.func @transform_24(%arg0: i32) -> (i32, i32, i32) {
    %c0_i32 = arith.constant 0 : i32
    %c0_i32_0 = arith.constant 0 : i32
    %c0_i32_1 = arith.constant 0 : i32
    return %arg0, %c0_i32, %c0_i32_0 : i32, i32, i32
  }
  func.func @transform_25(%arg0: i32) -> (i32, i32, i32, i32) {
    %c0_i32 = arith.constant 0 : i32
    %c0_i32_0 = arith.constant 0 : i32
    %c0_i32_1 = arith.constant 0 : i32
    %c0_i32_2 = arith.constant 0 : i32
    return %arg0, %c0_i32, %c0_i32_0, %c0_i32_1 : i32, i32, i32, i32
  }
  func.func @transform_26(%arg0: i32) -> (i32, i32, i32, i32) {
    %c0_i32 = arith.constant 0 : i32
    %c0_i32_0 = arith.constant 0 : i32
    %c0_i32_1 = arith.constant 0 : i32
    %c0_i32_2 = arith.constant 0 : i32
    return %arg0, %c0_i32, %c0_i32_0, %c0_i32_1 : i32, i32, i32, i32
  }
}

module attributes {stable_mosaic.version = 11 : i64} {
  func.func @dec_layer_kernel(%arg0: i32, %arg1: memref<1x8x32xf32, #tpu.memory_space<vmem>>, %arg2: memref<1x8x32xf32, #tpu.memory_space<vmem>>, %arg3: memref<1x1x8xf32, #tpu.memory_space<vmem>>, %arg4: memref<1x1x8xf32, #tpu.memory_space<vmem>>, %arg5: memref<32x96xf32, #tpu.memory_space<vmem>>, %arg6: memref<1x96xf32, #tpu.memory_space<vmem>>, %arg7: memref<32x32xf32, #tpu.memory_space<vmem>>, %arg8: memref<1x32xf32, #tpu.memory_space<vmem>>, %arg9: memref<32x32xf32, #tpu.memory_space<vmem>>, %arg10: memref<1x32xf32, #tpu.memory_space<vmem>>, %arg11: memref<32x64xf32, #tpu.memory_space<vmem>>, %arg12: memref<1x64xf32, #tpu.memory_space<vmem>>, %arg13: memref<32x32xf32, #tpu.memory_space<vmem>>, %arg14: memref<1x32xf32, #tpu.memory_space<vmem>>, %arg15: memref<32x64xf32, #tpu.memory_space<vmem>>, %arg16: memref<1x64xf32, #tpu.memory_space<vmem>>, %arg17: memref<64x32xf32, #tpu.memory_space<vmem>>, %arg18: memref<1x32xf32, #tpu.memory_space<vmem>>, %arg19: memref<1x32xf32, #tpu.memory_space<vmem>>, %arg20: memref<1x32xf32, #tpu.memory_space<vmem>>, %arg21: memref<1x32xf32, #tpu.memory_space<vmem>>, %arg22: memref<1x32xf32, #tpu.memory_space<vmem>>, %arg23: memref<1x32xf32, #tpu.memory_space<vmem>>, %arg24: memref<1x32xf32, #tpu.memory_space<vmem>>, %arg25: memref<1x8x32xf32, #tpu.memory_space<vmem>>, %arg26: memref<1x4x8x8xf32, #tpu.memory_space<vmem>>, %arg27: memref<1x4x8x8xf32, #tpu.memory_space<vmem>>) attributes {dimension_semantics = [#tpu.dimension_semantics<parallel>], iteration_bounds = array<i64: 2>, scalar_prefetch = 0 : i64, scratch_operands = 0 : i64, tpu.core_type = #tpu.core_type<tc>, window_params = [{transform_indices = @transform_0, window_bounds = array<i64: 1, 8, 32>}, {transform_indices = @transform_1, window_bounds = array<i64: 1, 8, 32>}, {transform_indices = @transform_2, window_bounds = array<i64: 1, 1, 8>}, {transform_indices = @transform_3, window_bounds = array<i64: 1, 1, 8>}, {pipeline_mode = #tpu.pipeline_mode<synchronous>, transform_indices = @transform_4, window_bounds = array<i64: 32, 96>}, {pipeline_mode = #tpu.pipeline_mode<synchronous>, transform_indices = @transform_5, window_bounds = array<i64: 1, 96>}, {pipeline_mode = #tpu.pipeline_mode<synchronous>, transform_indices = @transform_6, window_bounds = array<i64: 32, 32>}, {pipeline_mode = #tpu.pipeline_mode<synchronous>, transform_indices = @transform_7, window_bounds = array<i64: 1, 32>}, {pipeline_mode = #tpu.pipeline_mode<synchronous>, transform_indices = @transform_8, window_bounds = array<i64: 32, 32>}, {pipeline_mode = #tpu.pipeline_mode<synchronous>, transform_indices = @transform_9, window_bounds = array<i64: 1, 32>}, {pipeline_mode = #tpu.pipeline_mode<synchronous>, transform_indices = @transform_10, window_bounds = array<i64: 32, 64>}, {pipeline_mode = #tpu.pipeline_mode<synchronous>, transform_indices = @transform_11, window_bounds = array<i64: 1, 64>}, {pipeline_mode = #tpu.pipeline_mode<synchronous>, transform_indices = @transform_12, window_bounds = array<i64: 32, 32>}, {pipeline_mode = #tpu.pipeline_mode<synchronous>, transform_indices = @transform_13, window_bounds = array<i64: 1, 32>}, {pipeline_mode = #tpu.pipeline_mode<synchronous>, transform_indices = @transform_14, window_bounds = array<i64: 32, 64>}, {pipeline_mode = #tpu.pipeline_mode<synchronous>, transform_indices = @transform_15, window_bounds = array<i64: 1, 64>}, {pipeline_mode = #tpu.pipeline_mode<synchronous>, transform_indices = @transform_16, window_bounds = array<i64: 64, 32>}, {pipeline_mode = #tpu.pipeline_mode<synchronous>, transform_indices = @transform_17, window_bounds = array<i64: 1, 32>}, {pipeline_mode = #tpu.pipeline_mode<synchronous>, transform_indices = @transform_18, window_bounds = array<i64: 1, 32>}, {pipeline_mode = #tpu.pipeline_mode<synchronous>, transform_indices = @transform_19, window_bounds = array<i64: 1, 32>}, {pipeline_mode = #tpu.pipeline_mode<synchronous>, transform_indices = @transform_20, window_bounds = array<i64: 1, 32>}, {pipeline_mode = #tpu.pipeline_mode<synchronous>, transform_indices = @transform_21, window_bounds = array<i64: 1, 32>}, {pipeline_mode = #tpu.pipeline_mode<synchronous>, transform_indices = @transform_22, window_bounds = array<i64: 1, 32>}, {pipeline_mode = #tpu.pipeline_mode<synchronous>, transform_indices = @transform_23, window_bounds = array<i64: 1, 32>}, {transform_indices = @transform_24, window_bounds = array<i64: 1, 8, 32>}, {transform_indices = @transform_25, window_bounds = array<i64: 1, 4, 8, 8>}, {transform_indices = @transform_26, window_bounds = array<i64: 1, 4, 8, 8>}]} {
    %c0 = arith.constant 0 : index
    %c0_0 = arith.constant 0 : index
    %c0_1 = arith.constant 0 : index
    %0 = vector.load %arg1[%c0, %c0_0, %c0_1] : memref<1x8x32xf32, #tpu.memory_space<vmem>>, vector<1x8x32xf32>
    %1 = vector.shape_cast %0 : vector<1x8x32xf32> to vector<8x32xf32>
    %c0_2 = arith.constant 0 : index
    %c0_3 = arith.constant 0 : index
    %c0_4 = arith.constant 0 : index
    %2 = vector.load %arg2[%c0_2, %c0_3, %c0_4] : memref<1x8x32xf32, #tpu.memory_space<vmem>>, vector<1x8x32xf32>
    %3 = vector.shape_cast %2 : vector<1x8x32xf32> to vector<8x32xf32>
    %c0_5 = arith.constant 0 : index
    %c0_6 = arith.constant 0 : index
    %c0_7 = arith.constant 0 : index
    %4 = vector.load %arg3[%c0_5, %c0_6, %c0_7] : memref<1x1x8xf32, #tpu.memory_space<vmem>>, vector<1x1x8xf32>
    %5 = vector.shape_cast %4 : vector<1x1x8xf32> to vector<1x8xf32>
    %cst = arith.constant 0.000000e+00 : f32
    %6 = vector.broadcast %cst : f32 to vector<1x8xf32>
    %7 = arith.cmpf ogt, %5, %6 : vector<1x8xf32>
    %c0_8 = arith.constant 0 : index
    %c0_9 = arith.constant 0 : index
    %c0_10 = arith.constant 0 : index
    %8 = vector.load %arg4[%c0_8, %c0_9, %c0_10] : memref<1x1x8xf32, #tpu.memory_space<vmem>>, vector<1x1x8xf32>
    %9 = vector.shape_cast %8 : vector<1x1x8xf32> to vector<1x8xf32>
    %cst_11 = arith.constant 0.000000e+00 : f32
    %10 = vector.broadcast %cst_11 : f32 to vector<1x8xf32>
    %11 = arith.cmpf ogt, %9, %10 : vector<1x8xf32>
    %12 = tpu.iota {dimensions = array<i32: 0>} : vector<8x8xi32>
    %13 = tpu.iota {dimensions = array<i32: 1>} : vector<8x8xi32>
    %14 = arith.cmpi sgt, %13, %12 : vector<8x8xi32>
    %15 = vector.broadcast %7 : vector<1x8xi1> to vector<8x8xi1>
    %16 = arith.ori %15, %14 : vector<8x8xi1>
    %17 = vector.shape_cast %16 : vector<8x8xi1> to vector<1x8x8xi1>
    %18 = vector.shape_cast %11 : vector<1x8xi1> to vector<1x1x8xi1>
    %c0_12 = arith.constant 0 : index
    %c0_13 = arith.constant 0 : index
    %19 = vector.load %arg5[%c0_12, %c0_13] : memref<32x96xf32, #tpu.memory_space<vmem>>, vector<32x96xf32>
    %c0_14 = arith.constant 0 : index
    %c0_15 = arith.constant 0 : index
    %20 = vector.load %arg6[%c0_14, %c0_15] : memref<1x96xf32, #tpu.memory_space<vmem>>, vector<1x96xf32>
    %c0_16 = arith.constant 0 : index
    %c0_17 = arith.constant 0 : index
    %21 = vector.load %arg7[%c0_16, %c0_17] : memref<32x32xf32, #tpu.memory_space<vmem>>, vector<32x32xf32>
    %c0_18 = arith.constant 0 : index
    %c0_19 = arith.constant 0 : index
    %22 = vector.load %arg8[%c0_18, %c0_19] : memref<1x32xf32, #tpu.memory_space<vmem>>, vector<1x32xf32>
    %cst_20 = arith.constant dense<0.000000e+00> : vector<8x96xf32>
    %23 = tpu.matmul %1, %19, %cst_20 {dimension_numbers = #tpu.dot_dimension_numbers<[1], [0], [0], [1], [0, 0, 1, 1], [], []>} : vector<8x32xf32>, vector<32x96xf32>, vector<8x96xf32> -> vector<8x96xf32>
    %24 = vector.broadcast %20 : vector<1x96xf32> to vector<8x96xf32>
    %25 = arith.addf %23, %24 : vector<8x96xf32>
    %26 = vector.extract_strided_slice %25 {offsets = [0, 0], sizes = [8, 32], strides = [1, 1]} : vector<8x96xf32> to vector<8x32xf32>
    %27 = vector.extract_strided_slice %25 {offsets = [0, 32], sizes = [8, 32], strides = [1, 1]} : vector<8x96xf32> to vector<8x32xf32>
    %28 = vector.extract_strided_slice %25 {offsets = [0, 64], sizes = [8, 32], strides = [1, 1]} : vector<8x96xf32> to vector<8x32xf32>
    %29 = vector.extract_strided_slice %26 {offsets = [0, 0], sizes = [8, 8], strides = [1, 1]} : vector<8x32xf32> to vector<8x8xf32>
    %30 = vector.extract_strided_slice %26 {offsets = [0, 8], sizes = [8, 8], strides = [1, 1]} : vector<8x32xf32> to vector<8x8xf32>
    %31 = vector.extract_strided_slice %26 {offsets = [0, 16], sizes = [8, 8], strides = [1, 1]} : vector<8x32xf32> to vector<8x8xf32>
    %32 = vector.extract_strided_slice %26 {offsets = [0, 24], sizes = [8, 8], strides = [1, 1]} : vector<8x32xf32> to vector<8x8xf32>
    %33 = vector.shape_cast %29 : vector<8x8xf32> to vector<1x8x8xf32>
    %34 = vector.shape_cast %30 : vector<8x8xf32> to vector<1x8x8xf32>
    %35 = vector.shape_cast %31 : vector<8x8xf32> to vector<1x8x8xf32>
    %36 = vector.shape_cast %32 : vector<8x8xf32> to vector<1x8x8xf32>
    %37 = tpu.concatenate %33, %34, %35, %36 in 0 : vector<1x8x8xf32>, vector<1x8x8xf32>, vector<1x8x8xf32>, vector<1x8x8xf32> -> vector<4x8x8xf32>
    %38 = vector.extract_strided_slice %27 {offsets = [0, 0], sizes = [8, 8], strides = [1, 1]} : vector<8x32xf32> to vector<8x8xf32>
    %39 = vector.extract_strided_slice %27 {offsets = [0, 8], sizes = [8, 8], strides = [1, 1]} : vector<8x32xf32> to vector<8x8xf32>
    %40 = vector.extract_strided_slice %27 {offsets = [0, 16], sizes = [8, 8], strides = [1, 1]} : vector<8x32xf32> to vector<8x8xf32>
    %41 = vector.extract_strided_slice %27 {offsets = [0, 24], sizes = [8, 8], strides = [1, 1]} : vector<8x32xf32> to vector<8x8xf32>
    %42 = vector.shape_cast %38 : vector<8x8xf32> to vector<1x8x8xf32>
    %43 = vector.shape_cast %39 : vector<8x8xf32> to vector<1x8x8xf32>
    %44 = vector.shape_cast %40 : vector<8x8xf32> to vector<1x8x8xf32>
    %45 = vector.shape_cast %41 : vector<8x8xf32> to vector<1x8x8xf32>
    %46 = tpu.concatenate %42, %43, %44, %45 in 0 : vector<1x8x8xf32>, vector<1x8x8xf32>, vector<1x8x8xf32>, vector<1x8x8xf32> -> vector<4x8x8xf32>
    %47 = vector.extract_strided_slice %28 {offsets = [0, 0], sizes = [8, 8], strides = [1, 1]} : vector<8x32xf32> to vector<8x8xf32>
    %48 = vector.extract_strided_slice %28 {offsets = [0, 8], sizes = [8, 8], strides = [1, 1]} : vector<8x32xf32> to vector<8x8xf32>
    %49 = vector.extract_strided_slice %28 {offsets = [0, 16], sizes = [8, 8], strides = [1, 1]} : vector<8x32xf32> to vector<8x8xf32>
    %50 = vector.extract_strided_slice %28 {offsets = [0, 24], sizes = [8, 8], strides = [1, 1]} : vector<8x32xf32> to vector<8x8xf32>
    %51 = vector.shape_cast %47 : vector<8x8xf32> to vector<1x8x8xf32>
    %52 = vector.shape_cast %48 : vector<8x8xf32> to vector<1x8x8xf32>
    %53 = vector.shape_cast %49 : vector<8x8xf32> to vector<1x8x8xf32>
    %54 = vector.shape_cast %50 : vector<8x8xf32> to vector<1x8x8xf32>
    %55 = tpu.concatenate %51, %52, %53, %54 in 0 : vector<1x8x8xf32>, vector<1x8x8xf32>, vector<1x8x8xf32>, vector<1x8x8xf32> -> vector<4x8x8xf32>
    "tpu.trace_start"() <{level = 10 : i32, message = "hqd,hkd->hqk"}> : () -> ()
    %cst_21 = arith.constant dense<0.000000e+00> : vector<4x8x8xf32>
    %56 = tpu.matmul %37, %46, %cst_21 {dimension_numbers = #tpu.dot_dimension_numbers<[2], [2], [1], [1], [0, 0, 0, 1, 1, 1], [0], [0]>} : vector<4x8x8xf32>, vector<4x8x8xf32>, vector<4x8x8xf32> -> vector<4x8x8xf32>
    "tpu.trace_stop"() : () -> ()
    %cst_22 = arith.constant 0.353553385 : f32
    %57 = vector.broadcast %cst_22 : f32 to vector<4x8x8xf32>
    %58 = arith.mulf %56, %57 : vector<4x8x8xf32>
    %cst_23 = arith.constant -1.000000e+09 : f32
    %59 = vector.shape_cast %17 : vector<1x8x8xi1> to vector<1x8x8xi1>
    %60 = vector.broadcast %59 : vector<1x8x8xi1> to vector<4x8x8xi1>
    %61 = vector.broadcast %cst_23 : f32 to vector<4x8x8xf32>
    %62 = arith.select %60, %61, %58 : vector<4x8x8xi1>, vector<4x8x8xf32>
    %cst_24 = arith.constant dense<0xFF800000> : vector<4x8xf32>
    %63 = vector.multi_reduction <maximumf>, %62, %cst_24 [2] : vector<4x8x8xf32> to vector<4x8xf32>
    %64 = vector.shape_cast %63 : vector<4x8xf32> to vector<4x8x1xf32>
    %65 = vector.broadcast %64 : vector<4x8x1xf32> to vector<4x8x8xf32>
    %66 = arith.subf %62, %65 : vector<4x8x8xf32>
    %67 = math.exp %66 : vector<4x8x8xf32>
    %cst_25 = arith.constant dense<0.000000e+00> : vector<4x8xf32>
    %68 = vector.multi_reduction <add>, %67, %cst_25 [2] : vector<4x8x8xf32> to vector<4x8xf32>
    %69 = vector.shape_cast %68 : vector<4x8xf32> to vector<4x8x1xf32>
    %70 = tpu.reciprocal %69 : vector<4x8x1xf32> -> vector<4x8x1xf32>
    %71 = vector.broadcast %70 : vector<4x8x1xf32> to vector<4x8x8xf32>
    %72 = arith.mulf %67, %71 : vector<4x8x8xf32>
    "tpu.trace_start"() <{level = 10 : i32, message = "hqk,hkd->hqd"}> : () -> ()
    %cst_26 = arith.constant dense<0.000000e+00> : vector<4x8x8xf32>
    %73 = tpu.matmul %72, %55, %cst_26 {dimension_numbers = #tpu.dot_dimension_numbers<[2], [1], [1], [2], [0, 0, 0, 1, 1, 2], [0], [0]>} : vector<4x8x8xf32>, vector<4x8x8xf32>, vector<4x8x8xf32> -> vector<4x8x8xf32>
    "tpu.trace_stop"() : () -> ()
    %74 = vector.extract_strided_slice %73 {offsets = [0, 0, 0], sizes = [1, 8, 8], strides = [1, 1, 1]} : vector<4x8x8xf32> to vector<1x8x8xf32>
    %75 = vector.shape_cast %74 : vector<1x8x8xf32> to vector<8x8xf32>
    %76 = vector.extract_strided_slice %73 {offsets = [1, 0, 0], sizes = [1, 8, 8], strides = [1, 1, 1]} : vector<4x8x8xf32> to vector<1x8x8xf32>
    %77 = vector.shape_cast %76 : vector<1x8x8xf32> to vector<8x8xf32>
    %78 = vector.extract_strided_slice %73 {offsets = [2, 0, 0], sizes = [1, 8, 8], strides = [1, 1, 1]} : vector<4x8x8xf32> to vector<1x8x8xf32>
    %79 = vector.shape_cast %78 : vector<1x8x8xf32> to vector<8x8xf32>
    %80 = vector.extract_strided_slice %73 {offsets = [3, 0, 0], sizes = [1, 8, 8], strides = [1, 1, 1]} : vector<4x8x8xf32> to vector<1x8x8xf32>
    %81 = vector.shape_cast %80 : vector<1x8x8xf32> to vector<8x8xf32>
    %82 = tpu.concatenate %75, %77, %79, %81 in 1 : vector<8x8xf32>, vector<8x8xf32>, vector<8x8xf32>, vector<8x8xf32> -> vector<8x32xf32>
    %cst_27 = arith.constant dense<0.000000e+00> : vector<8x32xf32>
    %83 = tpu.matmul %82, %21, %cst_27 {dimension_numbers = #tpu.dot_dimension_numbers<[1], [0], [0], [1], [0, 0, 1, 1], [], []>} : vector<8x32xf32>, vector<32x32xf32>, vector<8x32xf32> -> vector<8x32xf32>
    %84 = vector.broadcast %22 : vector<1x32xf32> to vector<8x32xf32>
    %85 = arith.addf %83, %84 : vector<8x32xf32>
    %c0_28 = arith.constant 0 : index
    %c0_29 = arith.constant 0 : index
    %c0_30 = arith.constant 0 : index
    %c0_31 = arith.constant 0 : index
    %86 = vector.load %arg26[%c0_28, %c0_29, %c0_30, %c0_31] : memref<1x4x8x8xf32, #tpu.memory_space<vmem>>, vector<1x4x8x8xf32>
    %87 = vector.shape_cast %86 : vector<1x4x8x8xf32> to vector<4x8x8xf32>
    %88 = vector.shape_cast %72 : vector<4x8x8xf32> to vector<1x4x8x8xf32>
    tpu.vector_store %arg26[%c0_28, %c0_29, %c0_30, %c0_31], %88 {strides = array<i32>} : memref<1x4x8x8xf32, #tpu.memory_space<vmem>>, vector<1x4x8x8xf32>,
    %89 = arith.addf %1, %85 : vector<8x32xf32>
    %c0_32 = arith.constant 0 : index
    %c0_33 = arith.constant 0 : index
    %90 = vector.load %arg19[%c0_32, %c0_33] : memref<1x32xf32, #tpu.memory_space<vmem>>, vector<1x32xf32>
    %c0_34 = arith.constant 0 : index
    %c0_35 = arith.constant 0 : index
    %91 = vector.load %arg20[%c0_34, %c0_35] : memref<1x32xf32, #tpu.memory_space<vmem>>, vector<1x32xf32>
    %cst_36 = arith.constant dense<0.000000e+00> : vector<8xf32>
    %92 = vector.multi_reduction <add>, %89, %cst_36 [1] : vector<8x32xf32> to vector<8xf32>
    %93 = vector.shape_cast %92 : vector<8xf32> to vector<8x1xf32>
    %cst_37 = arith.constant 3.200000e+01 : f32
    %94 = vector.broadcast %cst_37 : f32 to vector<8x1xf32>
    %95 = arith.divf %93, %94 : vector<8x1xf32>
    %96 = vector.broadcast %95 : vector<8x1xf32> to vector<8x32xf32>
    %97 = arith.subf %89, %96 : vector<8x32xf32>
    %98 = arith.mulf %97, %97 : vector<8x32xf32>
    %cst_38 = arith.constant dense<0.000000e+00> : vector<8xf32>
    %99 = vector.multi_reduction <add>, %98, %cst_38 [1] : vector<8x32xf32> to vector<8xf32>
    %100 = vector.shape_cast %99 : vector<8xf32> to vector<8x1xf32>
    %cst_39 = arith.constant 3.200000e+01 : f32
    %101 = vector.broadcast %cst_39 : f32 to vector<8x1xf32>
    %102 = arith.divf %100, %101 : vector<8x1xf32>
    %cst_40 = arith.constant 9.99999996E-13 : f32
    %103 = vector.broadcast %cst_40 : f32 to vector<8x1xf32>
    %104 = arith.addf %102, %103 : vector<8x1xf32>
    %105 = math.rsqrt %104 : vector<8x1xf32>
    %106 = vector.broadcast %105 : vector<8x1xf32> to vector<8x32xf32>
    %107 = arith.mulf %97, %106 : vector<8x32xf32>
    %108 = vector.broadcast %90 : vector<1x32xf32> to vector<8x32xf32>
    %109 = arith.mulf %107, %108 : vector<8x32xf32>
    %110 = vector.broadcast %91 : vector<1x32xf32> to vector<8x32xf32>
    %111 = arith.addf %109, %110 : vector<8x32xf32>
    %c0_41 = arith.constant 0 : index
    %c0_42 = arith.constant 0 : index
    %112 = vector.load %arg9[%c0_41, %c0_42] : memref<32x32xf32, #tpu.memory_space<vmem>>, vector<32x32xf32>
    %c0_43 = arith.constant 0 : index
    %c0_44 = arith.constant 0 : index
    %113 = vector.load %arg10[%c0_43, %c0_44] : memref<1x32xf32, #tpu.memory_space<vmem>>, vector<1x32xf32>
    %c0_45 = arith.constant 0 : index
    %c0_46 = arith.constant 0 : index
    %114 = vector.load %arg11[%c0_45, %c0_46] : memref<32x64xf32, #tpu.memory_space<vmem>>, vector<32x64xf32>
    %c0_47 = arith.constant 0 : index
    %c0_48 = arith.constant 0 : index
    %115 = vector.load %arg12[%c0_47, %c0_48] : memref<1x64xf32, #tpu.memory_space<vmem>>, vector<1x64xf32>
    %c0_49 = arith.constant 0 : index
    %c0_50 = arith.constant 0 : index
    %116 = vector.load %arg13[%c0_49, %c0_50] : memref<32x32xf32, #tpu.memory_space<vmem>>, vector<32x32xf32>
    %c0_51 = arith.constant 0 : index
    %c0_52 = arith.constant 0 : index
    %117 = vector.load %arg14[%c0_51, %c0_52] : memref<1x32xf32, #tpu.memory_space<vmem>>, vector<1x32xf32>
    %cst_53 = arith.constant dense<0.000000e+00> : vector<8x32xf32>
    %118 = tpu.matmul %111, %112, %cst_53 {dimension_numbers = #tpu.dot_dimension_numbers<[1], [0], [0], [1], [0, 0, 1, 1], [], []>} : vector<8x32xf32>, vector<32x32xf32>, vector<8x32xf32> -> vector<8x32xf32>
    %119 = vector.broadcast %113 : vector<1x32xf32> to vector<8x32xf32>
    %120 = arith.addf %118, %119 : vector<8x32xf32>
    %cst_54 = arith.constant dense<0.000000e+00> : vector<8x64xf32>
    %121 = tpu.matmul %3, %114, %cst_54 {dimension_numbers = #tpu.dot_dimension_numbers<[1], [0], [0], [1], [0, 0, 1, 1], [], []>} : vector<8x32xf32>, vector<32x64xf32>, vector<8x64xf32> -> vector<8x64xf32>
    %122 = vector.broadcast %115 : vector<1x64xf32> to vector<8x64xf32>
    %123 = arith.addf %121, %122 : vector<8x64xf32>
    %124 = vector.extract_strided_slice %123 {offsets = [0, 0], sizes = [8, 32], strides = [1, 1]} : vector<8x64xf32> to vector<8x32xf32>
    %125 = vector.extract_strided_slice %123 {offsets = [0, 32], sizes = [8, 32], strides = [1, 1]} : vector<8x64xf32> to vector<8x32xf32>
    %126 = vector.extract_strided_slice %120 {offsets = [0, 0], sizes = [8, 8], strides = [1, 1]} : vector<8x32xf32> to vector<8x8xf32>
    %127 = vector.extract_strided_slice %120 {offsets = [0, 8], sizes = [8, 8], strides = [1, 1]} : vector<8x32xf32> to vector<8x8xf32>
    %128 = vector.extract_strided_slice %120 {offsets = [0, 16], sizes = [8, 8], strides = [1, 1]} : vector<8x32xf32> to vector<8x8xf32>
    %129 = vector.extract_strided_slice %120 {offsets = [0, 24], sizes = [8, 8], strides = [1, 1]} : vector<8x32xf32> to vector<8x8xf32>
    %130 = vector.shape_cast %126 : vector<8x8xf32> to vector<1x8x8xf32>
    %131 = vector.shape_cast %127 : vector<8x8xf32> to vector<1x8x8xf32>
    %132 = vector.shape_cast %128 : vector<8x8xf32> to vector<1x8x8xf32>
    %133 = vector.shape_cast %129 : vector<8x8xf32> to vector<1x8x8xf32>
    %134 = tpu.concatenate %130, %131, %132, %133 in 0 : vector<1x8x8xf32>, vector<1x8x8xf32>, vector<1x8x8xf32>, vector<1x8x8xf32> -> vector<4x8x8xf32>
    %135 = vector.extract_strided_slice %124 {offsets = [0, 0], sizes = [8, 8], strides = [1, 1]} : vector<8x32xf32> to vector<8x8xf32>
    %136 = vector.extract_strided_slice %124 {offsets = [0, 8], sizes = [8, 8], strides = [1, 1]} : vector<8x32xf32> to vector<8x8xf32>
    %137 = vector.extract_strided_slice %124 {offsets = [0, 16], sizes = [8, 8], strides = [1, 1]} : vector<8x32xf32> to vector<8x8xf32>
    %138 = vector.extract_strided_slice %124 {offsets = [0, 24], sizes = [8, 8], strides = [1, 1]} : vector<8x32xf32> to vector<8x8xf32>
    %139 = vector.shape_cast %135 : vector<8x8xf32> to vector<1x8x8xf32>
    %140 = vector.shape_cast %136 : vector<8x8xf32> to vector<1x8x8xf32>
    %141 = vector.shape_cast %137 : vector<8x8xf32> to vector<1x8x8xf32>
    %142 = vector.shape_cast %138 : vector<8x8xf32> to vector<1x8x8xf32>
    %143 = tpu.concatenate %139, %140, %141, %142 in 0 : vector<1x8x8xf32>, vector<1x8x8xf32>, vector<1x8x8xf32>, vector<1x8x8xf32> -> vector<4x8x8xf32>
    %144 = vector.extract_strided_slice %125 {offsets = [0, 0], sizes = [8, 8], strides = [1, 1]} : vector<8x32xf32> to vector<8x8xf32>
    %145 = vector.extract_strided_slice %125 {offsets = [0, 8], sizes = [8, 8], strides = [1, 1]} : vector<8x32xf32> to vector<8x8xf32>
    %146 = vector.extract_strided_slice %125 {offsets = [0, 16], sizes = [8, 8], strides = [1, 1]} : vector<8x32xf32> to vector<8x8xf32>
    %147 = vector.extract_strided_slice %125 {offsets = [0, 24], sizes = [8, 8], strides = [1, 1]} : vector<8x32xf32> to vector<8x8xf32>
    %148 = vector.shape_cast %144 : vector<8x8xf32> to vector<1x8x8xf32>
    %149 = vector.shape_cast %145 : vector<8x8xf32> to vector<1x8x8xf32>
    %150 = vector.shape_cast %146 : vector<8x8xf32> to vector<1x8x8xf32>
    %151 = vector.shape_cast %147 : vector<8x8xf32> to vector<1x8x8xf32>
    %152 = tpu.concatenate %148, %149, %150, %151 in 0 : vector<1x8x8xf32>, vector<1x8x8xf32>, vector<1x8x8xf32>, vector<1x8x8xf32> -> vector<4x8x8xf32>
    "tpu.trace_start"() <{level = 10 : i32, message = "hqd,hkd->hqk"}> : () -> ()
    %cst_55 = arith.constant dense<0.000000e+00> : vector<4x8x8xf32>
    %153 = tpu.matmul %134, %143, %cst_55 {dimension_numbers = #tpu.dot_dimension_numbers<[2], [2], [1], [1], [0, 0, 0, 1, 1, 1], [0], [0]>} : vector<4x8x8xf32>, vector<4x8x8xf32>, vector<4x8x8xf32> -> vector<4x8x8xf32>
    "tpu.trace_stop"() : () -> ()
    %cst_56 = arith.constant 0.353553385 : f32
    %154 = vector.broadcast %cst_56 : f32 to vector<4x8x8xf32>
    %155 = arith.mulf %153, %154 : vector<4x8x8xf32>
    %cst_57 = arith.constant -1.000000e+09 : f32
    %156 = vector.shape_cast %18 : vector<1x1x8xi1> to vector<1x1x8xi1>
    %157 = vector.broadcast %156 : vector<1x1x8xi1> to vector<4x8x8xi1>
    %158 = vector.broadcast %cst_57 : f32 to vector<4x8x8xf32>
    %159 = arith.select %157, %158, %155 : vector<4x8x8xi1>, vector<4x8x8xf32>
    %cst_58 = arith.constant dense<0xFF800000> : vector<4x8xf32>
    %160 = vector.multi_reduction <maximumf>, %159, %cst_58 [2] : vector<4x8x8xf32> to vector<4x8xf32>
    %161 = vector.shape_cast %160 : vector<4x8xf32> to vector<4x8x1xf32>
    %162 = vector.broadcast %161 : vector<4x8x1xf32> to vector<4x8x8xf32>
    %163 = arith.subf %159, %162 : vector<4x8x8xf32>
    %164 = math.exp %163 : vector<4x8x8xf32>
    %cst_59 = arith.constant dense<0.000000e+00> : vector<4x8xf32>
    %165 = vector.multi_reduction <add>, %164, %cst_59 [2] : vector<4x8x8xf32> to vector<4x8xf32>
    %166 = vector.shape_cast %165 : vector<4x8xf32> to vector<4x8x1xf32>
    %167 = tpu.reciprocal %166 : vector<4x8x1xf32> -> vector<4x8x1xf32>
    %168 = vector.broadcast %167 : vector<4x8x1xf32> to vector<4x8x8xf32>
    %169 = arith.mulf %164, %168 : vector<4x8x8xf32>
    "tpu.trace_start"() <{level = 10 : i32, message = "hqk,hkd->hqd"}> : () -> ()
    %cst_60 = arith.constant dense<0.000000e+00> : vector<4x8x8xf32>
    %170 = tpu.matmul %169, %152, %cst_60 {dimension_numbers = #tpu.dot_dimension_numbers<[2], [1], [1], [2], [0, 0, 0, 1, 1, 2], [0], [0]>} : vector<4x8x8xf32>, vector<4x8x8xf32>, vector<4x8x8xf32> -> vector<4x8x8xf32>
    "tpu.trace_stop"() : () -> ()
    %171 = vector.extract_strided_slice %170 {offsets = [0, 0, 0], sizes = [1, 8, 8], strides = [1, 1, 1]} : vector<4x8x8xf32> to vector<1x8x8xf32>
    %172 = vector.shape_cast %171 : vector<1x8x8xf32> to vector<8x8xf32>
    %173 = vector.extract_strided_slice %170 {offsets = [1, 0, 0], sizes = [1, 8, 8], strides = [1, 1, 1]} : vector<4x8x8xf32> to vector<1x8x8xf32>
    %174 = vector.shape_cast %173 : vector<1x8x8xf32> to vector<8x8xf32>
    %175 = vector.extract_strided_slice %170 {offsets = [2, 0, 0], sizes = [1, 8, 8], strides = [1, 1, 1]} : vector<4x8x8xf32> to vector<1x8x8xf32>
    %176 = vector.shape_cast %175 : vector<1x8x8xf32> to vector<8x8xf32>
    %177 = vector.extract_strided_slice %170 {offsets = [3, 0, 0], sizes = [1, 8, 8], strides = [1, 1, 1]} : vector<4x8x8xf32> to vector<1x8x8xf32>
    %178 = vector.shape_cast %177 : vector<1x8x8xf32> to vector<8x8xf32>
    %179 = tpu.concatenate %172, %174, %176, %178 in 1 : vector<8x8xf32>, vector<8x8xf32>, vector<8x8xf32>, vector<8x8xf32> -> vector<8x32xf32>
    %cst_61 = arith.constant dense<0.000000e+00> : vector<8x32xf32>
    %180 = tpu.matmul %179, %116, %cst_61 {dimension_numbers = #tpu.dot_dimension_numbers<[1], [0], [0], [1], [0, 0, 1, 1], [], []>} : vector<8x32xf32>, vector<32x32xf32>, vector<8x32xf32> -> vector<8x32xf32>
    %181 = vector.broadcast %117 : vector<1x32xf32> to vector<8x32xf32>
    %182 = arith.addf %180, %181 : vector<8x32xf32>
    %c0_62 = arith.constant 0 : index
    %c0_63 = arith.constant 0 : index
    %c0_64 = arith.constant 0 : index
    %c0_65 = arith.constant 0 : index
    %183 = vector.load %arg27[%c0_62, %c0_63, %c0_64, %c0_65] : memref<1x4x8x8xf32, #tpu.memory_space<vmem>>, vector<1x4x8x8xf32>
    %184 = vector.shape_cast %183 : vector<1x4x8x8xf32> to vector<4x8x8xf32>
    %185 = vector.shape_cast %169 : vector<4x8x8xf32> to vector<1x4x8x8xf32>
    tpu.vector_store %arg27[%c0_62, %c0_63, %c0_64, %c0_65], %185 {strides = array<i32>} : memref<1x4x8x8xf32, #tpu.memory_space<vmem>>, vector<1x4x8x8xf32>,
    %186 = arith.addf %111, %182 : vector<8x32xf32>
    %c0_66 = arith.constant 0 : index
    %c0_67 = arith.constant 0 : index
    %187 = vector.load %arg21[%c0_66, %c0_67] : memref<1x32xf32, #tpu.memory_space<vmem>>, vector<1x32xf32>
    %c0_68 = arith.constant 0 : index
    %c0_69 = arith.constant 0 : index
    %188 = vector.load %arg22[%c0_68, %c0_69] : memref<1x32xf32, #tpu.memory_space<vmem>>, vector<1x32xf32>
    %cst_70 = arith.constant dense<0.000000e+00> : vector<8xf32>
    %189 = vector.multi_reduction <add>, %186, %cst_70 [1] : vector<8x32xf32> to vector<8xf32>
    %190 = vector.shape_cast %189 : vector<8xf32> to vector<8x1xf32>
    %cst_71 = arith.constant 3.200000e+01 : f32
    %191 = vector.broadcast %cst_71 : f32 to vector<8x1xf32>
    %192 = arith.divf %190, %191 : vector<8x1xf32>
    %193 = vector.broadcast %192 : vector<8x1xf32> to vector<8x32xf32>
    %194 = arith.subf %186, %193 : vector<8x32xf32>
    %195 = arith.mulf %194, %194 : vector<8x32xf32>
    %cst_72 = arith.constant dense<0.000000e+00> : vector<8xf32>
    %196 = vector.multi_reduction <add>, %195, %cst_72 [1] : vector<8x32xf32> to vector<8xf32>
    %197 = vector.shape_cast %196 : vector<8xf32> to vector<8x1xf32>
    %cst_73 = arith.constant 3.200000e+01 : f32
    %198 = vector.broadcast %cst_73 : f32 to vector<8x1xf32>
    %199 = arith.divf %197, %198 : vector<8x1xf32>
    %cst_74 = arith.constant 9.99999996E-13 : f32
    %200 = vector.broadcast %cst_74 : f32 to vector<8x1xf32>
    %201 = arith.addf %199, %200 : vector<8x1xf32>
    %202 = math.rsqrt %201 : vector<8x1xf32>
    %203 = vector.broadcast %202 : vector<8x1xf32> to vector<8x32xf32>
    %204 = arith.mulf %194, %203 : vector<8x32xf32>
    %205 = vector.broadcast %187 : vector<1x32xf32> to vector<8x32xf32>
    %206 = arith.mulf %204, %205 : vector<8x32xf32>
    %207 = vector.broadcast %188 : vector<1x32xf32> to vector<8x32xf32>
    %208 = arith.addf %206, %207 : vector<8x32xf32>
    %c0_75 = arith.constant 0 : index
    %c0_76 = arith.constant 0 : index
    %209 = vector.load %arg15[%c0_75, %c0_76] : memref<32x64xf32, #tpu.memory_space<vmem>>, vector<32x64xf32>
    %c0_77 = arith.constant 0 : index
    %c0_78 = arith.constant 0 : index
    %210 = vector.load %arg16[%c0_77, %c0_78] : memref<1x64xf32, #tpu.memory_space<vmem>>, vector<1x64xf32>
    %c0_79 = arith.constant 0 : index
    %c0_80 = arith.constant 0 : index
    %211 = vector.load %arg17[%c0_79, %c0_80] : memref<64x32xf32, #tpu.memory_space<vmem>>, vector<64x32xf32>
    %c0_81 = arith.constant 0 : index
    %c0_82 = arith.constant 0 : index
    %212 = vector.load %arg18[%c0_81, %c0_82] : memref<1x32xf32, #tpu.memory_space<vmem>>, vector<1x32xf32>
    %cst_83 = arith.constant dense<0.000000e+00> : vector<8x64xf32>
    %213 = tpu.matmul %208, %209, %cst_83 {dimension_numbers = #tpu.dot_dimension_numbers<[1], [0], [0], [1], [0, 0, 1, 1], [], []>} : vector<8x32xf32>, vector<32x64xf32>, vector<8x64xf32> -> vector<8x64xf32>
    %214 = vector.broadcast %210 : vector<1x64xf32> to vector<8x64xf32>
    %215 = arith.addf %213, %214 : vector<8x64xf32>
    %cst_84 = arith.constant 5.000000e-01 : f32
    %216 = vector.broadcast %cst_84 : f32 to vector<8x64xf32>
    %217 = arith.mulf %216, %215 : vector<8x64xf32>
    %cst_85 = arith.constant 0.707106769 : f32
    %218 = vector.broadcast %cst_85 : f32 to vector<8x64xf32>
    %219 = arith.mulf %215, %218 : vector<8x64xf32>
    %220 = math.erf %219 : vector<8x64xf32>
    %cst_86 = arith.constant 1.000000e+00 : f32
    %221 = vector.broadcast %cst_86 : f32 to vector<8x64xf32>
    %222 = arith.addf %221, %220 : vector<8x64xf32>
    %223 = arith.mulf %217, %222 : vector<8x64xf32>
    %cst_87 = arith.constant dense<0.000000e+00> : vector<8x32xf32>
    %224 = tpu.matmul %223, %211, %cst_87 {dimension_numbers = #tpu.dot_dimension_numbers<[1], [0], [0], [1], [0, 0, 1, 1], [], []>} : vector<8x64xf32>, vector<64x32xf32>, vector<8x32xf32> -> vector<8x32xf32>
    %225 = vector.broadcast %212 : vector<1x32xf32> to vector<8x32xf32>
    %226 = arith.addf %224, %225 : vector<8x32xf32>
    %227 = arith.addf %208, %226 : vector<8x32xf32>
    %c0_88 = arith.constant 0 : index
    %c0_89 = arith.constant 0 : index
    %228 = vector.load %arg23[%c0_88, %c0_89] : memref<1x32xf32, #tpu.memory_space<vmem>>, vector<1x32xf32>
    %c0_90 = arith.constant 0 : index
    %c0_91 = arith.constant 0 : index
    %229 = vector.load %arg24[%c0_90, %c0_91] : memref<1x32xf32, #tpu.memory_space<vmem>>, vector<1x32xf32>
    %cst_92 = arith.constant dense<0.000000e+00> : vector<8xf32>
    %230 = vector.multi_reduction <add>, %227, %cst_92 [1] : vector<8x32xf32> to vector<8xf32>
    %231 = vector.shape_cast %230 : vector<8xf32> to vector<8x1xf32>
    %cst_93 = arith.constant 3.200000e+01 : f32
    %232 = vector.broadcast %cst_93 : f32 to vector<8x1xf32>
    %233 = arith.divf %231, %232 : vector<8x1xf32>
    %234 = vector.broadcast %233 : vector<8x1xf32> to vector<8x32xf32>
    %235 = arith.subf %227, %234 : vector<8x32xf32>
    %236 = arith.mulf %235, %235 : vector<8x32xf32>
    %cst_94 = arith.constant dense<0.000000e+00> : vector<8xf32>
    %237 = vector.multi_reduction <add>, %236, %cst_94 [1] : vector<8x32xf32> to vector<8xf32>
    %238 = vector.shape_cast %237 : vector<8xf32> to vector<8x1xf32>
    %cst_95 = arith.constant 3.200000e+01 : f32
    %239 = vector.broadcast %cst_95 : f32 to vector<8x1xf32>
    %240 = arith.divf %238, %239 : vector<8x1xf32>
    %cst_96 = arith.constant 9.99999996E-13 : f32
    %241 = vector.broadcast %cst_96 : f32 to vector<8x1xf32>
    %242 = arith.addf %240, %241 : vector<8x1xf32>
    %243 = math.rsqrt %242 : vector<8x1xf32>
    %244 = vector.broadcast %243 : vector<8x1xf32> to vector<8x32xf32>
    %245 = arith.mulf %235, %244 : vector<8x32xf32>
    %246 = vector.broadcast %228 : vector<1x32xf32> to vector<8x32xf32>
    %247 = arith.mulf %245, %246 : vector<8x32xf32>
    %248 = vector.broadcast %229 : vector<1x32xf32> to vector<8x32xf32>
    %249 = arith.addf %247, %248 : vector<8x32xf32>
    %c0_97 = arith.constant 0 : index
    %c0_98 = arith.constant 0 : index
    %c0_99 = arith.constant 0 : index
    %250 = vector.load %arg25[%c0_97, %c0_98, %c0_99] : memref<1x8x32xf32, #tpu.memory_space<vmem>>, vector<1x8x32xf32>
    %251 = vector.shape_cast %250 : vector<1x8x32xf32> to vector<8x32xf32>
    %252 = vector.shape_cast %249 : vector<8x32xf32> to vector<1x8x32xf32>
    tpu.vector_store %arg25[%c0_97, %c0_98, %c0_99], %252 {strides = array<i32>} : memref<1x8x32xf32, #tpu.memory_space<vmem>>, vector<1x8x32xf32>,
    return
  }
  func.func @transform_0(%arg0: i32) -> (i32, i32, i32) {
    %c0_i32 = arith.constant 0 : i32
    %c0_i32_0 = arith.constant 0 : i32
    %c0_i32_1 = arith.constant 0 : i32
    return %arg0, %c0_i32, %c0_i32_0 : i32, i32, i32
  }
  func.func @transform_1(%arg0: i32) -> (i32, i32, i32) {
    %c0_i32 = arith.constant 0 : i32
    %c0_i32_0 = arith.constant 0 : i32
    %c0_i32_1 = arith.constant 0 : i32
    return %arg0, %c0_i32, %c0_i32_0 : i32, i32, i32
  }
  func.func @transform_2(%arg0: i32) -> (i32, i32, i32) {
    %c0_i32 = arith.constant 0 : i32
    %c0_i32_0 = arith.constant 0 : i32
    %c0_i32_1 = arith.constant 0 : i32
    return %arg0, %c0_i32, %c0_i32_0 : i32, i32, i32
  }
  func.func @transform_3(%arg0: i32) -> (i32, i32, i32) {
    %c0_i32 = arith.constant 0 : i32
    %c0_i32_0 = arith.constant 0 : i32
    %c0_i32_1 = arith.constant 0 : i32
    return %arg0, %c0_i32, %c0_i32_0 : i32, i32, i32
  }
  func.func @transform_4(%arg0: i32) -> (i32, i32) {
    %c0_i32 = arith.constant 0 : i32
    %c0_i32_0 = arith.constant 0 : i32
    %c0_i32_1 = arith.constant 0 : i32
    return %c0_i32, %c0_i32_0 : i32, i32
  }
  func.func @transform_5(%arg0: i32) -> (i32, i32) {
    %c0_i32 = arith.constant 0 : i32
    %c0_i32_0 = arith.constant 0 : i32
    %c0_i32_1 = arith.constant 0 : i32
    return %c0_i32, %c0_i32_0 : i32, i32
  }
  func.func @transform_6(%arg0: i32) -> (i32, i32) {
    %c0_i32 = arith.constant 0 : i32
    %c0_i32_0 = arith.constant 0 : i32
    %c0_i32_1 = arith.constant 0 : i32
    return %c0_i32, %c0_i32_0 : i32, i32
  }
  func.func @transform_7(%arg0: i32) -> (i32, i32) {
    %c0_i32 = arith.constant 0 : i32
    %c0_i32_0 = arith.constant 0 : i32
    %c0_i32_1 = arith.constant 0 : i32
    return %c0_i32, %c0_i32_0 : i32, i32
  }
  func.func @transform_8(%arg0: i32) -> (i32, i32) {
    %c0_i32 = arith.constant 0 : i32
    %c0_i32_0 = arith.constant 0 : i32
    %c0_i32_1 = arith.constant 0 : i32
    return %c0_i32, %c0_i32_0 : i32, i32
  }
  func.func @transform_9(%arg0: i32) -> (i32, i32) {
    %c0_i32 = arith.constant 0 : i32
    %c0_i32_0 = arith.constant 0 : i32
    %c0_i32_1 = arith.constant 0 : i32
    return %c0_i32, %c0_i32_0 : i32, i32
  }
  func.func @transform_10(%arg0: i32) -> (i32, i32) {
    %c0_i32 = arith.constant 0 : i32
    %c0_i32_0 = arith.constant 0 : i32
    %c0_i32_1 = arith.constant 0 : i32
    return %c0_i32, %c0_i32_0 : i32, i32
  }
  func.func @transform_11(%arg0: i32) -> (i32, i32) {
    %c0_i32 = arith.constant 0 : i32
    %c0_i32_0 = arith.constant 0 : i32
    %c0_i32_1 = arith.constant 0 : i32
    return %c0_i32, %c0_i32_0 : i32, i32
  }
  func.func @transform_12(%arg0: i32) -> (i32, i32) {
    %c0_i32 = arith.constant 0 : i32
    %c0_i32_0 = arith.constant 0 : i32
    %c0_i32_1 = arith.constant 0 : i32
    return %c0_i32, %c0_i32_0 : i32, i32
  }
  func.func @transform_13(%arg0: i32) -> (i32, i32) {
    %c0_i32 = arith.constant 0 : i32
    %c0_i32_0 = arith.constant 0 : i32
    %c0_i32_1 = arith.constant 0 : i32
    return %c0_i32, %c0_i32_0 : i32, i32
  }
  func.func @transform_14(%arg0: i32) -> (i32, i32) {
    %c0_i32 = arith.constant 0 : i32
    %c0_i32_0 = arith.constant 0 : i32
    %c0_i32_1 = arith.constant 0 : i32
    return %c0_i32, %c0_i32_0 : i32, i32
  }
  func.func @transform_15(%arg0: i32) -> (i32, i32) {
    %c0_i32 = arith.constant 0 : i32
    %c0_i32_0 = arith.constant 0 : i32
    %c0_i32_1 = arith.constant 0 : i32
    return %c0_i32, %c0_i32_0 : i32, i32
  }
  func.func @transform_16(%arg0: i32) -> (i32, i32) {
    %c0_i32 = arith.constant 0 : i32
    %c0_i32_0 = arith.constant 0 : i32
    %c0_i32_1 = arith.constant 0 : i32
    return %c0_i32, %c0_i32_0 : i32, i32
  }
  func.func @transform_17(%arg0: i32) -> (i32, i32) {
    %c0_i32 = arith.constant 0 : i32
    %c0_i32_0 = arith.constant 0 : i32
    %c0_i32_1 = arith.constant 0 : i32
    return %c0_i32, %c0_i32_0 : i32, i32
  }
  func.func @transform_18(%arg0: i32) -> (i32, i32) {
    %c0_i32 = arith.constant 0 : i32
    %c0_i32_0 = arith.constant 0 : i32
    %c0_i32_1 = arith.constant 0 : i32
    return %c0_i32, %c0_i32_0 : i32, i32
  }
  func.func @transform_19(%arg0: i32) -> (i32, i32) {
    %c0_i32 = arith.constant 0 : i32
    %c0_i32_0 = arith.constant 0 : i32
    %c0_i32_1 = arith.constant 0 : i32
    return %c0_i32, %c0_i32_0 : i32, i32
  }
  func.func @transform_20(%arg0: i32) -> (i32, i32) {
    %c0_i32 = arith.constant 0 : i32
    %c0_i32_0 = arith.constant 0 : i32
    %c0_i32_1 = arith.constant 0 : i32
    return %c0_i32, %c0_i32_0 : i32, i32
  }
  func.func @transform_21(%arg0: i32) -> (i32, i32) {
    %c0_i32 = arith.constant 0 : i32
    %c0_i32_0 = arith.constant 0 : i32
    %c0_i32_1 = arith.constant 0 : i32
    return %c0_i32, %c0_i32_0 : i32, i32
  }
  func.func @transform_22(%arg0: i32) -> (i32, i32) {
    %c0_i32 = arith.constant 0 : i32
    %c0_i32_0 = arith.constant 0 : i32
    %c0_i32_1 = arith.constant 0 : i32
    return %c0_i32, %c0_i32_0 : i32, i32
  }
  func.func @transform_23(%arg0: i32) -> (i32, i32) {
    %c0_i32 = arith.constant 0 : i32
    %c0_i32_0 = arith.constant 0 : i32
    %c0_i32_1 = arith.constant 0 : i32
    return %c0_i32, %c0_i32_0 : i32, i32
  }
  func.func @transform_24(%arg0: i32) -> (i32, i32, i32) {
    %c0_i32 = arith.constant 0 : i32
    %c0_i32_0 = arith.constant 0 : i32
    %c0_i32_1 = arith.constant 0 : i32
    return %arg0, %c0_i32, %c0_i32_0 : i32, i32, i32
  }
  func.func @transform_25(%arg0: i32) -> (i32, i32, i32, i32) {
    %c0_i32 = arith.constant 0 : i32
    %c0_i32_0 = arith.constant 0 : i32
    %c0_i32_1 = arith.constant 0 : i32
    %c0_i32_2 = arith.constant 0 : i32
    return %arg0, %c0_i32, %c0_i32_0, %c0_i32_1 : i32, i32, i32, i32
  }
  func.func @transform_26(%arg0: i32) -> (i32, i32, i32, i32) {
    %c0_i32 = arith.constant 0 : i32
    %c0_i32_0 = arith.constant 0 : i32
    %c0_i32_1 = arith.constant 0 : i32
    %c0_i32_2 = arith.constant 0 : i32
    return %arg0, %c0_i32, %c0_i32_0, %c0_i32_1 : i32, i32, i32, i32
  }
}

</mosaic_0001>

<bundles_post_ra>
// kernel: _lambda_.4
= control target key start
LH: loop header
LB: loop body
LE: loop exit
PB: predicated region body
PF: predicated region fallthrough
CT: control target
= control target key end

     0   :  { %s1628_s0 = inlined_call_operand.vmem [shape: f32[2,8,32], index: 0, kind: input, shape index: {}]   ;;  %s1629_s1 = inlined_call_operand.vmem [shape: f32[2,1,8], index: 1, kind: input, shape index: {}]   ;;  %s1630_s2 = inlined_call_operand.vmem [shape: f32[32,96], index: 2, kind: input, shape index: {}]   ;;  %s1631_s3 = inlined_call_operand.vmem [shape: f32[1,96], index: 3, kind: input, shape index: {}]   ;;  %s1632_s4 = inlined_call_operand.vmem [shape: f32[32,32], index: 4, kind: input, shape index: {}]   ;;  %s1633_s5 = inlined_call_operand.vmem [shape: f32[1,32], index: 5, kind: input, shape index: {}]   ;;  %s1634_s6 = inlined_call_operand.vmem [shape: f32[32,64], index: 6, kind: input, shape index: {}]   ;;  %s1635_s7 = inlined_call_operand.vmem [shape: f32[1,64], index: 7, kind: input, shape index: {}]   ;;  %s1636_s8 = inlined_call_operand.vmem [shape: f32[64,32], index: 8, kind: input, shape index: {}]   ;;  %s1637_s9 = inlined_call_operand.vmem [shape: f32[1,32], index: 9, kind: input, shape index: {}]   ;;  %s1638_s10 = inlined_call_operand.vmem [shape: f32[2,8,32], index: 10, kind: output, shape index: {0}]   ;;  %s1639_s11 = inlined_call_operand.hbm [shape: f32[2,4,8,8], index: 11, kind: output, shape index: {1}]  }
   0x1   :  { %1643 = sst [smem:[#allocation5_spill]] %s1628_s0 }
   0x2   :  { %1644 = sst [smem:[#allocation6_spill]] %s1629_s1 }
   0x3   :  { %1645 = sst [smem:[#allocation7_spill]] %s1630_s2 }
   0x4   :  { %1646 = sst [smem:[#allocation8_spill]] %s1631_s3 }
   0x5   :  { %1647 = sst [smem:[#allocation9_spill]] %s1632_s4 }
   0x6   :  { %17 = vsyncpa [#allocation3], 0 }
   0x7   :  { %19 = vsyncpa [#allocation3 + $0x1], 0  ;;  %s1350_s17 = smov 0   ;;  %s1352_s18 = smov 0  }
   0x8   :  { %s1354_s19 = smov 0   ;;  %s1356_s20 = smov 0  }
   0x9 LB: > { %s1371_s21 = sadd.s32 4294967295, %s1277_s20   ;;  %s1102_s22 = sadd.s32 4294967294, %s1277_s20   ;;  %s1277_s20 = sphi %s1356_s20, %s1663_s20   ;;  %s1273_s19 = sphi %s1354_s19, %s1662_s19   ;;  %s1269_s18 = sphi %s1352_s18, %s1661_s18   ;;  %s1265_s17 = sphi %s1350_s17, %s1660_s17  }
   0xa   : > { %s1375_s23 = sadd.s32 1, %s1277_s20   ;;  %s278_s24 = sadd.s32 1, %s1273_s19 }
   0xb   : > { %s275_s25 = ssub.s32 %s1277_s20, %s1375_s23  ;;  %p288_p0 = scmp.ne.s32.totalorder %s1273_s19, %s1269_s18 }
   0xc   : > { %p276_p1 = scmp.eq.s32.totalorder %s275_s25, 0  ;;  %p289_p2 = scmp.eq.s32.totalorder %s1371_s21, 1 }
   0xd   : > { %p294_p3 = scmp.ne.s32.totalorder %s1269_s18, %s1265_s17  ;;  %p295_p4 = scmp.eq.s32.totalorder %s1102_s22, 1 }
   0xe   : > { %s1386_s26 = scalar_select %p276_p1, %s1273_s19, %s278_s24  }
   0xf   : > { %p1388_p5 = por %p289_p2, %p288_p0  ;;  %p1392_p6 = por %p295_p4, %p294_p3 }
  0x10   : > { %p1105_p7 = scmp.ge.s32.totalorder %s1277_s20, 1  ;;  %p350_p8 = scmp.lt.s32.totalorder %s1277_s20, 3 }
  0x12   : > { %p351_p9 = pnand %p1105_p7, %p350_p8 }
  0x13   : > { %s1650_s2 = sld [smem:[#allocation7_spill]] (!%p351_p9)  ;;  %p396_p10 = scmp.lt.s32.totalorder (!%p351_p9), %s1371_s21, 1 }
  0x14   : > { %354 = sbr.rel (%p351_p9) target bundleno = 2037 (0x7f5), region = 60  ;;  %s1651_s0 = sld [smem:[#allocation5_spill]] (!%p351_p9) }
  0x15   : > { %s1652_s3 = sld [smem:[#allocation8_spill]] (!%p351_p9)  ;;  %s1279_s15 = smov (!%p351_p9), 104  }
  0x16   : > { %s1280_s22 = smov (!%p351_p9), 120   ;;  %s1281_s24 = smov (!%p351_p9), 112  }
  0x17   : > { %s1282_s29 = smov (!%p351_p9), 96   ;;  %s1653_s1 = sld [smem:[#allocation6_spill]] (!%p351_p9) }
  0x18   : > { %s1284_s14 = smov (!%p351_p9), 64   ;;  %s1642_s30 = smov (!%p351_p9), 8  }
  0x19   : > { %v413_v0 = vld [vmem:[%s1650_s2 + $0x18] sm:$0xff]  ;;  %v412_v1 = vld [vmem:[%s1650_s2 + $0x10] sm:$0xff]  ;;  %v411_v2 = vld [vmem:[%s1650_s2 + $0x8] sm:$0xff]  ;;  %s1409_s16 = scalar_select %p396_p10, %s1371_s21, 1  ;;  %vm423_vm0 = vcmask 261120   ;;  %vm456_vm1 = vcmask 64512  }
  0x1a   : > { %439 = vmatpush.msra.mxu0 %v413_v0  ;;  %v410_v3 = vld [vmem:[%s1650_s2] sm:$0xff]  ;;  %v1283_v16 = vmov 0   ;;  %s1656_s4 = sld [smem:[#allocation9_spill]] }
  0x1b   : > { %s1640_s25 = sshll.u32 %s1409_s16, 3  ;;  %v1187_v5 = vld [vmem:[%s1652_s3] ss:$0 sm:$0xff] }
  0x1c   : > { %440 = vmatpush.msra.mxu0 %v412_v1  ;;  %s399_s12 = scalar_lea.vmem %s1651_s0, %s1640_s25  ;;  %s1657_s0 = sand.u32 1, %s1269_s18  }
  0x1d   : > { %v1420_v4 = vld [vmem:[%s399_s12] sm:$0xff]  ;;  %s402_s13 = scalar_lea.vmem %s1653_s1, %s1409_s16  ;;  %s1287_s12 = smov 24  }
  0x1e   : > { %441 = vmatpush.msra.mxu0 %v411_v2  ;;  %v408_v15 = vld [vmem:[%s402_s13] sm:$0x1]  ;;  %s989_s25 = scalar_lea.sflag [#allocation3], %s1657_s0 }
  0x1f   : > { %vm409_vm2 = vcmp.gt.f32.partialorder %v408_v15, 0.0 }
  0x20   : > { %442 = vmatpush.msra.mxu0 %v410_v3  ;;  %v563_v17 = vsel %vm409_vm2, 1, %v1283_v16 }
  0x21   : > { %1109 = vmatmul.msk.f32.vlgmr.msra.gmra.mxu0 %vm423_vm0, %v1420_v4  ;;  %v564_v18 = vperm.slane %v563_v17, 0 }
  0x23   : > { %vm1458_vm3 = vcmp.eq.s32.totalorder %v564_v18, 1 }
  0x9e   : > { %v444_v6 = vpop.f32.mrf.mxu0 }
  0x9f   : > { %v1427_v7 = vadd.f32 %v1187_v5, %v444_v6 }
  0xa1   : > { %452 = vrot.lane.b32.xlu1 %v1427_v7, %s1279_s15  ;;  %448 = vrot.lane.b32.xlu0 %v1427_v7, %s1280_s22  ;;  %s1641_s15 = sand.u32 1, %s1269_s18  }
  0xa2   : > { %s1106_s22 = sshll.u32 %s1641_s15, 5 }
  0xa9   : > { %450 = vrot.lane.b32.xlu0 %v1427_v7, %s1281_s24  ;;  %s1494_s24 = scalar_lea.vmem [#allocation2], %s1106_s22 }
  0xaa   : > { %s1004_s22 = sshll.u32 %s1494_s24, 4  ;;  %s1005_s22 = int_to_ptr.vmem [resolvable:$true] %s1004_s22 }
 0x113   : > { %v1432_v8 = vpop.permute.xlu1 %452  ;;  %v1434_v9 = vpop.permute.xlu0 %448 }
 0x114   : > { %533 = vrot.lane.b32.xlu0 %v1432_v8, %s1282_s29  ;;  %481 = vrot.lane.b32.xlu1 %v1434_v9, %s1282_s29 }
 0x11b   : > { %v1438_v10 = vpop.permute.xlu0 %450 }
 0x11c   : > { %507 = vrot.lane.b32.xlu2 %v1438_v10, %s1282_s29  ;;  %v1182_v56 = vpack.i.bf16 %v1438_v10, %v1434_v9 }
 0x124   : > { %454 = vrot.lane.b32.xlu2 %v1427_v7, %s1282_s29  ;;  %s1285_s29 = smov 16  }
 0x176   : > { %v508_v11 = vpop.permute.xlu2 %507 }
 0x177   : > { %1114 = vmatpush.xpose.msk.msra.mxu3 %vm456_vm1, %v508_v11 }
 0x17a   : > { %1115 = vmatmul.msk.f32.vlgmr.msra.gmra.mxu3 %vm456_vm1, %v1438_v10 }
 0x17e   : > { %v455_v12 = vpop.permute.xlu2 %454 }
 0x17f   : > { %1110 = vmatpush.xpose.msk.msra.mxu1 %vm456_vm1, %v455_v12 }
 0x182   : > { %1111 = vmatmul.msk.f32.vlgmr.msra.gmra.mxu1 %vm456_vm1, %v1427_v7 }
 0x186   : > { %v482_v13 = vpop.permute.xlu1 %481  ;;  %v534_v14 = vpop.permute.xlu0 %533 }
 0x187   : > { %1112 = vmatpush.xpose.msk.msra.mxu2 %vm456_vm1, %v482_v13  ;;  %1116 = vmatpush.xpose.msk.msrb.mxu1 %vm456_vm1, %v534_v14 }
 0x18a   : > { %1113 = vmatmul.msk.f32.vlgmr.msra.gmra.mxu2 %vm456_vm1, %v1434_v9  ;;  %1117 = vmatmul.msk.f32.vlgmr.msrb.gmra.mxu1 %vm456_vm1, %v1432_v8 }
 0x1fd   : > { %v530_v19 = vpop.f32.mrf.mxu3 }
 0x1fe   : > { %v561_v21 = vmul.f32 0.35355338, %v530_v19 }
 0x1ff   : > { %v478_v22 = vpop.f32.mrf.mxu1 }
 0x200   : > { %v568_v23 = vsel %vm1458_vm3, -1e+09, %v561_v21  ;;  %v559_v25 = vmul.f32 0.35355338, %v478_v22 }
 0x201   : > { %v576_v24 = vsel %vm456_vm1, %v568_v23, -inf }
 0x202   : > { %577 = vmax.xlane.f32.xlu2 %v576_v24  ;;  %v566_v26 = vsel %vm1458_vm3, -1e+09, %v559_v25 }
 0x203   : > { %v570_v29 = vsel %vm456_vm1, %v566_v26, -inf }
 0x207   : > { %v556_v27 = vpop.f32.mrf.mxu1 }
 0x208   : > { %v562_v28 = vmul.f32 0.35355338, %v556_v27 }
 0x20a   : > { %571 = vmax.xlane.f32.xlu2 %v570_v29  ;;  %v569_v30 = vsel %vm1458_vm3, -1e+09, %v562_v28 }
 0x20b   : > { %v579_v31 = vsel %vm456_vm1, %v569_v30, -inf }
 0x20c   : > { %580 = vmax.xlane.f32.xlu0 %v579_v31 }
 0x20d   : > { %v504_v32 = vpop.f32.mrf.mxu2 }
 0x20e   : > { %v560_v33 = vmul.f32 0.35355338, %v504_v32 }
 0x210   : > { %v567_v34 = vsel %vm1458_vm3, -1e+09, %v560_v33 }
 0x211   : > { %v573_v35 = vsel %vm456_vm1, %v567_v34, -inf }
 0x212   : > { %574 = vmax.xlane.f32.xlu1 %v573_v35 }
 0x275   : > { %v578_v36 = vpop.xlane.xlu2 %577 }
 0x276   : > { %v584_v37 = vsub.f32 %v568_v23, %v578_v36 }
 0x278   : > { %v590_v38 = vmul.f32 1.442695, %v584_v37 }
 0x27a   : > { %1191 = vpow2.f32 %v590_v38 }
 0x27d   : > { %v572_v39 = vpop.xlane.xlu2 %571 }
 0x27e   : > { %v582_v43 = vsub.f32 %v566_v26, %v572_v39 }
 0x27f   : > { %v581_v40 = vpop.xlane.xlu0 %580 }
 0x280   : > { %v1192_v41 = vpop.eup %1191  ;;  %v585_v42 = vsub.f32 %v569_v30, %v581_v40  ;;  %v586_v46 = vmul.f32 1.442695, %v582_v43 }
 0x281   : > { %v600_v44 = vsel %vm456_vm1, %v1192_v41, 0.0 }
 0x282   : > { %v592_v45 = vmul.f32 1.442695, %v585_v42  ;;  %601 = vadd.xlane.f32.xlu2 %v600_v44 }
 0x284   : > { %1193 = vpow2.f32 %v592_v45 }
 0x285   : > { %v575_v47 = vpop.xlane.xlu1 %574  ;;  %1195 = vpow2.f32 %v586_v46 }
 0x286   : > { %v583_v48 = vsub.f32 %v567_v34, %v575_v47 }
 0x288   : > { %v588_v49 = vmul.f32 1.442695, %v583_v48 }
 0x28a   : > { %v1475_v50 = vpop.eup %1193  ;;  %1197 = vpow2.f32 %v588_v49 }
 0x28b   : > { %v603_v51 = vsel %vm456_vm1, %v1475_v50, 0.0  ;;  %v1479_v52 = vpop.eup %1195 }
 0x28c   : > { %604 = vadd.xlane.f32.xlu0 %v603_v51  ;;  %v594_v55 = vsel %vm456_vm1, %v1479_v52, 0.0  ;;  %v417_v51 = vld [vmem:[%s1656_s4 + $0x10] sm:$0xff] }
 0x290   : > { %v1481_v53 = vpop.eup %1197 }
 0x291   : > { %v597_v54 = vsel %vm456_vm1, %v1481_v53, 0.0 }
 0x292   : > { %598 = vadd.xlane.f32.xlu1 %v597_v54 }
 0x294   : > { %595 = vadd.xlane.f32.xlu0 %v594_v55 }
 0x29a   : > { %744 = vrot.lane.b32.xlu2 %v1432_v8, %s1284_s14 }
 0x2a8   : > { %666 = vrot.lane.b32.xlu0 %v1427_v7, %s1284_s14 }
 0x2ab   : > { %1183 = vrot.lane.b32.xlu1 %v1182_v56, %s1284_s14 }
 0x2f5   : > { %v602_v57 = vpop.xlane.xlu2 %601 }
 0x2f6   : > { %1199 = vrcp.f32 %v602_v57  ;;  %v645_v62 = vand.u32 2147483648, %v602_v57  ;;  %v643_v0 = vand.u32 2147483647, %v602_v57  ;;  %vm639_vm5 = vweird.f32 %v602_v57 }
 0x2f8   : > { %v646_v2 = vor.u32 1.1754944e-38, %v645_v62  ;;  %vm644_vm7 = vcmp.eq.f32.partialorder %v643_v0, 8.507059e+37 }
 0x2fc   : > { %v1200_v58 = vpop.eup %1199 }
 0x2fd   : > { %v635_v59 = vmul.f32 %v1200_v58, %v602_v57  ;;  %vm640_vm4 = vweird.f32 %v1200_v58  ;;  %v745_v46 = vpop.permute.xlu2 %744 }
 0x2fe   : > { %vm641_vm6 = vmor %vm639_vm5, %vm640_vm4 }
 0x2ff   : > { %v636_v60 = vsub.f32 1.0, %v635_v59  ;;  %v605_v61 = vpop.xlane.xlu0 %604 }
 0x300   : > { %1201 = vrcp.f32 %v605_v61  ;;  %v659_v12 = vand.u32 2147483648, %v605_v61  ;;  %v657_v14 = vand.u32 2147483647, %v605_v61  ;;  %vm653_vm9 = vweird.f32 %v605_v61 }
 0x301   : > { %v637_v63 = vmul.f32 %v1200_v58, %v636_v60 }
 0x302   : > { %v660_v19 = vor.u32 1.1754944e-38, %v659_v12  ;;  %vm658_vm11 = vcmp.eq.f32.partialorder %v657_v14, 8.507059e+37  ;;  %v851_v14 = vld [vmem:[%s1634_s6 + $0x18] sm:$0xff] }
 0x303   : > { %v638_v1 = vadd.f32 %v1200_v58, %v637_v63 }
 0x305   : > { %v642_v3 = vsel %vm641_vm6, %v1200_v58, %v638_v1  ;;  %v599_v5 = vpop.xlane.xlu1 %598  ;;  %vm783_vm6 = vcmask 130048  }
 0x306   : > { %v1202_v6 = vpop.eup %1201  ;;  %v647_v7 = vsel %vm644_vm7, %v646_v2, %v642_v3  ;;  %1203 = vrcp.f32 %v599_v5  ;;  %v629_v24 = vand.u32 2147483647, %v599_v5  ;;  %v631_v25 = vand.u32 2147483648, %v599_v5 }
 0x307   : > { %v649_v8 = vmul.f32 %v1202_v6, %v605_v61  ;;  %v596_v9 = vpop.xlane.xlu0 %595  ;;  %v664_v10 = vmul.f32 %v1192_v41, %v647_v7  ;;  %vm654_vm8 = vweird.f32 %v1202_v6  ;;  %vm625_vm13 = vweird.f32 %v599_v5  ;;  %v1188_v61 = vld [vmem:[%s1633_s5] ss:$0 sm:$0xff] }
 0x308   : > { %1205 = vrcp.f32 %v596_v9  ;;  %vm655_vm10 = vmor %vm653_vm9, %vm654_vm8  ;;  %v617_v29 = vand.u32 2147483648, %v596_v9  ;;  %v615_v32 = vand.u32 2147483647, %v596_v9  ;;  %v632_v33 = vor.u32 1.1754944e-38, %v631_v25 }
 0x309   : > { %v650_v11 = vsub.f32 1.0, %v649_v8  ;;  %815 = vst.msk [vmem:[%s1494_s24 + $0x10] sm:$0xff] %vm456_vm1, %v664_v10  ;;  %vm630_vm2 = vcmp.eq.f32.partialorder %v629_v24, 8.507059e+37  ;;  %vm611_vm3 = vweird.f32 %v596_v9  ;;  %vm785_vm7 = vcmask 195584  }
 0x30a   : > { %v618_v36 = vor.u32 1.1754944e-38, %v617_v29  ;;  %vm616_vm5 = vcmp.eq.f32.partialorder %v615_v32, 8.507059e+37  ;;  %v1288_v2 = vmov 32.0   ;;  %v1189_v29 = vld [vmem:[%s1635_s7] ss:$0 sm:$0xff] }
 0x30b   : > { %v651_v13 = vmul.f32 %v1202_v6, %v650_v11  ;;  %1207 = vrcp.f32 %v1288_v2 }
 0x30c   : > { %v1204_v15 = vpop.eup %1203 }
 0x30d   : > { %v652_v16 = vadd.f32 %v1202_v6, %v651_v13  ;;  %v621_v17 = vmul.f32 %v1204_v15, %v599_v5  ;;  %vm626_vm12 = vweird.f32 %v1204_v15 }
 0x30e   : > { %v1206_v18 = vpop.eup %1205  ;;  %vm627_vm15 = vmor %vm625_vm13, %vm626_vm12 }
 0x30f   : > { %v656_v20 = vsel %vm655_vm10, %v1202_v6, %v652_v16  ;;  %v622_v21 = vsub.f32 1.0, %v621_v17  ;;  %v607_v22 = vmul.f32 %v1206_v18, %v596_v9  ;;  %vm612_vm14 = vweird.f32 %v1206_v18  ;;  %v849_v16 = vld [vmem:[%s1634_s6 + $0x8] sm:$0xff]  ;;  %v848_v17 = vld [vmem:[%s1634_s6] sm:$0xff] }
 0x310   : > { %v661_v23 = vsel %vm658_vm11, %v660_v19, %v656_v20  ;;  %vm613_vm4 = vmor %vm611_vm3, %vm612_vm14 }
 0x311   : > { %v623_v26 = vmul.f32 %v1204_v15, %v622_v21  ;;  %v608_v27 = vsub.f32 1.0, %v607_v22  ;;  %v665_v28 = vmul.f32 %v1475_v50, %v661_v23  ;;  %v418_v50 = vld [vmem:[%s1656_s4 + $0x18] sm:$0xff]  ;;  %v1208_v3 = vpop.eup %1207 }
 0x312   : > { %v822_v5 = vmul.f32 32.0, %v1208_v3 }
 0x313   : > { %v624_v30 = vadd.f32 %v1204_v15, %v623_v26  ;;  %v609_v31 = vmul.f32 %v1206_v18, %v608_v27  ;;  %816 = vst.msk [vmem:[%s1494_s24 + $0x18] sm:$0xff] %vm456_vm1, %v665_v28 }
 0x314   : > { %v823_v6 = vsub.f32 1.0, %v822_v5 }
 0x315   : > { %v610_v34 = vadd.f32 %v1206_v18, %v609_v31  ;;  %v628_v35 = vsel %vm627_vm15, %v1204_v15, %v624_v30  ;;  %v850_v15 = vld [vmem:[%s1634_s6 + $0x10] sm:$0xff]  ;;  %vm935_vm15 = vcmask 523264  }
 0x316   : > { %v633_v37 = vsel %vm630_vm2, %v632_v33, %v628_v35  ;;  %v824_v7 = vmul.f32 %v1208_v3, %v823_v6  ;;  %v860_v35 = vld [vmem:[%s1636_s8 + $0x38] sm:$0xff] }
 0x317   : > { %v614_v38 = vsel %vm613_vm4, %v1206_v18, %v610_v34  ;;  %v663_v39 = vmul.f32 %v1481_v53, %v633_v37  ;;  %v415_v53 = vld [vmem:[%s1656_s4] sm:$0xff]  ;;  %947 = vmatpush.msrb.mxu0 %v860_v35 }
 0x318   : > { %v619_v40 = vsel %vm616_vm5, %v618_v36, %v614_v38  ;;  %v825_v8 = vadd.f32 %v1208_v3, %v824_v7  ;;  %v859_v38 = vld [vmem:[%s1636_s8 + $0x30] sm:$0xff] }
 0x319   : > { %v662_v41 = vmul.f32 %v1479_v52, %v619_v40  ;;  %814 = vst.msk [vmem:[%s1494_s24 + $0x8] sm:$0xff] %vm456_vm1, %v663_v39  ;;  %v416_v52 = vld [vmem:[%s1656_s4 + $0x8] sm:$0xff]  ;;  %948 = vmatpush.msrb.mxu0 %v859_v38 }
 0x31a   : > { %v667_v42 = vpop.permute.xlu0 %666 }
 0x31b   : > { %687 = vmatpush.msrb.mxu2 %v667_v42  ;;  %813 = vst.msk [vmem:[%s1494_s24] sm:$0xff] %vm456_vm1, %v662_v41 }
 0x31c   : > { %1118 = vmatmul.msk.f32.vlgmr.msrb.gmra.mxu2 %vm456_vm1, %v662_v41  ;;  %v858_v41 = vld [vmem:[%s1636_s8 + $0x28] sm:$0xff] }
 0x31d   : > { %v1184_v43 = vpop.permute.xlu1 %1183  ;;  %805 = vmatpush.msra.mxu2 %v418_v50  ;;  %949 = vmatpush.msrb.mxu0 %v858_v41 }
 0x31e   : > { %v1186_v44 = vunpack.i.h.bf16 %v1184_v43  ;;  %v1185_v45 = vunpack.i.l.bf16 %v1184_v43 }
 0x31f   : > { %806 = vmatpush.msra.mxu2 %v417_v51  ;;  %v854_v51 = vld [vmem:[%s1636_s8 + $0x8] sm:$0xff] }
 0x320   : > { %713 = vmatpush.msrb.mxu3 %v1185_v45  ;;  %739 = vmatpush.msra.mxu1 %v1186_v44  ;;  %v857_v44 = vld [vmem:[%s1636_s8 + $0x20] sm:$0xff] }
 0x321   : > { %1119 = vmatmul.msk.f32.vlgmr.msrb.gmra.mxu3 %vm456_vm1, %v663_v39  ;;  %1120 = vmatmul.msk.f32.vlgmr.msra.gmra.mxu1 %vm456_vm1, %v664_v10 }
 0x322   : > { %765 = vmatpush.msrb.mxu1 %v745_v46  ;;  %807 = vmatpush.msra.mxu2 %v416_v52  ;;  %v856_v46 = vld [vmem:[%s1636_s8 + $0x18] sm:$0xff] }
 0x323   : > { %880 = vmatpush.msra.mxu3 %v851_v14  ;;  %950 = vmatpush.msrb.mxu0 %v857_v44 }
 0x324   : > { %808 = vmatpush.msra.mxu2 %v415_v53  ;;  %v853_v53 = vld [vmem:[%s1636_s8] sm:$0xff] }
 0x325   : > { %881 = vmatpush.msra.mxu3 %v850_v15  ;;  %951 = vmatpush.msrb.mxu0 %v856_v46 }
 0x327   : > { %882 = vmatpush.msra.mxu3 %v849_v16  ;;  %v1190_v16 = vld [vmem:[%s1637_s9] ss:$0 sm:$0xff] }
 0x329   : > { %1121 = vmatmul.msk.f32.vlgmr.msrb.gmra.mxu1 %vm456_vm1, %v665_v28  ;;  %883 = vmatpush.msra.mxu3 %v848_v17 }
 0x39e   : > { %v741_v47 = vpop.f32.mrf.mxu1 }
 0x39f   : > { %775 = vrot.lane.b32.xlu2 %v741_v47, %s1285_s29  ;;  %v689_v55 = vpop.f32.mrf.mxu2 }
 0x3a4   : > { %v715_v48 = vpop.f32.mrf.mxu3 }
 0x3a5   : > { %771 = vrot.lane.b32.xlu1 %v715_v48, %s1642_s30  ;;  %s1131_s30 = sshll.u32 %s1371_s21, 5  ;;  %s1235_s21 = scalar_lea.hbm %s1639_s11, 64 }
 0x3a6   : > { %v767_v49 = vpop.f32.mrf.mxu1  ;;  %s1003_s14 = scalar_lea.hbm %s1639_s11, %s1131_s30 }
 0x3a7   : > { %s1006_s29 = sshll.u32 %s1003_s14, 4  ;;  %s1007_s29 = int_to_ptr.hbm [resolvable:$true] %s1006_s29 }
 0x3a8   : > { %s1229_s15 = sshra.s32 %s1007_s29, 4  ;;  %s1230_s15 = int_to_ptr.hbm [resolvable:$true] %s1229_s15 }
 0x3a9   : > { %s1231_s1 = scalar_lea.hbm %s1230_s15, 32  ;;  %p1236_p0 = scmp.lt.s32.totalorder %s1230_s15, %s1639_s11 }
 0x3aa   : > { %p1232_p11 = scmp.ne.s32.totalorder %s1230_s15, %s1231_s1  ;;  %p1237_p1 = scmp.lt.s32.totalorder %s1235_s21, %s1231_s1 }
 0x3ac   : > { %p1233_p12 = pnand %p1232_p11, %p1388_p5  ;;  %p1238_p2 = por %p1237_p1, %p1236_p0 }
 0x3ad   : > { %779 = vrot.lane.b32.xlu1 %v767_v49, %s1287_s12  ;;  %v855_v49 = vld [vmem:[%s1636_s8 + $0x10] sm:$0xff] }
 0x3ae   : > { %952 = vmatpush.msrb.mxu0 %v855_v49  ;;  %p1234_p13 = pneg %p1233_p12 }
 0x3b0   : > { %953 = vmatpush.msrb.mxu0 %v854_v51  ;;  %p1239_p3 = pnand %p1238_p2, %p1234_p13 }
 0x3b2   : > { %954 = vmatpush.msrb.mxu0 %v853_v53 }
 0x3f9   : > { %v776_v57 = vpop.permute.xlu2 %775 }
 0x417   : > { %v772_v54 = vpop.permute.xlu1 %771 }
 0x418   : > { %v782_v56 = vsel %vm456_vm1, %v689_v55, %v772_v54  ;;  %vm826_vm1 = vweird.f32 %v1208_v3 }
 0x419   : > { %v784_v59 = vsel %vm783_vm6, %v782_v56, %v776_v57  ;;  %v1531_v9 = vsel %vm826_vm1, %v1208_v3, %v825_v8 }
 0x41f   : > { %v780_v58 = vpop.permute.xlu1 %779 }
 0x420   : > { %v786_v60 = vsel %vm785_vm7, %v784_v59, %v780_v58 }
 0x421   : > { %1122 = vmatmul.msk.f32.vlgmr.msra.gmra.mxu2 %vm423_vm0, %v786_v60 }
 0x4a4   : > { %v810_v62 = vpop.f32.mrf.mxu2 }
 0x4a5   : > { %v811_v63 = vadd.f32 %v1188_v61, %v810_v62 }
 0x4a7   : > { %v817_v0 = vadd.f32 %v811_v63, %v1420_v4 }
 0x4a9   : > { %v818_v1 = vsel %vm423_vm0, %v817_v0, 0.0 }
 0x4aa   : > { %819 = vadd.xlane.f32.xlu0 %v818_v1 }
 0x51d   : > { %v820_v10 = vpop.xlane.xlu0 %819 }
 0x51e   : > { %v828_v11 = vmul.f32 %v1531_v9, %v820_v10 }
 0x520   : > { %v829_v12 = vsub.f32 %v817_v0, %v828_v11 }
 0x522   : > { %v830_v13 = vmul.f32 %v829_v12, %v829_v12 }
 0x524   : > { %v831_v4 = vsel %vm423_vm0, %v830_v13, 0.0 }
 0x525   : > { %832 = vadd.xlane.f32.xlu2 %v831_v4 }
 0x598   : > { %v833_v18 = vpop.xlane.xlu2 %832 }
 0x599   : > { %v834_v19 = vmul.f32 %v833_v18, %v1531_v9 }
 0x59b   : > { %v835_v20 = vadd.f32 1e-06, %v834_v19 }
 0x59d   : > { %1209 = vrsqrt.f32 %v835_v20  ;;  %vm842_vm9 = vweird.f32 %v835_v20 }
 0x5a3   : > { %v1210_v21 = vpop.eup %1209 }
 0x5a4   : > { %v837_v22 = vmul.f32 %v1210_v21, %v835_v20  ;;  %vm843_vm8 = vweird.f32 %v1210_v21 }
 0x5a5   : > { %vm844_vm10 = vmor %vm842_vm9, %vm843_vm8 }
 0x5a6   : > { %v838_v23 = vmul.f32 %v1210_v21, %v837_v22 }
 0x5a8   : > { %v839_v24 = vmul.f32 0.5, %v838_v23 }
 0x5aa   : > { %v840_v25 = vsub.f32 1.5, %v839_v24 }
 0x5ac   : > { %v841_v26 = vmul.f32 %v1210_v21, %v840_v25 }
 0x5ae   : > { %v845_v27 = vsel %vm844_vm10, %v1210_v21, %v841_v26 }
 0x5af   : > { %v1548_v28 = vmul.f32 %v845_v27, %v829_v12 }
 0x5b1   : > { %1123 = vmatmul.msk.f32.vlgmr.msra.gmra.mxu3 %vm423_vm0, %v1548_v28 }
 0x634   : > { %v885_v30 = vpop.f32.mrf.mxu3 }
 0x635   : > { %v886_v31 = vadd.f32 %v1189_v29, %v885_v30 }
 0x637   : > { %v889_v32 = vmul.f32 0.70710677, %v886_v31  ;;  %v888_v4 = vmul.f32 0.5, %v886_v31 }
 0x639   : > { %v890_v33 = vmul.f32 %v889_v32, %v889_v32 }
 0x63b   : > { %v891_v34 = vmin.f32 %v890_v33, 16.0 }
 0x63d   : > { %v892_v36 = vmul.f32 2.1237322e-06, %v891_v34  ;;  %v903_v37 = vmul.f32 3.8918573e-05, %v891_v34 }
 0x63f   : > { %v893_v39 = vadd.f32 0.00028619796, %v892_v36  ;;  %v904_v40 = vadd.f32 0.001143296, %v903_v37 }
 0x641   : > { %v894_v42 = vmul.f32 %v893_v39, %v891_v34  ;;  %v905_v43 = vmul.f32 %v904_v40, %v891_v34 }
 0x643   : > { %v906_v45 = vadd.f32 0.014752088, %v905_v43  ;;  %v895_v47 = vadd.f32 0.0036580483, %v894_v42 }
 0x645   : > { %v907_v48 = vmul.f32 %v906_v45, %v891_v34  ;;  %v896_v52 = vmul.f32 %v895_v47, %v891_v34 }
 0x647   : > { %v908_v50 = vadd.f32 0.112945676, %v907_v48  ;;  %v897_v56 = vadd.f32 0.05243302, %v896_v52 }
 0x649   : > { %v909_v54 = vmul.f32 %v908_v50, %v891_v34  ;;  %v898_v59 = vmul.f32 %v897_v56, %v891_v34 }
 0x64b   : > { %v910_v55 = vadd.f32 0.4994258, %v909_v54  ;;  %v899_v60 = vadd.f32 0.18741608, %v898_v59 }
 0x64d   : > { %v911_v57 = vmul.f32 %v910_v55, %v891_v34  ;;  %v900_v62 = vmul.f32 %v899_v60, %v891_v34 }
 0x64f   : > { %v912_v58 = vadd.f32 1.0, %v911_v57  ;;  %v901_v2 = vadd.f32 1.1283791, %v900_v62 }
 0x651   : > { %1211 = vrcp.f32 %v912_v58  ;;  %v924_v1 = vand.u32 2147483648, %v912_v58  ;;  %v922_v5 = vand.u32 2147483647, %v912_v58  ;;  %vm918_vm12 = vweird.f32 %v912_v58 }
 0x652   : > { %v902_v8 = vmul.f32 %v901_v2, %v889_v32 }
 0x653   : > { %v925_v7 = vor.u32 1.1754944e-38, %v924_v1  ;;  %vm923_vm14 = vcmp.eq.f32.partialorder %v922_v5, 8.507059e+37 }
 0x657   : > { %v1212_v61 = vpop.eup %1211 }
 0x658   : > { %v914_v63 = vmul.f32 %v1212_v61, %v912_v58  ;;  %vm919_vm11 = vweird.f32 %v1212_v61 }
 0x659   : > { %vm920_vm13 = vmor %vm918_vm12, %vm919_vm11 }
 0x65a   : > { %v915_v0 = vsub.f32 1.0, %v914_v63 }
 0x65c   : > { %v916_v3 = vmul.f32 %v1212_v61, %v915_v0 }
 0x65e   : > { %v917_v6 = vadd.f32 %v1212_v61, %v916_v3 }
 0x660   : > { %v921_v10 = vsel %vm920_vm13, %v1212_v61, %v917_v6 }
 0x661   : > { %v926_v11 = vsel %vm923_vm14, %v925_v7, %v921_v10 }
 0x662   : > { %v927_v12 = vmul.f32 %v926_v11, %v902_v8 }
 0x664   : > { %v1124_v13 = vclamps-f32 %v927_v12, 1.0 }
 0x666   : > { %v930_v14 = vadd.f32 1.0, %v1124_v13 }
 0x668   : > { %v931_v15 = vmul.f32 %v930_v14, %v888_v4 }
 0x66a   : > { %1125 = vmatmul.msk.f32.vlgmr.msrb.gmra.mxu0 %vm935_vm15, %v931_v15 }
 0x6e7   : > { %v956_v17 = vpop.f32.mrf.mxu0 }
 0x6e8   : > { %v957_v18 = vadd.f32 %v1190_v16, %v956_v17 }
 0x6ea   : > { %v959_v19 = vadd.f32 %v957_v18, %v1548_v28 }
 0x6ec   : > { %v960_v20 = vsel %vm423_vm0, %v959_v19, 0.0 }
 0x6ed   : > { %961 = vadd.xlane.f32.xlu1 %v960_v20 }
 0x760   : > { %v962_v21 = vpop.xlane.xlu1 %961 }
 0x761   : > { %v963_v22 = vmul.f32 %v962_v21, %v1531_v9 }
 0x763   : > { %v964_v23 = vsub.f32 %v959_v19, %v963_v22 }
 0x765   : > { %v965_v24 = vmul.f32 %v964_v23, %v964_v23 }
 0x767   : > { %v966_v25 = vsel %vm423_vm0, %v965_v24, 0.0 }
 0x768   : > { %967 = vadd.xlane.f32.xlu0 %v966_v25 }
 0x769   : > { %1242 = shalt.err (!%p1239_p3)
}
 0x76a   : > { %s1289_s24 = smov 128   ;;  %s1658_s30 = smov 8  }
 0x76b   : > { %1132 = dma.vmem_to_hbm [thread:$0]  (%p1388_p5), %s1005_s22, 512, %s1007_s29, %s989_s25, %s1289_s24, %s1289_s24, %s1658_s30  }
 0x76c   : > { %s1659_s1 = sshll.u32 %s1409_s16, 3 }
 0x76d   : > { %s406_s4 = scalar_lea.vmem %s1638_s10, %s1659_s1 }
 0x7db   : > { %v968_v26 = vpop.xlane.xlu0 %967 }
 0x7dc   : > { %v969_v27 = vmul.f32 %v968_v26, %v1531_v9 }
 0x7de   : > { %v970_v28 = vadd.f32 1e-06, %v969_v27 }
 0x7e0   : > { %1213 = vrsqrt.f32 %v970_v28  ;;  %vm977_vm3 = vweird.f32 %v970_v28 }
 0x7e6   : > { %v1214_v29 = vpop.eup %1213 }
 0x7e7   : > { %v972_v30 = vmul.f32 %v1214_v29, %v970_v28  ;;  %vm978_vm2 = vweird.f32 %v1214_v29 }
 0x7e8   : > { %vm979_vm4 = vmor %vm977_vm3, %vm978_vm2 }
 0x7e9   : > { %v973_v31 = vmul.f32 %v1214_v29, %v972_v30 }
 0x7eb   : > { %v974_v32 = vmul.f32 0.5, %v973_v31 }
 0x7ed   : > { %v975_v33 = vsub.f32 1.5, %v974_v32 }
 0x7ef   : > { %v976_v34 = vmul.f32 %v1214_v29, %v975_v33 }
 0x7f1   : > { %v980_v35 = vsel %vm979_vm4, %v1214_v29, %v976_v34 }
 0x7f2   : > { %v981_v36 = vmul.f32 %v980_v35, %v964_v23 }
 0x7f4   : > { %983 = vst.msk [vmem:[%s406_s4] sm:$0xff] %vm423_vm0, %v981_v36 }
 0x7f5 PF: > { %p1138_p4 = scmp.ge.s32.totalorder %s1277_s20, 2  ;;  %s1028_s27 = sand.u32 1, %s1265_s17  }
 0x7f6   : > { %s1029_s13 = scalar_lea.sflag [#allocation3], %s1028_s27 }
 0x7f7   : > { %p1135_p5 = pnand %p1138_p4, %p1392_p6 }
 0x7f9   : > { %p1136_p7 = pneg %p1135_p5 }
 0x7fb   : > { %1260 = dma.done.wait (%p1136_p7), %s1029_s13, 512  }
 0x7fc   : > { %1262 = vsyncadd (%p1136_p7), %s1029_s13, 4294966784  ;;  %p22_p8 = scmp.ge.s32.totalorder %s1375_s23, 4   ;;  %s1660_s17 = smov %s1269_s18 }
 0x7fd   : > { %s1661_s18 = smov %s1273_s19  ;;  %s1662_s19 = smov %s1386_s26 }
 0x7fe   : > { %s1663_s20 = smov %s1375_s23  ;;  %24 = sbr.rel (!%p22_p8) target bundleno = 9 (0x9), region = 110 }
 0x803   :  { %1035 = vsyncpa [#allocation3], 1 }
 0x804   :  { %1037 = vsyncpa [#allocation3 + $0x1], 1 }

// kernel: _lambda_.6
= control target key start
LH: loop header
LB: loop body
LE: loop exit
PB: predicated region body
PF: predicated region fallthrough
CT: control target
= control target key end

     0   :  { %s3466_s0 = inlined_call_operand.vmem [shape: f32[2,8,32], index: 0, kind: input, shape index: {}]   ;;  %s3467_s1 = inlined_call_operand.vmem [shape: f32[2,8,32], index: 1, kind: input, shape index: {}]   ;;  %s3468_s2 = inlined_call_operand.vmem [shape: f32[2,1,8], index: 2, kind: input, shape index: {}]   ;;  %s3469_s3 = inlined_call_operand.vmem [shape: f32[2,1,8], index: 3, kind: input, shape index: {}]   ;;  %s3470_s4 = inlined_call_operand.vmem [shape: f32[32,96], index: 4, kind: input, shape index: {}]   ;;  %s3471_s5 = inlined_call_operand.vmem [shape: f32[1,96], index: 5, kind: input, shape index: {}]   ;;  %s3472_s6 = inlined_call_operand.vmem [shape: f32[32,32], index: 6, kind: input, shape index: {}]   ;;  %s3473_s7 = inlined_call_operand.vmem [shape: f32[1,32], index: 7, kind: input, shape index: {}]   ;;  %s3474_s8 = inlined_call_operand.vmem [shape: f32[32,32], index: 8, kind: input, shape index: {}]   ;;  %s3475_s9 = inlined_call_operand.vmem [shape: f32[1,32], index: 9, kind: input, shape index: {}]   ;;  %s3476_s10 = inlined_call_operand.vmem [shape: f32[32,64], index: 10, kind: input, shape index: {}]   ;;  %s3477_s11 = inlined_call_operand.vmem [shape: f32[1,64], index: 11, kind: input, shape index: {}]   ;;  %s3478_s12 = inlined_call_operand.vmem [shape: f32[32,32], index: 12, kind: input, shape index: {}]   ;;  %s3479_s13 = inlined_call_operand.vmem [shape: f32[1,32], index: 13, kind: input, shape index: {}]   ;;  %s3480_s14 = inlined_call_operand.vmem [shape: f32[32,64], index: 14, kind: input, shape index: {}]   ;;  %s3481_s15 = inlined_call_operand.vmem [shape: f32[1,64], index: 15, kind: input, shape index: {}]   ;;  %s3482_s16 = inlined_call_operand.vmem [shape: f32[64,32], index: 16, kind: input, shape index: {}]   ;;  %s3483_s17 = inlined_call_operand.vmem [shape: f32[1,32], index: 17, kind: input, shape index: {}]   ;;  %s3484_s18 = inlined_call_operand.hbm [shape: f32[1,32], index: 18, kind: input, shape index: {}]   ;;  %s3485_s19 = inlined_call_operand.hbm [shape: f32[1,32], index: 19, kind: input, shape index: {}]   ;;  %s3486_s20 = inlined_call_operand.hbm [shape: f32[1,32], index: 20, kind: input, shape index: {}]   ;;  %s3487_s21 = inlined_call_operand.hbm [shape: f32[1,32], index: 21, kind: input, shape index: {}]   ;;  %s3488_s22 = inlined_call_operand.hbm [shape: f32[1,32], index: 22, kind: input, shape index: {}]   ;;  %s3489_s23 = inlined_call_operand.hbm [shape: f32[1,32], index: 23, kind: input, shape index: {}]   ;;  %s3490_s24 = inlined_call_operand.vmem [shape: f32[2,8,32], index: 24, kind: output, shape index: {0}]   ;;  %s3491_s25 = inlined_call_operand.hbm [shape: f32[2,4,8,8], index: 25, kind: output, shape index: {1}]   ;;  %s3492_s26 = inlined_call_operand.hbm [shape: f32[2,4,8,8], index: 26, kind: output, shape index: {2}]  }
   0x1   :  { %3518 = sst [smem:[#allocation28_spill]] %s3466_s0 }
   0x2   :  { %3519 = sst [smem:[#allocation29_spill]] %s3467_s1 }
   0x3   :  { %3520 = sst [smem:[#allocation30_spill]] %s3468_s2 }
   0x4   :  { %3521 = sst [smem:[#allocation31_spill]] %s3469_s3 }
   0x5   :  { %3522 = sst [smem:[#allocation32_spill]] %s3470_s4 }
   0x6   :  { %3523 = sst [smem:[#allocation33_spill]] %s3471_s5 }
   0x7   :  { %3524 = sst [smem:[#allocation34_spill]] %s3472_s6 }
   0x8   :  { %3525 = sst [smem:[#allocation35_spill]] %s3473_s7 }
   0x9   :  { %3526 = sst [smem:[#allocation36_spill]] %s3474_s8 }
   0xa   :  { %3527 = sst [smem:[#allocation37_spill]] %s3475_s9 }
   0xb   :  { %3528 = sst [smem:[#allocation38_spill]] %s3476_s10 }
   0xc   :  { %3529 = sst [smem:[#allocation39_spill]] %s3477_s11 }
   0xd   :  { %3530 = sst [smem:[#allocation40_spill]] %s3478_s12 }
   0xe   :  { %3531 = sst [smem:[#allocation41_spill]] %s3479_s13 }
   0xf   :  { %3532 = sst [smem:[#allocation42_spill]] %s3484_s18 }
  0x10   :  { %3533 = sst [smem:[#allocation43_spill]] %s3485_s19 }
  0x11   :  { %3534 = sst [smem:[#allocation44_spill]] %s3486_s20 }
  0x12   :  { %3535 = sst [smem:[#allocation45_spill]] %s3487_s21 }
  0x13   :  { %3536 = sst [smem:[#allocation46_spill]] %s3488_s22 }
  0x14   :  { %3537 = sst [smem:[#allocation47_spill]] %s3490_s24 }
  0x15   :  { %32 = vsyncpa [#allocation3], 0 }
  0x16   :  { %33 = vsyncpa [#allocation6], 0 }
  0x17   :  { %34 = vsyncpa [#allocation9], 0 }
  0x18   :  { %35 = vsyncpa [#allocation12], 0 }
  0x19   :  { %36 = vsyncpa [#allocation4], 0 }
  0x1a   :  { %38 = vsyncpa [#allocation4 + $0x1], 0 }
  0x1b   :  { %39 = vsyncpa [#allocation15], 0 }
  0x1c   :  { %41 = vsyncpa [#allocation15 + $0x1], 0  ;;  %s2955_s27 = smov 0   ;;  %s2957_s3 = smov 0  }
  0x1d   :  { %s2959_s7 = smov 0   ;;  %s2961_s28 = smov 0  }
  0x1e LB: > { %3538 = sst [smem:[#allocation22_spill]] %s2789_s27  ;;  %s2976_s8 = sadd.s32 4294967295, %s2801_s28   ;;  %s2801_s28 = sphi %s2961_s28, %s3584_s28   ;;  %s2797_s7 = sphi %s2959_s7, %s3586_s7   ;;  %s2793_s3 = sphi %s2957_s3, %s3588_s3   ;;  %s2789_s27 = sphi %s2955_s27, %s3587_s27  }
  0x1f   : > { %3539 = sst [smem:[#allocation23_spill]] %s2797_s7  ;;  %s2267_s4 = sadd.s32 4294967294, %s2801_s28  }
  0x20   : > { %3540 = sst [smem:[#allocation24_spill]] %s2801_s28  ;;  %s2980_s29 = sadd.s32 1, %s2801_s28  }
  0x21   : > { %3541 = sst [smem:[#allocation25_spill]] %s2980_s29  ;;  %s604_s0 = sadd.s32 1, %s2797_s7 }
  0x22   : > { %s601_s9 = ssub.s32 %s2801_s28, %s2980_s29  ;;  %p614_p0 = scmp.ne.s32.totalorder %s2797_s7, %s2793_s3 }
  0x23   : > { %p602_p1 = scmp.eq.s32.totalorder %s601_s9, 0  ;;  %p615_p2 = scmp.eq.s32.totalorder %s2976_s8, 1 }
  0x24   : > { %p620_p3 = scmp.ne.s32.totalorder %s2793_s3, %s2789_s27  ;;  %p621_p4 = scmp.eq.s32.totalorder %s2267_s4, 1 }
  0x25   : > { %s2991_s30 = scalar_select %p602_p1, %s2797_s7, %s604_s0  }
  0x26   : > { %p2993_p5 = por %p615_p2, %p614_p0  ;;  %p2997_p6 = por %p621_p4, %p620_p3 }
  0x27   : > { %3542 = sst [smem:[#allocation26_spill]] %s2991_s30  ;;  %p2268_p7 = scmp.ge.s32.totalorder %s2801_s28, 1 }
  0x28   : > { %s3544_s5 = scalar_select %p2997_p6, 1, 0 }
  0x29   : > { %p654_p8 = scmp.lt.s32.totalorder %s2801_s28, 3  ;;  %p2384_p9 = scmp.eq.s32.totalorder %s2976_s8, 0 }
  0x2a   : > { %3545 = sst [smem:[#allocation27_spill]] %s3544_s5  ;;  %s2803_s0 = smov [#allocation5]  }
  0x2b   : > { %p3004_p10 = pnand %p2268_p7, %p654_p8  ;;  %s3547_s19 = sld [smem:[#allocation43_spill]] }
  0x2c   : > { %s722_s9 = sshll.u32 %s2803_s0, 4  ;;  %s3548_s21 = sld [smem:[#allocation45_spill]]  ;;  %s723_s9 = int_to_ptr.vmem [resolvable:$true] %s722_s9 }
  0x2d   : > { %p2358_p11 = pneg %p3004_p10  ;;  %s3550_s18 = sld [smem:[#allocation42_spill]] }
  0x2e   : > { %s2804_s27 = smov [#allocation8]   ;;  %s3551_s20 = sld [smem:[#allocation44_spill]] }
  0x2f   : > { %p3018_p12 = pnand %p2384_p9, %p2358_p11  ;;  %s746_s0 = sshll.u32 %s2804_s27, 4  ;;  %s747_s0 = int_to_ptr.vmem [resolvable:$true] %s746_s0 }
  0x30   : > { %s2805_s28 = smov [#allocation2]   ;;  %s2806_s27 = smov [#allocation7]  }
  0x31   : > { %s720_s4 = sshll.u32 %s3547_s19, 4  ;;  %s710_s24 = sshll.u32 %s2805_s28, 4  ;;  %s721_s4 = int_to_ptr.hbm [resolvable:$true] %s720_s4  ;;  %s711_s24 = int_to_ptr.vmem [resolvable:$true] %s710_s24 }
  0x32   : > { %s744_s29 = sshll.u32 %s3548_s21, 4  ;;  %s734_s6 = sshll.u32 %s2806_s27, 4  ;;  %s745_s29 = int_to_ptr.hbm [resolvable:$true] %s744_s29  ;;  %s735_s6 = int_to_ptr.vmem [resolvable:$true] %s734_s6 }
  0x33   : > { %s708_s19 = sshll.u32 %s3550_s18, 4  ;;  %s3552_s22 = sld [smem:[#allocation46_spill]]  ;;  %s709_s19 = int_to_ptr.hbm [resolvable:$true] %s708_s19 }
  0x34   : > { %2364 = dma.hbm_to_vmem [thread:$0]  (!%p3018_p12), %s721_s4, 16, %s723_s9, [#allocation6]  }
  0x35   : > { %2370 = dma.hbm_to_vmem [thread:$0]  (!%p3018_p12), %s745_s29, 16, %s747_s0, [#allocation9]  }
  0x36   : > { %s732_s21 = sshll.u32 %s3551_s20, 4  ;;  %s768_s7 = sshll.u32 %s3489_s23, 4  ;;  %s733_s21 = int_to_ptr.hbm [resolvable:$true] %s732_s21  ;;  %s769_s7 = int_to_ptr.hbm [resolvable:$true] %s768_s7 }
  0x37   : > { %2361 = dma.hbm_to_vmem [thread:$0]  (!%p3018_p12), %s709_s19, 16, %s711_s24, [#allocation3]  }
  0x38   : > { %2367 = dma.hbm_to_vmem [thread:$0]  (!%p3018_p12), %s733_s21, 16, %s735_s6, [#allocation6]  }
  0x39   : > { %s756_s9 = sshll.u32 %s3552_s22, 4  ;;  %s2807_s28 = smov [#allocation10]   ;;  %s757_s9 = int_to_ptr.hbm [resolvable:$true] %s756_s9 }
  0x3a   : > { %s758_s30 = sshll.u32 %s2807_s28, 4  ;;  %s2808_s19 = smov [#allocation11]   ;;  %s759_s30 = int_to_ptr.vmem [resolvable:$true] %s758_s30 }
  0x3b   : > { %2373 = dma.hbm_to_vmem [thread:$0]  (!%p3018_p12), %s757_s9, 16, %s759_s30, [#allocation9]  }
  0x3c   : > { %s770_s24 = sshll.u32 %s2808_s19, 4  ;;  %809 = sbr.rel (%p3004_p10) target bundleno = 3420 (0xd5c), region = 116  ;;  %s771_s24 = int_to_ptr.vmem [resolvable:$true] %s770_s24 }
  0x3d   : > { %2376 = dma.hbm_to_vmem [thread:$0]  (!%p3018_p12), %s769_s7, 16, %s771_s24, [#allocation12]  }
  0x41   : > { %2764 = dma.done.wait (%p2384_p9), [#allocation3], 16  }
  0x42   : > { %2766 = vsyncadd (%p2384_p9), [#allocation3], 4294967280 }
  0x43   : > { %2768 = dma.done.wait (%p2384_p9), [#allocation6], 32  }
  0x44   : > { %2770 = vsyncadd (%p2384_p9), [#allocation6], 4294967264 }
  0x45   : > { %2772 = dma.done.wait (%p2384_p9), [#allocation9], 32  }
  0x46   : > { %2774 = vsyncadd (%p2384_p9), [#allocation9], 4294967264 }
  0x47   : > { %2776 = dma.done.wait (%p2384_p9), [#allocation12], 16  }
  0x48   : > { %2778 = vsyncadd (%p2384_p9), [#allocation12], 4294967280  ;;  %p923_p13 = scmp.lt.s32.totalorder %s2976_s8, 1  ;;  %s3553_s6 = sld [smem:[#allocation32_spill]]  ;;  %vm969_vm0 = vcmask 261120   ;;  %vm1002_vm1 = vcmask 64512   ;;  %v947_v16 = vlaneseq }
  0x49   : > { %s3554_s0 = sld [smem:[#allocation28_spill]]  ;;  %s3504_s4 = smov 96   ;;  %v2813_v17 = vmov 0  }
  0x4a   : > { %s3066_s21 = scalar_select %p923_p13, %s2976_s8, 1  ;;  %v948_v19 = vshrl.u32 %v947_v16, 7  ;;  %v950_v20 = vand.u32 127, %v947_v16 }
  0x4b   : > { %s3555_s1 = sld [smem:[#allocation33_spill]]  ;;  %s3506_s9 = smov 104  }
  0x4c   : > { %s3069_s5 = sshll.u32 %s3066_s21, 3  ;;  %s3510_s29 = smov 120   ;;  %vm951_vm3 = vcmp.gt.s32.totalorder %v950_v20, %v948_v19 }
  0x4d   : > { %s3556_s30 = sld [smem:[#allocation30_spill]]  ;;  %s2814_s24 = smov 64  }
  0x4e   : > { %v959_v0 = vld [vmem:[%s3553_s6 + $0x18] sm:$0xff]  ;;  %v958_v1 = vld [vmem:[%s3553_s6 + $0x10] sm:$0xff]  ;;  %v957_v2 = vld [vmem:[%s3553_s6 + $0x8] sm:$0xff]  ;;  %s3155_s10 = sand.u32 1, %s2793_s3   ;;  %s3514_s28 = smov 8  }
  0x4f   : > { %s926_s7 = scalar_lea.vmem %s3554_s0, %s3069_s5  ;;  %985 = vmatpush.msra.mxu0 %v959_v0  ;;  %v956_v3 = vld [vmem:[%s3553_s6] sm:$0xff]  ;;  %s3508_s0 = smov 112  }
  0x50   : > { %v3087_v4 = vld [vmem:[%s926_s7] sm:$0xff]  ;;  %s3503_s27 = sshll.u32 %s3155_s10, 5  ;;  %s3513_s7 = smov 16  }
  0x51   : > { %986 = vmatpush.msra.mxu0 %v958_v1  ;;  %v2456_v5 = vld [vmem:[%s3555_s1] ss:$0 sm:$0xff]  ;;  %s3161_s1 = scalar_lea.vmem [#allocation13], %s3503_s27  ;;  %s3557_s27 = sld [smem:[#allocation34_spill]] }
  0x52   : > { %s3565_s11 = sld [smem:[#allocation39_spill]]  ;;  %s3569_s6 = smov 104  }
  0x53   : > { %987 = vmatpush.msra.mxu0 %v957_v2  ;;  %s933_s19 = scalar_lea.vmem %s3556_s30, %s3066_s21  ;;  %s3516_s30 = smov 24  }
  0x54   : > { %v943_v15 = vld [vmem:[%s933_s19] sm:$0x1]  ;;  %s3570_s20 = sld [smem:[#allocation31_spill]] }
  0x55   : > { %988 = vmatpush.msra.mxu0 %v956_v3  ;;  %vm944_vm2 = vcmp.gt.f32.partialorder %v943_v15, 0.0  ;;  %s3578_s12 = sld [smem:[#allocation40_spill]] }
  0x56   : > { %2288 = vmatmul.msk.f32.vlgmr.msra.gmra.mxu0 %vm969_vm0, %v3087_v4  ;;  %v952_v18 = vsel %vm944_vm2, 1, %v2813_v17  ;;  %s3579_s13 = sld [smem:[#allocation41_spill]] }
  0x57   : > { %v953_v21 = vperm.slane %v952_v18, 0 }
  0x59   : > { %vm954_vm4 = vcmp.eq.s32.totalorder %v953_v21, 1 }
  0x5a   : > { %vm955_vm5 = vmor %vm954_vm4, %vm951_vm3  ;;  %s936_s22 = scalar_lea.vmem %s3570_s20, %s3066_s21  ;;  %s3573_s21 = smov 96  }
  0x5b   : > { %s2328_s20 = sshll.u32 %s2976_s8, 5 }
  0xd3   : > { %v990_v6 = vpop.f32.mrf.mxu0 }
  0xd4   : > { %v3094_v7 = vadd.f32 %v2456_v5, %v990_v6 }
  0xd6   : > { %1000 = vrot.lane.b32.xlu2 %v3094_v7, %s3504_s4  ;;  %998 = vrot.lane.b32.xlu1 %v3094_v7, %s3506_s9 }
  0xd7   : > { %994 = vrot.lane.b32.xlu0 %v3094_v7, %s3510_s29  ;;  %s3559_s29 = sld [smem:[#allocation35_spill]] }
  0xdf   : > { %996 = vrot.lane.b32.xlu0 %v3094_v7, %s3508_s0  ;;  %s3567_s0 = smov 112  }
 0x130   : > { %v1001_v8 = vpop.permute.xlu2 %1000 }
 0x131   : > { %2289 = vmatpush.xpose.msk.msra.mxu1 %vm1002_vm1, %v1001_v8 }
 0x134   : > { %2290 = vmatmul.msk.f32.vlgmr.msra.gmra.mxu1 %vm1002_vm1, %v3094_v7 }
 0x148   : > { %v3107_v9 = vpop.permute.xlu1 %998 }
 0x149   : > { %v3109_v10 = vpop.permute.xlu0 %994  ;;  %1079 = vrot.lane.b32.xlu0 %v3107_v9, %s3504_s4 }
 0x14a   : > { %1027 = vrot.lane.b32.xlu1 %v3109_v10, %s3504_s4 }
 0x151   : > { %v3115_v11 = vpop.permute.xlu0 %996 }
 0x152   : > { %1053 = vrot.lane.b32.xlu2 %v3115_v11, %s3504_s4  ;;  %v2446_v57 = vpack.i.bf16 %v3107_v9, %v3115_v11  ;;  %s3558_s4 = smov %s3557_s27 }
 0x1ac   : > { %v1054_v12 = vpop.permute.xlu2 %1053 }
 0x1ad   : > { %2293 = vmatpush.xpose.msk.msrb.mxu0 %vm1002_vm1, %v1054_v12 }
 0x1b0   : > { %2294 = vmatmul.msk.f32.vlgmr.msrb.gmra.mxu0 %vm1002_vm1, %v3115_v11 }
 0x1b1   : > { %v1024_v24 = vpop.f32.mrf.mxu1 }
 0x1b2   : > { %v1105_v27 = vmul.f32 0.35355338, %v1024_v24 }
 0x1b4   : > { %v1111_v28 = vsel %vm955_vm5, -1e+09, %v1105_v27 }
 0x1b5   : > { %v1115_v29 = vsel %vm1002_vm1, %v1111_v28, -inf }
 0x1bb   : > { %v1080_v13 = vpop.permute.xlu0 %1079 }
 0x1bc   : > { %v1028_v14 = vpop.permute.xlu1 %1027  ;;  %2295 = vmatpush.xpose.msk.msrb.mxu1 %vm1002_vm1, %v1080_v13 }
 0x1bd   : > { %2291 = vmatpush.xpose.msk.msra.mxu2 %vm1002_vm1, %v1028_v14 }
 0x1bf   : > { %2296 = vmatmul.msk.f32.vlgmr.msrb.gmra.mxu1 %vm1002_vm1, %v3107_v9 }
 0x1c0   : > { %2292 = vmatmul.msk.f32.vlgmr.msra.gmra.mxu2 %vm1002_vm1, %v3109_v10 }
 0x22d   : > { %v1076_v22 = vpop.f32.mrf.mxu0 }
 0x22e   : > { %v1107_v23 = vmul.f32 0.35355338, %v1076_v22 }
 0x230   : > { %v1113_v25 = vsel %vm955_vm5, -1e+09, %v1107_v23 }
 0x231   : > { %v1121_v26 = vsel %vm1002_vm1, %v1113_v25, -inf }
 0x232   : > { %1122 = vmax.xlane.f32.xlu2 %v1121_v26 }
 0x23a   : > { %1116 = vmax.xlane.f32.xlu2 %v1115_v29 }
 0x23c   : > { %v1102_v30 = vpop.f32.mrf.mxu1 }
 0x23d   : > { %v1108_v31 = vmul.f32 0.35355338, %v1102_v30 }
 0x23f   : > { %v1114_v32 = vsel %vm955_vm5, -1e+09, %v1108_v31 }
 0x240   : > { %v1124_v33 = vsel %vm1002_vm1, %v1114_v32, -inf }
 0x241   : > { %1125 = vmax.xlane.f32.xlu0 %v1124_v33 }
 0x243   : > { %v1050_v34 = vpop.f32.mrf.mxu2 }
 0x244   : > { %v1106_v35 = vmul.f32 0.35355338, %v1050_v34 }
 0x246   : > { %v1112_v36 = vsel %vm955_vm5, -1e+09, %v1106_v35 }
 0x247   : > { %v1118_v37 = vsel %vm1002_vm1, %v1112_v36, -inf }
 0x248   : > { %1119 = vmax.xlane.f32.xlu1 %v1118_v37 }
 0x2a5   : > { %v1123_v38 = vpop.xlane.xlu2 %1122 }
 0x2a6   : > { %v1129_v39 = vsub.f32 %v1113_v25, %v1123_v38 }
 0x2a8   : > { %v1135_v40 = vmul.f32 1.442695, %v1129_v39 }
 0x2aa   : > { %2469 = vpow2.f32 %v1135_v40 }
 0x2ad   : > { %v1117_v43 = vpop.xlane.xlu2 %1116 }
 0x2ae   : > { %v1127_v46 = vsub.f32 %v1111_v28, %v1117_v43 }
 0x2b0   : > { %v2470_v41 = vpop.eup %2469  ;;  %v1131_v48 = vmul.f32 1.442695, %v1127_v46 }
 0x2b1   : > { %v1145_v42 = vsel %vm1002_vm1, %v2470_v41, 0.0 }
 0x2b2   : > { %1146 = vadd.xlane.f32.xlu2 %v1145_v42 }
 0x2b4   : > { %v1126_v44 = vpop.xlane.xlu0 %1125 }
 0x2b5   : > { %v1130_v45 = vsub.f32 %v1114_v32, %v1126_v44 }
 0x2b7   : > { %v1137_v47 = vmul.f32 1.442695, %v1130_v45 }
 0x2b9   : > { %2471 = vpow2.f32 %v1137_v47 }
 0x2ba   : > { %2473 = vpow2.f32 %v1131_v48 }
 0x2bb   : > { %v1120_v49 = vpop.xlane.xlu1 %1119 }
 0x2bc   : > { %v1128_v50 = vsub.f32 %v1112_v36, %v1120_v49 }
 0x2be   : > { %v1133_v51 = vmul.f32 1.442695, %v1128_v50 }
 0x2bf   : > { %v3138_v52 = vpop.eup %2471 }
 0x2c0   : > { %2475 = vpow2.f32 %v1133_v51  ;;  %v1148_v53 = vsel %vm1002_vm1, %v3138_v52, 0.0  ;;  %v3142_v54 = vpop.eup %2473 }
 0x2c1   : > { %1149 = vadd.xlane.f32.xlu0 %v1148_v53  ;;  %v1139_v58 = vsel %vm1002_vm1, %v3142_v54, 0.0  ;;  %v964_v53 = vld [vmem:[%s3557_s27 + $0x18] sm:$0xff]  ;;  %s3577_s27 = smov 16  }
 0x2c6   : > { %v3144_v55 = vpop.eup %2475 }
 0x2c7   : > { %v1142_v56 = vsel %vm1002_vm1, %v3144_v55, 0.0 }
 0x2c8   : > { %1143 = vadd.xlane.f32.xlu1 %v1142_v56  ;;  %v961_v56 = vld [vmem:[%s3558_s4] sm:$0xff] }
 0x2c9   : > { %1140 = vadd.xlane.f32.xlu0 %v1139_v58 }
 0x2ca   : > { %2447 = vrot.lane.b32.xlu2 %v2446_v57, %s2814_s24 }
 0x2dd   : > { %1211 = vrot.lane.b32.xlu0 %v3094_v7, %s2814_s24 }
 0x2e1   : > { %1237 = vrot.lane.b32.xlu1 %v3109_v10, %s2814_s24 }
 0x325   : > { %v1147_v59 = vpop.xlane.xlu2 %1146 }
 0x326   : > { %2477 = vrcp.f32 %v1147_v59  ;;  %v1190_v2 = vand.u32 2147483648, %v1147_v59  ;;  %v1188_v5 = vand.u32 2147483647, %v1147_v59  ;;  %vm1184_vm7 = vweird.f32 %v1147_v59 }
 0x328   : > { %v1191_v7 = vor.u32 1.1754944e-38, %v1190_v2  ;;  %vm1189_vm9 = vcmp.eq.f32.partialorder %v1188_v5, 8.507059e+37 }
 0x32c   : > { %v2478_v60 = vpop.eup %2477 }
 0x32d   : > { %v1180_v61 = vmul.f32 %v2478_v60, %v1147_v59  ;;  %v2448_v62 = vpop.permute.xlu2 %2447  ;;  %vm1185_vm6 = vweird.f32 %v2478_v60 }
 0x32e   : > { %v2450_v63 = vunpack.i.h.bf16 %v2448_v62  ;;  %v2449_v0 = vunpack.i.l.bf16 %v2448_v62  ;;  %vm1186_vm8 = vmor %vm1184_vm7, %vm1185_vm6 }
 0x32f   : > { %v1181_v1 = vsub.f32 1.0, %v1180_v61 }
 0x330   : > { %1284 = vmatpush.msra.mxu0 %v2449_v0  ;;  %1310 = vmatpush.msra.mxu1 %v2450_v63  ;;  %v2457_v0 = vld [vmem:[%s3559_s29] ss:$0 sm:$0xff]  ;;  %s3566_s29 = smov 120  }
 0x331   : > { %v1182_v3 = vmul.f32 %v2478_v60, %v1181_v1 }
 0x333   : > { %v1183_v6 = vadd.f32 %v2478_v60, %v1182_v3 }
 0x334   : > { %v1150_v8 = vpop.xlane.xlu0 %1149 }
 0x335   : > { %v1187_v9 = vsel %vm1186_vm8, %v2478_v60, %v1183_v6  ;;  %2479 = vrcp.f32 %v1150_v8  ;;  %v1204_v18 = vand.u32 2147483648, %v1150_v8  ;;  %v1202_v20 = vand.u32 2147483647, %v1150_v8 }
 0x336   : > { %v1192_v10 = vsel %vm1189_vm9, %v1191_v7, %v1187_v9  ;;  %vm1198_vm11 = vweird.f32 %v1150_v8  ;;  %vm1328_vm8 = vcmask 130048   ;;  %vm1330_vm9 = vcmask 195584  }
 0x337   : > { %v1209_v11 = vmul.f32 %v2470_v41, %v1192_v10  ;;  %v1205_v24 = vor.u32 1.1754944e-38, %v1204_v18  ;;  %vm1203_vm13 = vcmp.eq.f32.partialorder %v1202_v20, 8.507059e+37  ;;  %v2818_v6 = vmov 32.0  }
 0x339   : > { %2299 = vmatmul.msk.f32.vlgmr.msra.gmra.mxu0 %vm1002_vm1, %v1209_v11  ;;  %1360 = vst.msk [vmem:[%s3161_s1 + $0x10] sm:$0xff] %vm1002_vm1, %v1209_v11 }
 0x33b   : > { %v2480_v12 = vpop.eup %2479  ;;  %v1144_v13 = vpop.xlane.xlu1 %1143 }
 0x33c   : > { %v1194_v14 = vmul.f32 %v2480_v12, %v1150_v8  ;;  %2481 = vrcp.f32 %v1144_v13  ;;  %v1141_v15 = vpop.xlane.xlu0 %1140  ;;  %vm1199_vm10 = vweird.f32 %v2480_v12  ;;  %v1176_v30 = vand.u32 2147483648, %v1144_v13 }
 0x33d   : > { %2483 = vrcp.f32 %v1141_v15  ;;  %vm1200_vm12 = vmor %vm1198_vm11, %vm1199_vm10  ;;  %v1162_v34 = vand.u32 2147483648, %v1141_v15  ;;  %v1174_v35 = vand.u32 2147483647, %v1144_v13  ;;  %v1160_v37 = vand.u32 2147483647, %v1141_v15 }
 0x33e   : > { %v1195_v16 = vsub.f32 1.0, %v1194_v14  ;;  %vm1170_vm2 = vweird.f32 %v1144_v13  ;;  %v1177_v39 = vor.u32 1.1754944e-38, %v1176_v30  ;;  %vm1156_vm3 = vweird.f32 %v1141_v15 }
 0x33f   : > { %v1163_v41 = vor.u32 1.1754944e-38, %v1162_v34  ;;  %vm1175_vm6 = vcmp.eq.f32.partialorder %v1174_v35, 8.507059e+37  ;;  %vm1161_vm7 = vcmp.eq.f32.partialorder %v1160_v37, 8.507059e+37  ;;  %2485 = vrcp.f32 %v2818_v6 }
 0x340   : > { %v1196_v19 = vmul.f32 %v2480_v12, %v1195_v16 }
 0x342   : > { %v2482_v21 = vpop.eup %2481  ;;  %v1197_v22 = vadd.f32 %v2480_v12, %v1196_v19 }
 0x343   : > { %v2484_v23 = vpop.eup %2483  ;;  %v1166_v25 = vmul.f32 %v2482_v21, %v1144_v13  ;;  %vm1171_vm14 = vweird.f32 %v2482_v21 }
 0x344   : > { %v1201_v26 = vsel %vm1200_vm12, %v2480_v12, %v1197_v22  ;;  %v1152_v27 = vmul.f32 %v2484_v23, %v1141_v15  ;;  %vm1157_vm15 = vweird.f32 %v2484_v23  ;;  %vm1172_vm4 = vmor %vm1170_vm2, %vm1171_vm14 }
 0x345   : > { %v1206_v28 = vsel %vm1203_vm13, %v1205_v24, %v1201_v26  ;;  %v1167_v29 = vsub.f32 1.0, %v1166_v25  ;;  %vm1158_vm5 = vmor %vm1156_vm3, %vm1157_vm15  ;;  %v2486_v7 = vpop.eup %2485 }
 0x346   : > { %v1153_v31 = vsub.f32 1.0, %v1152_v27  ;;  %v1210_v32 = vmul.f32 %v3138_v52, %v1206_v28  ;;  %v1369_v8 = vmul.f32 32.0, %v2486_v7  ;;  %vm1373_vm10 = vweird.f32 %v2486_v7 }
 0x347   : > { %v1168_v33 = vmul.f32 %v2482_v21, %v1167_v29 }
 0x348   : > { %v1154_v36 = vmul.f32 %v2484_v23, %v1153_v31  ;;  %2300 = vmatmul.msk.f32.vlgmr.msra.gmra.mxu1 %vm1002_vm1, %v1210_v32  ;;  %1361 = vst.msk [vmem:[%s3161_s1 + $0x18] sm:$0xff] %vm1002_vm1, %v1210_v32  ;;  %v1370_v9 = vsub.f32 1.0, %v1369_v8 }
 0x349   : > { %v1169_v38 = vadd.f32 %v2482_v21, %v1168_v33 }
 0x34a   : > { %v1155_v40 = vadd.f32 %v2484_v23, %v1154_v36  ;;  %v1371_v10 = vmul.f32 %v2486_v7, %v1370_v9  ;;  %v2458_v36 = vld [vmem:[#allocation2] ss:$0 sm:$0xff] }
 0x34b   : > { %v1173_v42 = vsel %vm1172_vm4, %v2482_v21, %v1169_v38 }
 0x34c   : > { %v1159_v43 = vsel %vm1158_vm5, %v2484_v23, %v1155_v40  ;;  %v1178_v44 = vsel %vm1175_vm6, %v1177_v39, %v1173_v42  ;;  %v1372_v11 = vadd.f32 %v2486_v7, %v1371_v10  ;;  %v2459_v39 = vld [vmem:[#allocation5] ss:$0 sm:$0xff]  ;;  %v2460_v42 = vld [vmem:[%s3565_s11] ss:$0 sm:$0xff] }
 0x34d   : > { %v1164_v45 = vsel %vm1161_vm7, %v1163_v41, %v1159_v43  ;;  %v1208_v46 = vmul.f32 %v3144_v55, %v1178_v44  ;;  %v962_v55 = vld [vmem:[%s3558_s4 + $0x8] sm:$0xff] }
 0x34e   : > { %v1207_v47 = vmul.f32 %v3142_v54, %v1164_v45  ;;  %v963_v54 = vld [vmem:[%s3558_s4 + $0x10] sm:$0xff]  ;;  %v3201_v12 = vsel %vm1373_vm10, %v2486_v7, %v1372_v11  ;;  %s3562_s4 = sld [smem:[#allocation29_spill]] }
 0x34f   : > { %v1212_v48 = vpop.permute.xlu0 %1211  ;;  %1359 = vst.msk [vmem:[%s3161_s1 + $0x8] sm:$0xff] %vm1002_vm1, %v1208_v46 }
 0x350   : > { %1232 = vmatpush.msrb.mxu2 %v1212_v48  ;;  %1358 = vst.msk [vmem:[%s3161_s1] sm:$0xff] %vm1002_vm1, %v1207_v47 }
 0x351   : > { %2297 = vmatmul.msk.f32.vlgmr.msrb.gmra.mxu2 %vm1002_vm1, %v1207_v47 }
 0x352   : > { %1350 = vmatpush.msra.mxu2 %v964_v53 }
 0x353   : > { %v1238_v49 = vpop.permute.xlu1 %1237 }
 0x354   : > { %1258 = vmatpush.msra.mxu3 %v1238_v49  ;;  %1351 = vmatpush.msra.mxu2 %v963_v54  ;;  %s930_s18 = scalar_lea.vmem %s3562_s4, %s3069_s5 }
 0x355   : > { %2298 = vmatmul.msk.f32.vlgmr.msra.gmra.mxu3 %vm1002_vm1, %v1208_v46  ;;  %v942_v22 = vld [vmem:[%s930_s18] sm:$0xff]  ;;  %s3574_s18 = sshll.u32 %s3155_s10, 5 }
 0x356   : > { %1352 = vmatpush.msra.mxu2 %v962_v55  ;;  %v945_v55 = vld [vmem:[%s936_s22] sm:$0x1]  ;;  %s3316_s9 = scalar_lea.vmem [#allocation14], %s3574_s18  ;;  %s2037_s18 = scalar_lea.hbm %s3491_s25, %s2328_s20 }
 0x357   : > { %vm946_vm14 = vcmp.gt.f32.partialorder %v945_v55, 0.0  ;;  %s2711_s22 = scalar_lea.hbm %s3491_s25, 64 }
 0x358   : > { %1353 = vmatpush.msra.mxu2 %v961_v56  ;;  %v1583_v56 = vsel %vm946_vm14, 1, %v2813_v17 }
 0x3b6   : > { %v1286_v50 = vpop.f32.mrf.mxu0 }
 0x3b7   : > { %1320 = vrot.lane.b32.xlu2 %v1286_v50, %s3513_s7  ;;  %s3560_s7 = sld [smem:[#allocation38_spill]] }
 0x3bd   : > { %s3561_s19 = smov %s3560_s7  ;;  %v1410_v18 = vld [vmem:[%s3560_s7 + $0x18] sm:$0xff]  ;;  %s3563_s7 = sld [smem:[#allocation36_spill]] }
 0x3be   : > { %1461 = vmatpush.msrb.mxu0 %v1410_v18  ;;  %v1409_v19 = vld [vmem:[%s3561_s19 + $0x10] sm:$0xff]  ;;  %v1408_v20 = vld [vmem:[%s3561_s19 + $0x8] sm:$0xff]  ;;  %v1407_v21 = vld [vmem:[%s3561_s19] sm:$0xff] }
 0x3c0   : > { %1462 = vmatpush.msrb.mxu0 %v1409_v19 }
 0x3c2   : > { %1463 = vmatpush.msrb.mxu0 %v1408_v20 }
 0x3c3   : > { %s3564_s24 = smov %s3563_s7  ;;  %v1405_v23 = vld [vmem:[%s3563_s7 + $0x18] sm:$0xff]  ;;  %s2054_s7 = scalar_lea.hbm %s3492_s26, %s2328_s20 }
 0x3c4   : > { %1464 = vmatpush.msrb.mxu0 %v1407_v21  ;;  %v1404_v24 = vld [vmem:[%s3564_s24 + $0x10] sm:$0xff]  ;;  %1435 = vmatpush.msrb.mxu3 %v1405_v23  ;;  %v1403_v25 = vld [vmem:[%s3564_s24 + $0x8] sm:$0xff]  ;;  %v1402_v26 = vld [vmem:[%s3564_s24] sm:$0xff] }
 0x3c5   : > { %v1312_v52 = vpop.f32.mrf.mxu1  ;;  %2303 = vmatmul.msk.f32.vlgmr.msrb.gmra.mxu0 %vm969_vm0, %v942_v22 }
 0x3c6   : > { %1436 = vmatpush.msrb.mxu3 %v1404_v24 }
 0x3c8   : > { %1437 = vmatpush.msrb.mxu3 %v1403_v25 }
 0x3ca   : > { %1438 = vmatpush.msrb.mxu3 %v1402_v26 }
 0x3d4   : > { %v1234_v58 = vpop.f32.mrf.mxu2 }
 0x3d8   : > { %v1260_v51 = vpop.f32.mrf.mxu3 }
 0x3d9   : > { %1316 = vrot.lane.b32.xlu1 %v1260_v51, %s3514_s28  ;;  %s3568_s28 = sld [smem:[#allocation37_spill]] }
 0x3df   : > { %v2461_v45 = vld [vmem:[%s3568_s28] ss:$0 sm:$0xff]  ;;  %s2038_s28 = sshll.u32 %s3161_s1, 4  ;;  %s2039_s28 = int_to_ptr.vmem [resolvable:$true] %s2038_s28 }
 0x3e1   : > { %1324 = vrot.lane.b32.xlu1 %v1312_v52, %s3516_s30  ;;  %s2018_s30 = scalar_lea.sflag [#allocation4], %s3155_s10 }
 0x411   : > { %v1321_v60 = vpop.permute.xlu2 %1320 }
 0x442   : > { %v1466_v43 = vpop.f32.mrf.mxu0 }
 0x443   : > { %v3242_v44 = vadd.f32 %v2460_v42, %v1466_v43 }
 0x445   : > { %1477 = vrot.lane.b32.xlu1 %v3242_v44, %s3566_s29  ;;  %2304 = vmatpush.xpose.msk.msrb.mxu1 %vm1002_vm1, %v3242_v44 }
 0x44b   : > { %v1317_v57 = vpop.permute.xlu1 %1316 }
 0x44c   : > { %v1327_v59 = vsel %vm1002_vm1, %v1234_v58, %v1317_v57  ;;  %v1584_v57 = vperm.slane %v1583_v56, 0 }
 0x44d   : > { %v1329_v62 = vsel %vm1328_vm8, %v1327_v59, %v1321_v60  ;;  %1479 = vrot.lane.b32.xlu1 %v3242_v44, %s3567_s0 }
 0x44e   : > { %vm3278_vm15 = vcmp.eq.s32.totalorder %v1584_v57, 1 }
 0x453   : > { %v1325_v61 = vpop.permute.xlu1 %1324 }
 0x454   : > { %v1331_v63 = vsel %vm1330_vm9, %v1329_v62, %v1325_v61 }
 0x455   : > { %2301 = vmatmul.msk.f32.vlgmr.msra.gmra.mxu2 %vm969_vm0, %v1331_v63 }
 0x4b7   : > { %v3259_v48 = vpop.permute.xlu1 %1477 }
 0x4b8   : > { %2306 = vmatpush.xpose.msk.msrb.mxu2 %vm1002_vm1, %v3259_v48 }
 0x4bf   : > { %v3263_v49 = vpop.permute.xlu1 %1479 }
 0x4c0   : > { %v2451_v50 = vpack.i.bf16 %v3263_v49, %v3259_v48  ;;  %2308 = vmatpush.xpose.msk.msra.mxu3 %vm1002_vm1, %v3263_v49 }
 0x4d8   : > { %v1355_v1 = vpop.f32.mrf.mxu2 }
 0x4d9   : > { %v1356_v2 = vadd.f32 %v2457_v0, %v1355_v1 }
 0x4db   : > { %v1362_v3 = vadd.f32 %v1356_v2, %v3087_v4 }
 0x4dd   : > { %v1365_v5 = vsel %vm969_vm0, %v1362_v3, 0.0 }
 0x4de   : > { %1366 = vadd.xlane.f32.xlu0 %v1365_v5 }
 0x551   : > { %v1367_v13 = vpop.xlane.xlu0 %1366 }
 0x552   : > { %v1375_v14 = vmul.f32 %v3201_v12, %v1367_v13 }
 0x554   : > { %v1376_v15 = vsub.f32 %v1362_v3, %v1375_v14 }
 0x556   : > { %v1377_v16 = vmul.f32 %v1376_v15, %v1376_v15 }
 0x558   : > { %v1378_v4 = vsel %vm969_vm0, %v1377_v16, 0.0 }
 0x559   : > { %1379 = vadd.xlane.f32.xlu2 %v1378_v4 }
 0x5cc   : > { %v1380_v27 = vpop.xlane.xlu2 %1379 }
 0x5cd   : > { %v1381_v28 = vmul.f32 %v1380_v27, %v3201_v12 }
 0x5cf   : > { %v1382_v29 = vadd.f32 1e-12, %v1381_v28 }
 0x5d1   : > { %2487 = vrsqrt.f32 %v1382_v29  ;;  %vm1389_vm12 = vweird.f32 %v1382_v29 }
 0x5d7   : > { %v2488_v30 = vpop.eup %2487 }
 0x5d8   : > { %v1384_v31 = vmul.f32 %v2488_v30, %v1382_v29  ;;  %vm1390_vm11 = vweird.f32 %v2488_v30 }
 0x5d9   : > { %vm1391_vm13 = vmor %vm1389_vm12, %vm1390_vm11 }
 0x5da   : > { %v1385_v32 = vmul.f32 %v2488_v30, %v1384_v31 }
 0x5dc   : > { %v1386_v33 = vmul.f32 0.5, %v1385_v32 }
 0x5de   : > { %v1387_v34 = vsub.f32 1.5, %v1386_v33 }
 0x5e0   : > { %v1388_v35 = vmul.f32 %v2488_v30, %v1387_v34 }
 0x5e2   : > { %v1392_v37 = vsel %vm1391_vm13, %v2488_v30, %v1388_v35 }
 0x5e3   : > { %v1393_v38 = vmul.f32 %v1392_v37, %v1376_v15 }
 0x5e5   : > { %v1397_v40 = vmul.f32 %v2458_v36, %v1393_v38 }
 0x5e7   : > { %v3235_v41 = vadd.f32 %v2459_v39, %v1397_v40 }
 0x5e9   : > { %2302 = vmatmul.msk.f32.vlgmr.msrb.gmra.mxu3 %vm969_vm0, %v3235_v41 }
 0x66c   : > { %v1440_v46 = vpop.f32.mrf.mxu3 }
 0x66d   : > { %v1441_v47 = vadd.f32 %v2461_v45, %v1440_v46 }
 0x66f   : > { %1474 = vrot.lane.b32.xlu0 %v1441_v47, %s3569_s6  ;;  %1470 = vrot.lane.b32.xlu1 %v1441_v47, %s3566_s29  ;;  %s3575_s29 = smov 24  }
 0x670   : > { %2305 = vmatmul.msk.f32.vlgmr.msrb.gmra.mxu1 %vm1002_vm1, %v1441_v47 }
 0x677   : > { %1472 = vrot.lane.b32.xlu1 %v1441_v47, %s3567_s0  ;;  %s3576_s0 = smov 8  }
 0x67f   : > { %1481 = vrot.lane.b32.xlu1 %v3242_v44, %s3569_s6  ;;  %s2040_s6 = sshll.u32 %s2037_s18, 4  ;;  %s2041_s6 = int_to_ptr.hbm [resolvable:$true] %s2040_s6 }
 0x680   : > { %s2705_s4 = sshra.s32 %s2041_s6, 4  ;;  %s2706_s4 = int_to_ptr.hbm [resolvable:$true] %s2705_s4 }
 0x681   : > { %s2707_s11 = scalar_lea.hbm %s2706_s4, 32  ;;  %p2712_p3 = scmp.lt.s32.totalorder %s2706_s4, %s3491_s25 }
 0x682   : > { %p2708_p0 = scmp.ne.s32.totalorder %s2706_s4, %s2707_s11  ;;  %p2713_p4 = scmp.lt.s32.totalorder %s2711_s22, %s2707_s11 }
 0x684   : > { %p2709_p1 = pnand %p2708_p0, %p2993_p5  ;;  %p2714_p7 = por %p2713_p4, %p2712_p3 }
 0x686   : > { %p2710_p2 = pneg %p2709_p1 }
 0x688   : > { %p2715_p8 = pnand %p2714_p7, %p2710_p2 }
 0x6e1   : > { %v1471_v51 = vpop.permute.xlu1 %1470  ;;  %v1475_v54 = vpop.permute.xlu0 %1474 }
 0x6e2   : > { %2307 = vmatmul.msk.f32.vlgmr.msrb.gmra.mxu2 %vm1002_vm1, %v1471_v51 }
 0x6e9   : > { %v1473_v52 = vpop.permute.xlu1 %1472 }
 0x6ea   : > { %2309 = vmatmul.msk.f32.vlgmr.msra.gmra.mxu3 %vm1002_vm1, %v1473_v52 }
 0x6ed   : > { %v1504_v5 = vpop.f32.mrf.mxu1 }
 0x6ee   : > { %v1579_v8 = vmul.f32 0.35355338, %v1504_v5 }
 0x6f0   : > { %v1586_v9 = vsel %vm3278_vm15, -1e+09, %v1579_v8 }
 0x6f1   : > { %v1482_v53 = vpop.permute.xlu1 %1481  ;;  %v1590_v10 = vsel %vm1002_vm1, %v1586_v9, -inf }
 0x6f2   : > { %2310 = vmatpush.xpose.msk.msra.mxu0 %vm1002_vm1, %v1482_v53 }
 0x6f5   : > { %2311 = vmatmul.msk.f32.vlgmr.msra.gmra.mxu0 %vm1002_vm1, %v1475_v54 }
 0x765   : > { %v1528_v58 = vpop.f32.mrf.mxu2 }
 0x766   : > { %v1580_v59 = vmul.f32 0.35355338, %v1528_v58 }
 0x768   : > { %v1587_v61 = vsel %vm3278_vm15, -1e+09, %v1580_v59 }
 0x769   : > { %v1593_v62 = vsel %vm1002_vm1, %v1587_v61, -inf }
 0x76a   : > { %1594 = vmax.xlane.f32.xlu2 %v1593_v62 }
 0x76d   : > { %v1552_v63 = vpop.f32.mrf.mxu3 }
 0x76e   : > { %v1581_v0 = vmul.f32 0.35355338, %v1552_v63 }
 0x770   : > { %v1588_v1 = vsel %vm3278_vm15, -1e+09, %v1581_v0 }
 0x771   : > { %v1596_v17 = vsel %vm1002_vm1, %v1588_v1, -inf }
 0x772   : > { %1597 = vmax.xlane.f32.xlu1 %v1596_v17  ;;  %v1576_v2 = vpop.f32.mrf.mxu0 }
 0x773   : > { %v1582_v3 = vmul.f32 0.35355338, %v1576_v2 }
 0x775   : > { %v1589_v6 = vsel %vm3278_vm15, -1e+09, %v1582_v3 }
 0x776   : > { %v1599_v7 = vsel %vm1002_vm1, %v1589_v6, -inf }
 0x777   : > { %1600 = vmax.xlane.f32.xlu2 %v1599_v7 }
 0x77f   : > { %1591 = vmax.xlane.f32.xlu2 %v1590_v10 }
 0x78b   : > { %1764 = vrot.lane.b32.xlu1 %v1482_v53, %s3573_s21 }
 0x7dd   : > { %v1595_v11 = vpop.xlane.xlu2 %1594 }
 0x7de   : > { %v1603_v13 = vsub.f32 %v1587_v61, %v1595_v11 }
 0x7e0   : > { %v1608_v14 = vmul.f32 1.442695, %v1603_v13 }
 0x7e2   : > { %2489 = vpow2.f32 %v1608_v14 }
 0x7e5   : > { %v1598_v4 = vpop.xlane.xlu1 %1597 }
 0x7e6   : > { %v1604_v20 = vsub.f32 %v1588_v1, %v1598_v4 }
 0x7e8   : > { %v2490_v15 = vpop.eup %2489  ;;  %v1610_v22 = vmul.f32 1.442695, %v1604_v20 }
 0x7e9   : > { %v1617_v16 = vsel %vm1002_vm1, %v2490_v15, 0.0 }
 0x7ea   : > { %1618 = vadd.xlane.f32.xlu0 %v1617_v16  ;;  %v1601_v18 = vpop.xlane.xlu2 %1600 }
 0x7eb   : > { %v1605_v19 = vsub.f32 %v1589_v6, %v1601_v18 }
 0x7ed   : > { %v1612_v21 = vmul.f32 1.442695, %v1605_v19 }
 0x7ef   : > { %2491 = vpow2.f32 %v1612_v21 }
 0x7f0   : > { %2493 = vpow2.f32 %v1610_v22 }
 0x7f2   : > { %v1592_v23 = vpop.xlane.xlu2 %1591 }
 0x7f3   : > { %v1602_v24 = vsub.f32 %v1586_v9, %v1592_v23 }
 0x7f5   : > { %v3296_v25 = vpop.eup %2491  ;;  %v1606_v26 = vmul.f32 1.442695, %v1602_v24 }
 0x7f6   : > { %v1623_v27 = vsel %vm1002_vm1, %v3296_v25, 0.0  ;;  %v3300_v28 = vpop.eup %2493 }
 0x7f7   : > { %2495 = vpow2.f32 %v1606_v26  ;;  %1624 = vadd.xlane.f32.xlu2 %v1623_v27  ;;  %v1620_v31 = vsel %vm1002_vm1, %v3300_v28, 0.0  ;;  %v1415_v26 = vld [vmem:[%s3578_s12 + $0x18] sm:$0xff]  ;;  %v1414_v27 = vld [vmem:[%s3578_s12 + $0x10] sm:$0xff] }
 0x7fd   : > { %v3302_v29 = vpop.eup %2495  ;;  %v1765_v30 = vpop.permute.xlu1 %1764 }
 0x7fe   : > { %1785 = vmatpush.msrb.mxu0 %v1765_v30  ;;  %v1614_v32 = vsel %vm1002_vm1, %v3302_v29, 0.0 }
 0x7ff   : > { %1621 = vadd.xlane.f32.xlu2 %v1620_v31  ;;  %1615 = vadd.xlane.f32.xlu0 %v1614_v32 }
 0x817   : > { %2452 = vrot.lane.b32.xlu2 %v2451_v50, %s3573_s21 }
 0x81f   : > { %1686 = vrot.lane.b32.xlu2 %v3242_v44, %s3573_s21 }
 0x85d   : > { %v1619_v33 = vpop.xlane.xlu0 %1618 }
 0x85e   : > { %2497 = vrcp.f32 %v1619_v33  ;;  %v1651_v37 = vand.u32 2147483648, %v1619_v33  ;;  %v1649_v39 = vand.u32 2147483647, %v1619_v33  ;;  %vm1645_vm3 = vweird.f32 %v1619_v33 }
 0x860   : > { %v1652_v43 = vor.u32 1.1754944e-38, %v1651_v37  ;;  %vm1650_vm5 = vcmp.eq.f32.partialorder %v1649_v39, 8.507059e+37  ;;  %v2462_v37 = vld [vmem:[%s3579_s13] ss:$0 sm:$0xff] }
 0x864   : > { %v2498_v34 = vpop.eup %2497 }
 0x865   : > { %v1641_v35 = vmul.f32 %v2498_v34, %v1619_v33  ;;  %vm1646_vm2 = vweird.f32 %v2498_v34 }
 0x866   : > { %vm1647_vm4 = vmor %vm1645_vm3, %vm1646_vm2 }
 0x867   : > { %v1642_v36 = vsub.f32 1.0, %v1641_v35 }
 0x869   : > { %v1643_v38 = vmul.f32 %v2498_v34, %v1642_v36 }
 0x86a   : > { %v1625_v40 = vpop.xlane.xlu2 %1624 }
 0x86b   : > { %v1644_v42 = vadd.f32 %v2498_v34, %v1643_v38  ;;  %2499 = vrcp.f32 %v1625_v40  ;;  %v1679_v52 = vand.u32 2147483648, %v1625_v40  ;;  %v1677_v54 = vand.u32 2147483647, %v1625_v40 }
 0x86c   : > { %vm1673_vm7 = vweird.f32 %v1625_v40 }
 0x86d   : > { %v1648_v45 = vsel %vm1647_vm4, %v2498_v34, %v1644_v42  ;;  %v1680_v57 = vor.u32 1.1754944e-38, %v1679_v52  ;;  %vm1678_vm11 = vcmp.eq.f32.partialorder %v1677_v54, 8.507059e+37 }
 0x86e   : > { %v1653_v46 = vsel %vm1650_vm5, %v1652_v43, %v1648_v45 }
 0x86f   : > { %v1683_v44 = vmul.f32 %v2490_v15, %v1653_v46 }
 0x871   : > { %v2500_v47 = vpop.eup %2499  ;;  %1832 = vst.msk [vmem:[%s3316_s9 + $0x8] sm:$0xff] %vm1002_vm1, %v1683_v44 }
 0x872   : > { %v1669_v48 = vmul.f32 %v2500_v47, %v1625_v40  ;;  %v1616_v49 = vpop.xlane.xlu0 %1615  ;;  %v1622_v50 = vpop.xlane.xlu2 %1621  ;;  %vm1674_vm6 = vweird.f32 %v2500_v47 }
 0x873   : > { %2501 = vrcp.f32 %v1616_v49  ;;  %vm1675_vm10 = vmor %vm1673_vm7, %vm1674_vm6  ;;  %v1637_v3 = vand.u32 2147483648, %v1616_v49  ;;  %v1635_v7 = vand.u32 2147483647, %v1616_v49  ;;  %v1665_v8 = vand.u32 2147483648, %v1622_v50 }
 0x874   : > { %v1670_v51 = vsub.f32 1.0, %v1669_v48  ;;  %2503 = vrcp.f32 %v1622_v50  ;;  %v1663_v10 = vand.u32 2147483647, %v1622_v50  ;;  %vm1631_vm14 = vweird.f32 %v1616_v49  ;;  %v1871_v48 = vld [vmem:[%s3480_s14 + $0x18] sm:$0xff] }
 0x875   : > { %v1638_v13 = vor.u32 1.1754944e-38, %v1637_v3  ;;  %vm1659_vm2 = vweird.f32 %v1622_v50  ;;  %vm1636_vm3 = vcmp.eq.f32.partialorder %v1635_v7, 8.507059e+37  ;;  %v1666_v16 = vor.u32 1.1754944e-38, %v1665_v8  ;;  %v1880_v8 = vld [vmem:[%s3482_s16 + $0x38] sm:$0xff] }
 0x876   : > { %v1671_v53 = vmul.f32 %v2500_v47, %v1670_v51  ;;  %vm1664_vm5 = vcmp.eq.f32.partialorder %v1663_v10, 8.507059e+37 }
 0x878   : > { %v1672_v55 = vadd.f32 %v2500_v47, %v1671_v53 }
 0x879   : > { %v2502_v56 = vpop.eup %2501 }
 0x87a   : > { %v2504_v58 = vpop.eup %2503  ;;  %v1676_v59 = vsel %vm1675_vm10, %v2500_v47, %v1672_v55  ;;  %v1627_v60 = vmul.f32 %v2502_v56, %v1616_v49  ;;  %v2453_v61 = vpop.permute.xlu2 %2452  ;;  %vm1632_vm12 = vweird.f32 %v2502_v56  ;;  %v1869_v49 = vld [vmem:[%s3480_s14 + $0x8] sm:$0xff] }
 0x87b   : > { %v1681_v62 = vsel %vm1678_vm11, %v1680_v57, %v1676_v59  ;;  %v1655_v63 = vmul.f32 %v2504_v58, %v1622_v50  ;;  %v2455_v0 = vunpack.i.h.bf16 %v2453_v61  ;;  %v2454_v17 = vunpack.i.l.bf16 %v2453_v61  ;;  %vm1633_vm15 = vmor %vm1631_vm14, %vm1632_vm12  ;;  %v1868_v50 = vld [vmem:[%s3480_s14] sm:$0xff] }
 0x87c   : > { %v1628_v1 = vsub.f32 1.0, %v1627_v60  ;;  %v1685_v2 = vmul.f32 %v3296_v25, %v1681_v62  ;;  %vm1660_vm13 = vweird.f32 %v2504_v58  ;;  %v2463_v60 = vld [vmem:[#allocation7] ss:$0 sm:$0xff]  ;;  %vm1955_vm12 = vcmask 523264  }
 0x87d   : > { %v1656_v5 = vsub.f32 1.0, %v1655_v63  ;;  %1759 = vmatpush.msrb.mxu3 %v2455_v0  ;;  %1733 = vmatpush.msra.mxu2 %v2454_v17  ;;  %vm1661_vm4 = vmor %vm1659_vm2, %vm1660_vm13  ;;  %v2464_v63 = vld [vmem:[#allocation8] ss:$0 sm:$0xff]  ;;  %v2465_v17 = vld [vmem:[%s3481_s15] ss:$0 sm:$0xff] }
 0x87e   : > { %v1629_v6 = vmul.f32 %v2502_v56, %v1628_v1  ;;  %2315 = vmatmul.msk.f32.vlgmr.msrb.gmra.mxu0 %vm1002_vm1, %v1685_v2  ;;  %1834 = vst.msk [vmem:[%s3316_s9 + $0x18] sm:$0xff] %vm1002_vm1, %v1685_v2  ;;  %2313 = vmatmul.msk.f32.vlgmr.msra.gmra.mxu2 %vm1002_vm1, %v1683_v44 }
 0x87f   : > { %v1657_v9 = vmul.f32 %v2504_v58, %v1656_v5  ;;  %1900 = vmatpush.msrb.mxu2 %v1871_v48  ;;  %1967 = vmatpush.msra.mxu3 %v1880_v8 }
 0x880   : > { %v1630_v11 = vadd.f32 %v2502_v56, %v1629_v6 }
 0x881   : > { %v1658_v14 = vadd.f32 %v2504_v58, %v1657_v9 }
 0x882   : > { %v1634_v15 = vsel %vm1633_vm15, %v2502_v56, %v1630_v11  ;;  %v1687_v4 = vpop.permute.xlu2 %1686  ;;  %v1879_v11 = vld [vmem:[%s3482_s16 + $0x30] sm:$0xff] }
 0x883   : > { %v1639_v18 = vsel %vm1636_vm3, %v1638_v13, %v1634_v15  ;;  %v1662_v19 = vsel %vm1661_vm4, %v2504_v58, %v1658_v14  ;;  %1707 = vmatpush.msra.mxu1 %v1687_v4  ;;  %1968 = vmatpush.msra.mxu3 %v1879_v11  ;;  %v1878_v15 = vld [vmem:[%s3482_s16 + $0x28] sm:$0xff] }
 0x884   : > { %v1667_v20 = vsel %vm1664_vm5, %v1666_v16, %v1662_v19  ;;  %v1682_v21 = vmul.f32 %v3302_v29, %v1639_v18  ;;  %v1412_v29 = vld [vmem:[%s3578_s12] sm:$0xff] }
 0x885   : > { %v1684_v22 = vmul.f32 %v3300_v28, %v1667_v20  ;;  %1823 = vmatpush.msrb.mxu1 %v1415_v26  ;;  %v1413_v28 = vld [vmem:[%s3578_s12 + $0x8] sm:$0xff]  ;;  %1969 = vmatpush.msra.mxu3 %v1878_v15  ;;  %v1877_v18 = vld [vmem:[%s3482_s16 + $0x20] sm:$0xff]  ;;  %v1876_v20 = vld [vmem:[%s3482_s16 + $0x18] sm:$0xff] }
 0x886   : > { %2312 = vmatmul.msk.f32.vlgmr.msra.gmra.mxu1 %vm1002_vm1, %v1682_v21  ;;  %1831 = vst.msk [vmem:[%s3316_s9] sm:$0xff] %vm1002_vm1, %v1682_v21 }
 0x887   : > { %2314 = vmatmul.msk.f32.vlgmr.msrb.gmra.mxu3 %vm1002_vm1, %v1684_v22  ;;  %1833 = vst.msk [vmem:[%s3316_s9 + $0x10] sm:$0xff] %vm1002_vm1, %v1684_v22  ;;  %1824 = vmatpush.msrb.mxu1 %v1414_v27  ;;  %v1873_v27 = vld [vmem:[%s3482_s16] sm:$0xff] }
 0x888   : > { %1970 = vmatpush.msra.mxu3 %v1877_v18 }
 0x889   : > { %1825 = vmatpush.msrb.mxu1 %v1413_v28 }
 0x88a   : > { %1971 = vmatpush.msra.mxu3 %v1876_v20 }
 0x88b   : > { %1826 = vmatpush.msrb.mxu1 %v1412_v29 }
 0x8fb   : > { %v1787_v23 = vpop.f32.mrf.mxu0 }
 0x8fc   : > { %1799 = vrot.lane.b32.xlu2 %v1787_v23, %s3575_s29  ;;  %v1875_v23 = vld [vmem:[%s3482_s16 + $0x10] sm:$0xff] }
 0x8fd   : > { %1972 = vmatpush.msra.mxu3 %v1875_v23 }
 0x901   : > { %v1735_v24 = vpop.f32.mrf.mxu2 }
 0x902   : > { %1791 = vrot.lane.b32.xlu0 %v1735_v24, %s3576_s0 }
 0x903   : > { %v1709_v31 = vpop.f32.mrf.mxu1 }
 0x90a   : > { %v1761_v25 = vpop.f32.mrf.mxu3 }
 0x90b   : > { %1795 = vrot.lane.b32.xlu1 %v1761_v25, %s3577_s27  ;;  %v1874_v25 = vld [vmem:[%s3482_s16 + $0x8] sm:$0xff] }
 0x90c   : > { %1973 = vmatpush.msra.mxu3 %v1874_v25 }
 0x90e   : > { %1974 = vmatpush.msra.mxu3 %v1873_v27 }
 0x956   : > { %v1800_v34 = vpop.permute.xlu2 %1799 }
 0x974   : > { %v1792_v30 = vpop.permute.xlu0 %1791 }
 0x975   : > { %v1802_v32 = vsel %vm1002_vm1, %v1709_v31, %v1792_v30 }
 0x97d   : > { %v1796_v33 = vpop.permute.xlu1 %1795 }
 0x97e   : > { %v1803_v35 = vsel %vm1328_vm8, %v1802_v32, %v1796_v33 }
 0x97f   : > { %v1804_v36 = vsel %vm1330_vm9, %v1803_v35, %v1800_v34 }
 0x980   : > { %2316 = vmatmul.msk.f32.vlgmr.msrb.gmra.mxu1 %vm969_vm0, %v1804_v36 }
 0x9fd   : > { %v1828_v38 = vpop.f32.mrf.mxu1 }
 0x9fe   : > { %v1829_v39 = vadd.f32 %v2462_v37, %v1828_v38 }
 0xa00   : > { %v1835_v40 = vadd.f32 %v1829_v39, %v3235_v41  ;;  %v1870_v41 = vld [vmem:[%s3480_s14 + $0x10] sm:$0xff] }
 0xa01   : > { %1901 = vmatpush.msrb.mxu2 %v1870_v41 }
 0xa02   : > { %v1838_v42 = vsel %vm969_vm0, %v1835_v40, 0.0 }
 0xa03   : > { %1839 = vadd.xlane.f32.xlu1 %v1838_v42  ;;  %1902 = vmatpush.msrb.mxu2 %v1869_v49 }
 0xa05   : > { %1903 = vmatpush.msrb.mxu2 %v1868_v50 }
 0xa76   : > { %v1840_v43 = vpop.xlane.xlu1 %1839 }
 0xa77   : > { %v1841_v45 = vmul.f32 %v1840_v43, %v3201_v12 }
 0xa79   : > { %v1842_v46 = vsub.f32 %v1835_v40, %v1841_v45 }
 0xa7b   : > { %v1843_v44 = vmul.f32 %v1842_v46, %v1842_v46 }
 0xa7d   : > { %v1844_v47 = vsel %vm969_vm0, %v1843_v44, 0.0 }
 0xa7e   : > { %1845 = vadd.xlane.f32.xlu2 %v1844_v47 }
 0xaf1   : > { %v1846_v51 = vpop.xlane.xlu2 %1845 }
 0xaf2   : > { %v1847_v52 = vmul.f32 %v1846_v51, %v3201_v12 }
 0xaf4   : > { %v1848_v53 = vadd.f32 1e-12, %v1847_v52 }
 0xaf6   : > { %2505 = vrsqrt.f32 %v1848_v53  ;;  %vm1855_vm8 = vweird.f32 %v1848_v53 }
 0xafc   : > { %v2506_v54 = vpop.eup %2505 }
 0xafd   : > { %v1850_v55 = vmul.f32 %v2506_v54, %v1848_v53  ;;  %vm1856_vm1 = vweird.f32 %v2506_v54  ;;  %v2466_v53 = vld [vmem:[%s3483_s17] ss:$0 sm:$0xff] }
 0xafe   : > { %vm1857_vm9 = vmor %vm1855_vm8, %vm1856_vm1 }
 0xaff   : > { %v1851_v56 = vmul.f32 %v2506_v54, %v1850_v55 }
 0xb01   : > { %v1852_v57 = vmul.f32 0.5, %v1851_v56 }
 0xb03   : > { %v1853_v58 = vsub.f32 1.5, %v1852_v57 }
 0xb05   : > { %v1854_v59 = vmul.f32 %v2506_v54, %v1853_v58 }
 0xb07   : > { %v1858_v61 = vsel %vm1857_vm9, %v2506_v54, %v1854_v59 }
 0xb08   : > { %v1859_v62 = vmul.f32 %v1858_v61, %v1842_v46 }
 0xb0a   : > { %v1863_v0 = vmul.f32 %v2463_v60, %v1859_v62 }
 0xb0c   : > { %v3372_v1 = vadd.f32 %v2464_v63, %v1863_v0 }
 0xb0e   : > { %2317 = vmatmul.msk.f32.vlgmr.msrb.gmra.mxu2 %vm969_vm0, %v3372_v1 }
 0xb91   : > { %v1905_v2 = vpop.f32.mrf.mxu2 }
 0xb92   : > { %v1906_v3 = vadd.f32 %v2465_v17, %v1905_v2 }
 0xb94   : > { %v1909_v5 = vmul.f32 0.70710677, %v1906_v3  ;;  %v1908_v50 = vmul.f32 0.5, %v1906_v3 }
 0xb96   : > { %v1910_v6 = vmul.f32 %v1909_v5, %v1909_v5 }
 0xb98   : > { %v1911_v7 = vmin.f32 %v1910_v6, 16.0 }
 0xb9a   : > { %v1912_v9 = vmul.f32 2.1237322e-06, %v1911_v7  ;;  %v1923_v10 = vmul.f32 3.8918573e-05, %v1911_v7 }
 0xb9c   : > { %v1913_v13 = vadd.f32 0.00028619796, %v1912_v9  ;;  %v1924_v14 = vadd.f32 0.001143296, %v1923_v10 }
 0xb9e   : > { %v1914_v16 = vmul.f32 %v1913_v13, %v1911_v7  ;;  %v1925_v4 = vmul.f32 %v1924_v14, %v1911_v7 }
 0xba0   : > { %v1926_v19 = vadd.f32 0.014752088, %v1925_v4  ;;  %v1915_v21 = vadd.f32 0.0036580483, %v1914_v16 }
 0xba2   : > { %v1927_v22 = vmul.f32 %v1926_v19, %v1911_v7  ;;  %v1916_v26 = vmul.f32 %v1915_v21, %v1911_v7 }
 0xba4   : > { %v1928_v24 = vadd.f32 0.112945676, %v1927_v22  ;;  %v1917_v30 = vadd.f32 0.05243302, %v1916_v26 }
 0xba6   : > { %v1929_v28 = vmul.f32 %v1928_v24, %v1911_v7  ;;  %v1918_v33 = vmul.f32 %v1917_v30, %v1911_v7 }
 0xba8   : > { %v1930_v29 = vadd.f32 0.4994258, %v1929_v28  ;;  %v1919_v34 = vadd.f32 0.18741608, %v1918_v33 }
 0xbaa   : > { %v1931_v31 = vmul.f32 %v1930_v29, %v1911_v7  ;;  %v1920_v36 = vmul.f32 %v1919_v34, %v1911_v7 }
 0xbac   : > { %v1932_v32 = vadd.f32 1.0, %v1931_v31  ;;  %v1921_v40 = vadd.f32 1.1283791, %v1920_v36 }
 0xbae   : > { %2507 = vrcp.f32 %v1932_v32  ;;  %v1944_v39 = vand.u32 2147483648, %v1932_v32  ;;  %v1942_v43 = vand.u32 2147483647, %v1932_v32  ;;  %vm1938_vm7 = vweird.f32 %v1932_v32 }
 0xbaf   : > { %v1922_v44 = vmul.f32 %v1921_v40, %v1909_v5 }
 0xbb0   : > { %v1945_v46 = vor.u32 1.1754944e-38, %v1944_v39  ;;  %vm1943_vm11 = vcmp.eq.f32.partialorder %v1942_v43, 8.507059e+37 }
 0xbb4   : > { %v2508_v35 = vpop.eup %2507 }
 0xbb5   : > { %v1934_v37 = vmul.f32 %v2508_v35, %v1932_v32  ;;  %vm1939_vm6 = vweird.f32 %v2508_v35 }
 0xbb6   : > { %vm1940_vm10 = vmor %vm1938_vm7, %vm1939_vm6 }
 0xbb7   : > { %v1935_v38 = vsub.f32 1.0, %v1934_v37 }
 0xbb9   : > { %v1936_v42 = vmul.f32 %v2508_v35, %v1935_v38 }
 0xbbb   : > { %v1937_v45 = vadd.f32 %v2508_v35, %v1936_v42 }
 0xbbd   : > { %v1941_v47 = vsel %vm1940_vm10, %v2508_v35, %v1937_v45 }
 0xbbe   : > { %v1946_v48 = vsel %vm1943_vm11, %v1945_v46, %v1941_v47 }
 0xbbf   : > { %v1947_v41 = vmul.f32 %v1946_v48, %v1922_v44 }
 0xbc1   : > { %v2318_v49 = vclamps-f32 %v1947_v41, 1.0 }
 0xbc3   : > { %v1950_v51 = vadd.f32 1.0, %v2318_v49 }
 0xbc5   : > { %v1951_v52 = vmul.f32 %v1950_v51, %v1908_v50 }
 0xbc7   : > { %2319 = vmatmul.msk.f32.vlgmr.msra.gmra.mxu3 %vm1955_vm12, %v1951_v52 }
 0xc4a   : > { %v1976_v54 = vpop.f32.mrf.mxu3 }
 0xc4b   : > { %v1977_v55 = vadd.f32 %v2466_v53, %v1976_v54 }
 0xc4d   : > { %v1979_v56 = vadd.f32 %v1977_v55, %v3372_v1 }
 0xc4f   : > { %v1982_v57 = vsel %vm969_vm0, %v1979_v56, 0.0 }
 0xc50   : > { %1983 = vadd.xlane.f32.xlu0 %v1982_v57 }
 0xcc3   : > { %v1984_v58 = vpop.xlane.xlu0 %1983 }
 0xcc4   : > { %v1985_v59 = vmul.f32 %v1984_v58, %v3201_v12 }
 0xcc6   : > { %v1986_v60 = vsub.f32 %v1979_v56, %v1985_v59 }
 0xcc8   : > { %v1987_v61 = vmul.f32 %v1986_v60, %v1986_v60 }
 0xcca   : > { %v1988_v62 = vsel %vm969_vm0, %v1987_v61, 0.0 }
 0xccb   : > { %1989 = vadd.xlane.f32.xlu1 %v1988_v62 }
 0xccc   : > { %2718 = shalt.err (!%p2715_p8)
}
 0xccd   : > { %s2819_s1 = smov 128   ;;  %s2055_s20 = sshll.u32 %s3316_s9, 4  ;;  %s2056_s20 = int_to_ptr.vmem [resolvable:$true] %s2055_s20 }
 0xcce   : > { %2354 = dma.vmem_to_hbm [thread:$0]  (%p2993_p5), %s2039_s28, 512, %s2041_s6, %s2018_s30, %s2819_s1, %s2819_s1, %s3576_s0  }
 0xccf   : > { %s2057_s12 = sshll.u32 %s2054_s7, 4  ;;  %s2023_s18 = scalar_lea.sflag [#allocation15], %s3155_s10  ;;  %s2058_s12 = int_to_ptr.hbm [resolvable:$true] %s2057_s12 }
 0xcd0   : > { %s2733_s29 = sshra.s32 %s2058_s12, 4  ;;  %s2739_s4 = scalar_lea.hbm %s3492_s26, 64  ;;  %s2734_s29 = int_to_ptr.hbm [resolvable:$true] %s2733_s29 }
 0xcd1   : > { %s2735_s13 = scalar_lea.hbm %s2734_s29, 32  ;;  %p2740_p12 = scmp.lt.s32.totalorder %s2734_s29, %s3492_s26 }
 0xcd2   : > { %p2736_p9 = scmp.ne.s32.totalorder %s2734_s29, %s2735_s13  ;;  %p2741_p13 = scmp.lt.s32.totalorder %s2739_s4, %s2735_s13 }
 0xcd4   : > { %p2737_p10 = pnand %p2736_p9, %p2993_p5  ;;  %p2742_p0 = por %p2741_p13, %p2740_p12 }
 0xcd6   : > { %p2738_p11 = pneg %p2737_p10 }
 0xcd8   : > { %p2743_p1 = pnand %p2742_p0, %p2738_p11 }
 0xcda   : > { %2746 = shalt.err (!%p2743_p1)
}
 0xcdb   : > { %2355 = dma.vmem_to_hbm [thread:$0]  (%p2993_p5), %s2056_s20, 512, %s2058_s12, %s2023_s18, %s2819_s1, %s2819_s1, %s3576_s0   ;;  %v2467_v8 = vld [vmem:[#allocation10] ss:$0 sm:$0xff]  ;;  %v2468_v10 = vld [vmem:[#allocation11] ss:$0 sm:$0xff] }
 0xcdc   : > { %s3580_s9 = sld [smem:[#allocation47_spill]] }
 0xce2   : > { %s940_s0 = scalar_lea.vmem %s3580_s9, %s3069_s5 }
 0xd3e   : > { %v1990_v63 = vpop.xlane.xlu1 %1989 }
 0xd3f   : > { %v1991_v0 = vmul.f32 %v1990_v63, %v3201_v12 }
 0xd41   : > { %v1992_v1 = vadd.f32 1e-12, %v1991_v0 }
 0xd43   : > { %2509 = vrsqrt.f32 %v1992_v1  ;;  %vm1999_vm14 = vweird.f32 %v1992_v1 }
 0xd49   : > { %v2510_v17 = vpop.eup %2509 }
 0xd4a   : > { %v1994_v2 = vmul.f32 %v2510_v17, %v1992_v1  ;;  %vm2000_vm13 = vweird.f32 %v2510_v17 }
 0xd4b   : > { %vm2001_vm15 = vmor %vm1999_vm14, %vm2000_vm13 }
 0xd4c   : > { %v1995_v3 = vmul.f32 %v2510_v17, %v1994_v2 }
 0xd4e   : > { %v1996_v5 = vmul.f32 0.5, %v1995_v3 }
 0xd50   : > { %v1997_v6 = vsub.f32 1.5, %v1996_v5 }
 0xd52   : > { %v1998_v7 = vmul.f32 %v2510_v17, %v1997_v6 }
 0xd54   : > { %v2002_v9 = vsel %vm2001_vm15, %v2510_v17, %v1998_v7 }
 0xd55   : > { %v2003_v11 = vmul.f32 %v2002_v9, %v1986_v60 }
 0xd57   : > { %v2007_v13 = vmul.f32 %v2467_v8, %v2003_v11 }
 0xd59   : > { %v2011_v12 = vadd.f32 %v2468_v10, %v2007_v13 }
 0xd5b   : > { %2012 = vst.msk [vmem:[%s940_s0] sm:$0xff] %vm969_vm0, %v2011_v12 }
 0xd5c PF: > { %s3581_s7 = sld [smem:[#allocation24_spill]] }
 0xd5d   : > { %s3582_s28 = sld [smem:[#allocation22_spill]] }
 0xd62   : > { %p2396_p5 = scmp.ge.s32.totalorder %s3581_s7, 2 }
 0xd63   : > { %s2079_s30 = sand.u32 1, %s3582_s28  }
 0xd64   : > { %p2378_p2 = pnand %p2396_p5, %p2997_p6  ;;  %s2080_s21 = scalar_lea.sflag [#allocation4], %s2079_s30 }
 0xd66   : > { %p2379_p3 = pneg %p2378_p2 }
 0xd68   : > { %2780 = dma.done.wait (%p2379_p3), %s2080_s21, 512  }
 0xd69   : > { %2782 = vsyncadd (%p2379_p3), %s2080_s21, 4294966784  ;;  %s2090_s1 = scalar_lea.sflag [#allocation15], %s2079_s30 }
 0xd6a   : > { %2784 = dma.done.wait (%p2379_p3), %s2090_s1, 512  }
 0xd6b   : > { %2786 = vsyncadd (%p2379_p3), %s2090_s1, 4294966784  ;;  %s3584_s28 = sld [smem:[#allocation25_spill]]  ;;  %s3587_s27 = smov %s2793_s3 }
 0xd6c   : > { %s3585_s5 = sld [smem:[#allocation23_spill]] }
 0xd6d   : > { %s3586_s7 = sld [smem:[#allocation26_spill]] }
 0xd71   : > { %p44_p4 = scmp.ge.s32.totalorder %s3584_s28, 4  }
 0xd72   : > { %s3588_s3 = smov %s3585_s5 }
 0xd73   :  { %46 = sbr.rel (!%p44_p4) target bundleno = 30 (0x1e), region = 214 }
 0xd78   :  { %2096 = vsyncpa [#allocation3], 1 }
 0xd79   :  { %2098 = vsyncpa [#allocation3 + $0x1], 1 }
 0xd7a   :  { %2099 = vsyncpa [#allocation6], 1 }
 0xd7b   :  { %2100 = vsyncpa [#allocation9], 1 }
 0xd7c   :  { %2101 = vsyncpa [#allocation12], 1 }
 0xd7d   :  { %2102 = vsyncpa [#allocation4], 1 }
 0xd7e   :  { %2104 = vsyncpa [#allocation4 + $0x1], 1 }
 0xd7f   :  { %2105 = vsyncpa [#allocation15], 1 }
 0xd80   :  { %2107 = vsyncpa [#allocation15 + $0x1], 1 }

// kernel: _lambda_.7
= control target key start
LH: loop header
LB: loop body
LE: loop exit
PB: predicated region body
PF: predicated region fallthrough
CT: control target
= control target key end

     0   :  { %s3978_s0 = inlined_call_operand.vmem [shape: f32[2,8,32], index: 0, kind: input, shape index: {}]   ;;  %s3979_s1 = inlined_call_operand.vmem [shape: f32[2,8,32], index: 1, kind: input, shape index: {}]   ;;  %s3980_s2 = inlined_call_operand.vmem [shape: f32[2,1,8], index: 2, kind: input, shape index: {}]   ;;  %s3981_s3 = inlined_call_operand.vmem [shape: f32[2,1,8], index: 3, kind: input, shape index: {}]   ;;  %s3982_s4 = inlined_call_operand.vmem [shape: f32[32,96], index: 4, kind: input, shape index: {}]   ;;  %s3983_s5 = inlined_call_operand.vmem [shape: f32[1,96], index: 5, kind: input, shape index: {}]   ;;  %s3984_s6 = inlined_call_operand.vmem [shape: f32[32,32], index: 6, kind: input, shape index: {}]   ;;  %s3985_s7 = inlined_call_operand.hbm [shape: f32[1,32], index: 7, kind: input, shape index: {}]   ;;  %s3986_s8 = inlined_call_operand.vmem [shape: f32[32,32], index: 8, kind: input, shape index: {}]   ;;  %s3987_s9 = inlined_call_operand.hbm [shape: f32[1,32], index: 9, kind: input, shape index: {}]   ;;  %s3988_s10 = inlined_call_operand.vmem [shape: f32[32,64], index: 10, kind: input, shape index: {}]   ;;  %s3989_s11 = inlined_call_operand.hbm [shape: f32[1,64], index: 11, kind: input, shape index: {}]   ;;  %s3990_s12 = inlined_call_operand.vmem [shape: f32[32,32], index: 12, kind: input, shape index: {}]   ;;  %s3991_s13 = inlined_call_operand.hbm [shape: f32[1,32], index: 13, kind: input, shape index: {}]   ;;  %s3992_s14 = inlined_call_operand.vmem [shape: f32[32,64], index: 14, kind: input, shape index: {}]   ;;  %s3993_s15 = inlined_call_operand.hbm [shape: f32[1,64], index: 15, kind: input, shape index: {}]   ;;  %s3994_s16 = inlined_call_operand.vmem [shape: f32[64,32], index: 16, kind: input, shape index: {}]   ;;  %s3995_s17 = inlined_call_operand.hbm [shape: f32[1,32], index: 17, kind: input, shape index: {}]   ;;  %s3996_s18 = inlined_call_operand.hbm [shape: f32[1,32], index: 18, kind: input, shape index: {}]   ;;  %s3997_s19 = inlined_call_operand.hbm [shape: f32[1,32], index: 19, kind: input, shape index: {}]   ;;  %s3998_s20 = inlined_call_operand.hbm [shape: f32[1,32], index: 20, kind: input, shape index: {}]   ;;  %s3999_s21 = inlined_call_operand.hbm [shape: f32[1,32], index: 21, kind: input, shape index: {}]   ;;  %s4000_s22 = inlined_call_operand.hbm [shape: f32[1,32], index: 22, kind: input, shape index: {}]   ;;  %s4001_s23 = inlined_call_operand.hbm [shape: f32[1,32], index: 23, kind: input, shape index: {}]   ;;  %s4002_s24 = inlined_call_operand.hbm [shape: f32[2,8,32], index: 24, kind: output, shape index: {0}]   ;;  %s4003_s25 = inlined_call_operand.hbm [shape: f32[2,4,8,8], index: 25, kind: output, shape index: {1}]   ;;  %s4004_s26 = inlined_call_operand.hbm [shape: f32[2,4,8,8], index: 26, kind: output, shape index: {2}]  }
   0x1   :  { %4035 = sst [smem:[#allocation41_spill]] %s3978_s0 }
   0x2   :  { %4036 = sst [smem:[#allocation42_spill]] %s3979_s1 }
   0x3   :  { %4037 = sst [smem:[#allocation43_spill]] %s3980_s2 }
   0x4   :  { %4038 = sst [smem:[#allocation44_spill]] %s3981_s3 }
   0x5   :  { %4039 = sst [smem:[#allocation45_spill]] %s3982_s4 }
   0x6   :  { %4040 = sst [smem:[#allocation46_spill]] %s3983_s5 }
   0x7   :  { %4041 = sst [smem:[#allocation47_spill]] %s3984_s6 }
   0x8   :  { %4042 = sst [smem:[#allocation48_spill]] %s3985_s7 }
   0x9   :  { %4043 = sst [smem:[#allocation49_spill]] %s3986_s8 }
   0xa   :  { %4044 = sst [smem:[#allocation50_spill]] %s3987_s9 }
   0xb   :  { %4045 = sst [smem:[#allocation51_spill]] %s3988_s10 }
   0xc   :  { %4046 = sst [smem:[#allocation52_spill]] %s3989_s11 }
   0xd   :  { %4047 = sst [smem:[#allocation53_spill]] %s3990_s12 }
   0xe   :  { %4048 = sst [smem:[#allocation54_spill]] %s3991_s13 }
   0xf   :  { %4049 = sst [smem:[#allocation55_spill]] %s3992_s14 }
  0x10   :  { %4050 = sst [smem:[#allocation56_spill]] %s3993_s15 }
  0x11   :  { %4051 = sst [smem:[#allocation57_spill]] %s3995_s17 }
  0x12   :  { %4052 = sst [smem:[#allocation58_spill]] %s4002_s24 }
  0x13   :  { %4053 = sst [smem:[#allocation59_spill]] %s4004_s26 }
  0x14   :  { %32 = vsyncpa [#allocation3], 0 }
  0x15   :  { %33 = vsyncpa [#allocation6], 0 }
  0x16   :  { %34 = vsyncpa [#allocation9], 0 }
  0x17   :  { %35 = vsyncpa [#allocation12], 0 }
  0x18   :  { %36 = vsyncpa [#allocation15], 0 }
  0x19   :  { %37 = vsyncpa [#allocation18], 0 }
  0x1a   :  { %38 = vsyncpa [#allocation21], 0 }
  0x1b   :  { %39 = vsyncpa [#allocation4], 0 }
  0x1c   :  { %41 = vsyncpa [#allocation4 + $0x1], 0 }
  0x1d   :  { %42 = vsyncpa [#allocation24], 0 }
  0x1e   :  { %44 = vsyncpa [#allocation24 + $0x1], 0  ;;  %s3419_s27 = smov 0   ;;  %s3421_s3 = smov 0  }
  0x1f   :  { %s3423_s7 = smov 0   ;;  %s3425_s28 = smov 0  }
  0x20 LB: > { %4054 = sst [smem:[#allocation35_spill]] %s3247_s27  ;;  %s3440_s8 = sadd.s32 4294967295, %s3259_s28   ;;  %s3259_s28 = sphi %s3425_s28, %s4097_s28   ;;  %s3255_s7 = sphi %s3423_s7, %s4099_s7   ;;  %s3251_s3 = sphi %s3421_s3, %s4101_s3   ;;  %s3247_s27 = sphi %s3419_s27, %s4100_s27  }
  0x21   : > { %4055 = sst [smem:[#allocation36_spill]] %s3255_s7  ;;  %s4009_s4 = sadd.s32 4294967294, %s3259_s28  }
  0x22   : > { %4056 = sst [smem:[#allocation37_spill]] %s3259_s28  ;;  %s3444_s29 = sadd.s32 1, %s3259_s28  }
  0x23   : > { %4057 = sst [smem:[#allocation38_spill]] %s3444_s29  ;;  %s581_s0 = sadd.s32 1, %s3255_s7 }
  0x24   : > { %s578_s9 = ssub.s32 %s3259_s28, %s3444_s29  ;;  %p591_p0 = scmp.ne.s32.totalorder %s3255_s7, %s3251_s3 }
  0x25   : > { %p579_p1 = scmp.eq.s32.totalorder %s578_s9, 0  ;;  %p592_p2 = scmp.eq.s32.totalorder %s3440_s8, 1 }
  0x26   : > { %p597_p3 = scmp.ne.s32.totalorder %s3251_s3, %s3247_s27  ;;  %p598_p4 = scmp.eq.s32.totalorder %s4009_s4, 1 }
  0x27   : > { %s3457_s30 = scalar_select %p579_p1, %s3255_s7, %s581_s0  }
  0x28   : > { %p3459_p5 = por %p592_p2, %p591_p0  ;;  %p3463_p6 = por %p598_p4, %p597_p3 }
  0x29   : > { %4058 = sst [smem:[#allocation39_spill]] %s3457_s30  ;;  %p2427_p7 = scmp.ge.s32.totalorder %s3259_s28, 1 }
  0x2a   : > { %s4060_s5 = scalar_select %p3463_p6, 1, 0 }
  0x2b   : > { %p657_p8 = scmp.lt.s32.totalorder %s3259_s28, 3  ;;  %p2604_p9 = scmp.eq.s32.totalorder %s3440_s8, 0 }
  0x2c   : > { %4061 = sst [smem:[#allocation40_spill]] %s4060_s5  ;;  %s3261_s4 = smov [#allocation5]  }
  0x2d   : > { %p3470_p10 = pnand %p2427_p7, %p657_p8  ;;  %s4063_s9 = sld [smem:[#allocation50_spill]] }
  0x2e   : > { %s695_s30 = sshll.u32 %s3261_s4, 4  ;;  %s4064_s13 = sld [smem:[#allocation54_spill]]  ;;  %s696_s30 = int_to_ptr.vmem [resolvable:$true] %s695_s30 }
  0x2f   : > { %p2557_p11 = pneg %p3470_p10  ;;  %s4066_s17 = sld [smem:[#allocation57_spill]] }
  0x30   : > { %s3262_s28 = smov [#allocation8]   ;;  %s3263_s24 = smov [#allocation11]  }
  0x31   : > { %p3484_p12 = pnand %p2604_p9, %p2557_p11  ;;  %s725_s4 = sshll.u32 %s3262_s28, 4  ;;  %s726_s4 = int_to_ptr.vmem [resolvable:$true] %s725_s4 }
  0x32   : > { %s755_s26 = sshll.u32 %s3263_s24, 4  ;;  %s3264_s6 = smov [#allocation14]   ;;  %s756_s26 = int_to_ptr.vmem [resolvable:$true] %s755_s26 }
  0x33   : > { %s693_s0 = sshll.u32 %s4063_s9, 4  ;;  %s779_s28 = sshll.u32 %s3264_s6, 4  ;;  %s694_s0 = int_to_ptr.hbm [resolvable:$true] %s693_s0  ;;  %s780_s28 = int_to_ptr.vmem [resolvable:$true] %s779_s28 }
  0x34   : > { %s723_s5 = sshll.u32 %s4064_s13, 4  ;;  %s777_s13 = sshll.u32 %s3997_s19, 4  ;;  %s724_s5 = int_to_ptr.hbm [resolvable:$true] %s723_s5  ;;  %s778_s13 = int_to_ptr.hbm [resolvable:$true] %s777_s13 }
  0x35   : > { %s753_s9 = sshll.u32 %s4066_s17, 4  ;;  %s3265_s24 = smov [#allocation17]   ;;  %s754_s9 = int_to_ptr.hbm [resolvable:$true] %s753_s9 }
  0x36   : > { %2563 = dma.hbm_to_vmem [thread:$0]  (!%p3484_p12), %s694_s0, 16, %s696_s30, [#allocation6]  }
  0x37   : > { %2569 = dma.hbm_to_vmem [thread:$0]  (!%p3484_p12), %s724_s5, 16, %s726_s4, [#allocation9]  }
  0x38   : > { %2575 = dma.hbm_to_vmem [thread:$0]  (!%p3484_p12), %s754_s9, 16, %s756_s26, [#allocation12]  }
  0x39   : > { %s801_s30 = sshll.u32 %s3999_s21, 4  ;;  %s4067_s4 = sld [smem:[#allocation48_spill]]  ;;  %s802_s30 = int_to_ptr.hbm [resolvable:$true] %s801_s30 }
  0x3a   : > { %2581 = dma.hbm_to_vmem [thread:$0]  (!%p3484_p12), %s778_s13, 16, %s780_s28, [#allocation15]  }
  0x3b   : > { %s803_s29 = sshll.u32 %s3265_s24, 4  ;;  %s3266_s26 = smov [#allocation2]   ;;  %s804_s29 = int_to_ptr.vmem [resolvable:$true] %s803_s29 }
  0x3c   : > { %2587 = dma.hbm_to_vmem [thread:$0]  (!%p3484_p12), %s802_s30, 16, %s804_s29, [#allocation18]  }
  0x3d   : > { %s680_s9 = sshll.u32 %s3266_s26, 4  ;;  %s4068_s11 = sld [smem:[#allocation52_spill]]  ;;  %s681_s9 = int_to_ptr.vmem [resolvable:$true] %s680_s9 }
  0x3e   : > { %s4069_s15 = sld [smem:[#allocation56_spill]]  ;;  %s3267_s0 = smov [#allocation7]  }
  0x3f   : > { %s678_s7 = sshll.u32 %s4067_s4, 4  ;;  %s710_s4 = sshll.u32 %s3267_s0, 4  ;;  %s679_s7 = int_to_ptr.hbm [resolvable:$true] %s678_s7  ;;  %s711_s4 = int_to_ptr.vmem [resolvable:$true] %s710_s4 }
  0x40   : > { %2560 = dma.hbm_to_vmem [thread:$0]  (!%p3484_p12), %s679_s7, 16, %s681_s9, [#allocation3]  }
  0x41   : > { %s3268_s30 = smov [#allocation10]   ;;  %s765_s17 = sshll.u32 %s3996_s18, 4  ;;  %s766_s17 = int_to_ptr.hbm [resolvable:$true] %s765_s17 }
  0x42   : > { %s740_s24 = sshll.u32 %s3268_s30, 4  ;;  %s789_s6 = sshll.u32 %s3998_s20, 4  ;;  %s741_s24 = int_to_ptr.vmem [resolvable:$true] %s740_s24  ;;  %s790_s6 = int_to_ptr.hbm [resolvable:$true] %s789_s6 }
  0x43   : > { %s708_s1 = sshll.u32 %s4068_s11, 4  ;;  %s3269_s13 = smov [#allocation13]   ;;  %s709_s1 = int_to_ptr.hbm [resolvable:$true] %s708_s1 }
  0x44   : > { %s738_s5 = sshll.u32 %s4069_s15, 4  ;;  %s767_s28 = sshll.u32 %s3269_s13, 4  ;;  %s739_s5 = int_to_ptr.hbm [resolvable:$true] %s738_s5  ;;  %s768_s28 = int_to_ptr.vmem [resolvable:$true] %s767_s28 }
  0x45   : > { %2566 = dma.hbm_to_vmem [thread:$0]  (!%p3484_p12), %s709_s1, 16, %s711_s4, [#allocation6]  }
  0x46   : > { %2572 = dma.hbm_to_vmem [thread:$0]  (!%p3484_p12), %s739_s5, 16, %s741_s24, [#allocation9]  }
  0x47   : > { %2578 = dma.hbm_to_vmem [thread:$0]  (!%p3484_p12), %s766_s17, 16, %s768_s28, [#allocation12]  }
  0x48   : > { %s3270_s1 = smov [#allocation16]   ;;  %s813_s29 = sshll.u32 %s4000_s22, 4  ;;  %s814_s29 = int_to_ptr.hbm [resolvable:$true] %s813_s29 }
  0x49   : > { %s791_s0 = sshll.u32 %s3270_s1, 4  ;;  %s825_s26 = sshll.u32 %s4001_s23, 4  ;;  %s792_s0 = int_to_ptr.vmem [resolvable:$true] %s791_s0  ;;  %s826_s26 = int_to_ptr.hbm [resolvable:$true] %s825_s26 }
  0x4a   : > { %2584 = dma.hbm_to_vmem [thread:$0]  (!%p3484_p12), %s790_s6, 16, %s792_s0, [#allocation15]  }
  0x4b   : > { %s3271_s7 = smov [#allocation19]   ;;  %s3272_s17 = smov [#allocation20]  }
  0x4c   : > { %s815_s9 = sshll.u32 %s3271_s7, 4  ;;  %s827_s13 = sshll.u32 %s3272_s17, 4  ;;  %s816_s9 = int_to_ptr.vmem [resolvable:$true] %s815_s9  ;;  %s828_s13 = int_to_ptr.vmem [resolvable:$true] %s827_s13 }
  0x4d   : > { %2590 = dma.hbm_to_vmem [thread:$0]  (!%p3484_p12), %s814_s29, 16, %s816_s9, [#allocation18]  }
  0x4e   : > { %2593 = dma.hbm_to_vmem [thread:$0]  (!%p3484_p12), %s826_s26, 16, %s828_s13, [#allocation21]  }
  0x4f   : > { %866 = sbr.rel (%p3470_p10) target bundleno = 3447 (0xd77), region = 116 }
  0x54   : > { %3210 = dma.done.wait (%p2604_p9), [#allocation3], 16  }
  0x55   : > { %3212 = vsyncadd (%p2604_p9), [#allocation3], 4294967280 }
  0x56   : > { %3214 = dma.done.wait (%p2604_p9), [#allocation6], 32  }
  0x57   : > { %3216 = vsyncadd (%p2604_p9), [#allocation6], 4294967264 }
  0x58   : > { %3218 = dma.done.wait (%p2604_p9), [#allocation9], 32  }
  0x59   : > { %3220 = vsyncadd (%p2604_p9), [#allocation9], 4294967264 }
  0x5a   : > { %3222 = dma.done.wait (%p2604_p9), [#allocation12], 32  }
  0x5b   : > { %3224 = vsyncadd (%p2604_p9), [#allocation12], 4294967264 }
  0x5c   : > { %3226 = dma.done.wait (%p2604_p9), [#allocation15], 32  }
  0x5d   : > { %3228 = vsyncadd (%p2604_p9), [#allocation15], 4294967264 }
  0x5e   : > { %3230 = dma.done.wait (%p2604_p9), [#allocation18], 32  }
  0x5f   : > { %3232 = vsyncadd (%p2604_p9), [#allocation18], 4294967264 }
  0x60   : > { %3234 = dma.done.wait (%p2604_p9), [#allocation21], 16  }
  0x61   : > { %3236 = vsyncadd (%p2604_p9), [#allocation21], 4294967280  ;;  %p1011_p13 = scmp.lt.s32.totalorder %s3440_s8, 1  ;;  %s4070_s1 = sld [smem:[#allocation45_spill]]  ;;  %vm1053_vm0 = vcmask 261120   ;;  %vm1086_vm1 = vcmask 64512   ;;  %v1031_v16 = vlaneseq }
  0x62   : > { %s4071_s5 = sld [smem:[#allocation41_spill]]  ;;  %s4020_s0 = smov 96   ;;  %v3277_v17 = vmov 0  }
  0x63   : > { %s3574_s27 = scalar_select %p1011_p13, %s3440_s8, 1  ;;  %v1032_v19 = vshrl.u32 %v1031_v16, 7  ;;  %v1034_v20 = vand.u32 127, %v1031_v16 }
  0x64   : > { %s4072_s28 = sld [smem:[#allocation46_spill]]  ;;  %s4022_s4 = smov 104  }
  0x65   : > { %s2457_s10 = sshll.u32 %s3574_s27, 3  ;;  %s4030_s30 = smov 120   ;;  %vm1035_vm3 = vcmp.gt.s32.totalorder %v1034_v20, %v1032_v19 }
  0x66   : > { %s4024_s29 = smov 112   ;;  %s4073_s26 = sld [smem:[#allocation43_spill]] }
  0x67   : > { %v1043_v0 = vld [vmem:[%s4070_s1 + $0x18] sm:$0xff]  ;;  %v1042_v1 = vld [vmem:[%s4070_s1 + $0x10] sm:$0xff]  ;;  %v1041_v2 = vld [vmem:[%s4070_s1 + $0x8] sm:$0xff]  ;;  %s3278_s9 = smov 64   ;;  %s3662_s17 = sand.u32 1, %s3251_s3  }
  0x68   : > { %s1014_s24 = scalar_lea.vmem %s4071_s5, %s2457_s10  ;;  %1069 = vmatpush.msra.mxu0 %v1043_v0  ;;  %v1040_v3 = vld [vmem:[%s4070_s1] sm:$0xff]  ;;  %s4019_s13 = sshll.u32 %s3662_s17, 5 }
  0x69   : > { %v3594_v4 = vld [vmem:[%s1014_s24] sm:$0xff]  ;;  %s3668_s6 = scalar_lea.vmem [#allocation23], %s4019_s13  ;;  %s4027_s5 = smov 8  }
  0x6a   : > { %1070 = vmatpush.msra.mxu0 %v1042_v1  ;;  %v2694_v5 = vld [vmem:[%s4072_s28] ss:$0 sm:$0xff]  ;;  %s4026_s28 = smov 16   ;;  %s4029_s24 = smov 24  }
  0x6b   : > { %s4077_s13 = sld [smem:[#allocation49_spill]]  ;;  %s4086_s1 = smov 24  }
  0x6c   : > { %1071 = vmatpush.msra.mxu0 %v1041_v2  ;;  %s1021_s7 = scalar_lea.vmem %s4073_s26, %s3574_s27  ;;  %s4080_s26 = smov 104  }
  0x6d   : > { %v1027_v15 = vld [vmem:[%s1021_s7] sm:$0x1]  ;;  %s4076_s7 = sld [smem:[#allocation42_spill]]  ;;  %s4087_s11 = smov 8  }
  0x6e   : > { %1072 = vmatpush.msra.mxu0 %v1040_v3  ;;  %vm1028_vm2 = vcmp.gt.f32.partialorder %v1027_v15, 0.0  ;;  %s4089_s12 = sld [smem:[#allocation53_spill]] }
  0x6f   : > { %2459 = vmatmul.msk.f32.vlgmr.msra.gmra.mxu0 %vm1053_vm0, %v3594_v4  ;;  %v1036_v18 = vsel %vm1028_vm2, 1, %v3277_v17  ;;  %s4090_s14 = sld [smem:[#allocation55_spill]] }
  0x70   : > { %v1037_v21 = vperm.slane %v1036_v18, 0 }
  0x72   : > { %vm1038_vm4 = vcmp.eq.s32.totalorder %v1037_v21, 1 }
  0x73   : > { %vm1039_vm5 = vmor %vm1038_vm4, %vm1035_vm3 }
  0xec   : > { %v1074_v6 = vpop.f32.mrf.mxu0 }
  0xed   : > { %v3601_v7 = vadd.f32 %v2694_v5, %v1074_v6 }
  0xef   : > { %1084 = vrot.lane.b32.xlu2 %v3601_v7, %s4020_s0  ;;  %1082 = vrot.lane.b32.xlu1 %v3601_v7, %s4022_s4  ;;  %s4081_s4 = sld [smem:[#allocation44_spill]] }
  0xf0   : > { %1078 = vrot.lane.b32.xlu0 %v3601_v7, %s4030_s30  ;;  %s4088_s30 = smov 16  }
  0xf8   : > { %1080 = vrot.lane.b32.xlu0 %v3601_v7, %s4024_s29  ;;  %s4075_s29 = sld [smem:[#allocation51_spill]] }
 0x149   : > { %v1085_v8 = vpop.permute.xlu2 %1084 }
 0x14a   : > { %2460 = vmatpush.xpose.msk.msra.mxu1 %vm1086_vm1, %v1085_v8 }
 0x14d   : > { %2461 = vmatmul.msk.f32.vlgmr.msra.gmra.mxu1 %vm1086_vm1, %v3601_v7 }
 0x161   : > { %v3614_v9 = vpop.permute.xlu1 %1082 }
 0x162   : > { %v3616_v10 = vpop.permute.xlu0 %1078  ;;  %1163 = vrot.lane.b32.xlu0 %v3614_v9, %s4020_s0 }
 0x163   : > { %1111 = vrot.lane.b32.xlu1 %v3616_v10, %s4020_s0 }
 0x16a   : > { %v3622_v11 = vpop.permute.xlu0 %1080 }
 0x16b   : > { %1137 = vrot.lane.b32.xlu2 %v3622_v11, %s4020_s0  ;;  %v2684_v57 = vpack.i.bf16 %v3614_v9, %v3622_v11  ;;  %s2134_s0 = sshll.u32 %s3668_s6, 4  ;;  %s2135_s0 = int_to_ptr.vmem [resolvable:$true] %s2134_s0 }
 0x1c5   : > { %v1138_v12 = vpop.permute.xlu2 %1137 }
 0x1c6   : > { %2464 = vmatpush.xpose.msk.msrb.mxu0 %vm1086_vm1, %v1138_v12 }
 0x1c9   : > { %2465 = vmatmul.msk.f32.vlgmr.msrb.gmra.mxu0 %vm1086_vm1, %v3622_v11 }
 0x1ca   : > { %v1108_v24 = vpop.f32.mrf.mxu1 }
 0x1cb   : > { %v1189_v27 = vmul.f32 0.35355338, %v1108_v24 }
 0x1cd   : > { %v1195_v28 = vsel %vm1039_vm5, -1e+09, %v1189_v27 }
 0x1ce   : > { %v1199_v29 = vsel %vm1086_vm1, %v1195_v28, -inf }
 0x1d4   : > { %v1164_v13 = vpop.permute.xlu0 %1163 }
 0x1d5   : > { %v1112_v14 = vpop.permute.xlu1 %1111  ;;  %2466 = vmatpush.xpose.msk.msrb.mxu1 %vm1086_vm1, %v1164_v13 }
 0x1d6   : > { %2462 = vmatpush.xpose.msk.msra.mxu2 %vm1086_vm1, %v1112_v14 }
 0x1d8   : > { %2467 = vmatmul.msk.f32.vlgmr.msrb.gmra.mxu1 %vm1086_vm1, %v3614_v9 }
 0x1d9   : > { %2463 = vmatmul.msk.f32.vlgmr.msra.gmra.mxu2 %vm1086_vm1, %v3616_v10 }
 0x246   : > { %v1160_v22 = vpop.f32.mrf.mxu0 }
 0x247   : > { %v1191_v23 = vmul.f32 0.35355338, %v1160_v22 }
 0x249   : > { %v1197_v25 = vsel %vm1039_vm5, -1e+09, %v1191_v23 }
 0x24a   : > { %v1205_v26 = vsel %vm1086_vm1, %v1197_v25, -inf }
 0x24b   : > { %1206 = vmax.xlane.f32.xlu2 %v1205_v26 }
 0x253   : > { %1200 = vmax.xlane.f32.xlu2 %v1199_v29 }
 0x255   : > { %v1186_v30 = vpop.f32.mrf.mxu1 }
 0x256   : > { %v1192_v31 = vmul.f32 0.35355338, %v1186_v30 }
 0x258   : > { %v1198_v32 = vsel %vm1039_vm5, -1e+09, %v1192_v31 }
 0x259   : > { %v1208_v33 = vsel %vm1086_vm1, %v1198_v32, -inf }
 0x25a   : > { %1209 = vmax.xlane.f32.xlu0 %v1208_v33 }
 0x25c   : > { %v1134_v34 = vpop.f32.mrf.mxu2 }
 0x25d   : > { %v1190_v35 = vmul.f32 0.35355338, %v1134_v34 }
 0x25f   : > { %v1196_v36 = vsel %vm1039_vm5, -1e+09, %v1190_v35 }
 0x260   : > { %v1202_v37 = vsel %vm1086_vm1, %v1196_v36, -inf }
 0x261   : > { %1203 = vmax.xlane.f32.xlu1 %v1202_v37 }
 0x2be   : > { %v1207_v38 = vpop.xlane.xlu2 %1206 }
 0x2bf   : > { %v1213_v39 = vsub.f32 %v1197_v25, %v1207_v38 }
 0x2c1   : > { %v1219_v40 = vmul.f32 1.442695, %v1213_v39 }
 0x2c3   : > { %2707 = vpow2.f32 %v1219_v40 }
 0x2c6   : > { %v1201_v43 = vpop.xlane.xlu2 %1200 }
 0x2c7   : > { %v1211_v46 = vsub.f32 %v1195_v28, %v1201_v43 }
 0x2c9   : > { %v2708_v41 = vpop.eup %2707  ;;  %v1215_v48 = vmul.f32 1.442695, %v1211_v46 }
 0x2ca   : > { %v1229_v42 = vsel %vm1086_vm1, %v2708_v41, 0.0 }
 0x2cb   : > { %1230 = vadd.xlane.f32.xlu2 %v1229_v42 }
 0x2cd   : > { %v1210_v44 = vpop.xlane.xlu0 %1209 }
 0x2ce   : > { %v1214_v45 = vsub.f32 %v1198_v32, %v1210_v44 }
 0x2d0   : > { %v1221_v47 = vmul.f32 1.442695, %v1214_v45 }
 0x2d2   : > { %2709 = vpow2.f32 %v1221_v47 }
 0x2d3   : > { %2711 = vpow2.f32 %v1215_v48 }
 0x2d4   : > { %v1204_v49 = vpop.xlane.xlu1 %1203 }
 0x2d5   : > { %v1212_v50 = vsub.f32 %v1196_v36, %v1204_v49 }
 0x2d7   : > { %v1217_v51 = vmul.f32 1.442695, %v1212_v50 }
 0x2d8   : > { %v3645_v52 = vpop.eup %2709 }
 0x2d9   : > { %2713 = vpow2.f32 %v1217_v51  ;;  %v1232_v53 = vsel %vm1086_vm1, %v3645_v52, 0.0  ;;  %v3649_v54 = vpop.eup %2711 }
 0x2da   : > { %1233 = vadd.xlane.f32.xlu0 %v1232_v53  ;;  %v1223_v58 = vsel %vm1086_vm1, %v3649_v54, 0.0 }
 0x2df   : > { %v3651_v55 = vpop.eup %2713 }
 0x2e0   : > { %v1226_v56 = vsel %vm1086_vm1, %v3651_v55, 0.0 }
 0x2e1   : > { %1227 = vadd.xlane.f32.xlu1 %v1226_v56 }
 0x2e2   : > { %1224 = vadd.xlane.f32.xlu0 %v1223_v58 }
 0x2e3   : > { %2685 = vrot.lane.b32.xlu2 %v2684_v57, %s3278_s9 }
 0x2f6   : > { %1295 = vrot.lane.b32.xlu0 %v3601_v7, %s3278_s9 }
 0x2fa   : > { %1321 = vrot.lane.b32.xlu1 %v3616_v10, %s3278_s9  ;;  %s4074_s9 = sld [smem:[#allocation47_spill]] }
 0x300   : > { %v1048_v53 = vld [vmem:[%s4074_s9 + $0x18] sm:$0xff]  ;;  %v1045_v56 = vld [vmem:[%s4074_s9] sm:$0xff] }
 0x33e   : > { %v1231_v59 = vpop.xlane.xlu2 %1230 }
 0x33f   : > { %2715 = vrcp.f32 %v1231_v59  ;;  %v1274_v2 = vand.u32 2147483648, %v1231_v59  ;;  %v1272_v5 = vand.u32 2147483647, %v1231_v59  ;;  %vm1268_vm7 = vweird.f32 %v1231_v59 }
 0x341   : > { %v1275_v7 = vor.u32 1.1754944e-38, %v1274_v2  ;;  %vm1273_vm9 = vcmp.eq.f32.partialorder %v1272_v5, 8.507059e+37 }
 0x345   : > { %v2716_v60 = vpop.eup %2715 }
 0x346   : > { %v1264_v61 = vmul.f32 %v2716_v60, %v1231_v59  ;;  %v2686_v62 = vpop.permute.xlu2 %2685  ;;  %vm1269_vm6 = vweird.f32 %v2716_v60 }
 0x347   : > { %v2688_v63 = vunpack.i.h.bf16 %v2686_v62  ;;  %v2687_v0 = vunpack.i.l.bf16 %v2686_v62  ;;  %vm1270_vm8 = vmor %vm1268_vm7, %vm1269_vm6 }
 0x348   : > { %v1265_v1 = vsub.f32 1.0, %v1264_v61 }
 0x349   : > { %1368 = vmatpush.msra.mxu0 %v2687_v0  ;;  %1394 = vmatpush.msra.mxu1 %v2688_v63  ;;  %v2695_v0 = vld [vmem:[#allocation2] ss:$0 sm:$0xff] }
 0x34a   : > { %v1266_v3 = vmul.f32 %v2716_v60, %v1265_v1 }
 0x34c   : > { %v1267_v6 = vadd.f32 %v2716_v60, %v1266_v3 }
 0x34d   : > { %v1234_v8 = vpop.xlane.xlu0 %1233 }
 0x34e   : > { %v1271_v9 = vsel %vm1270_vm8, %v2716_v60, %v1267_v6  ;;  %2717 = vrcp.f32 %v1234_v8  ;;  %v1288_v18 = vand.u32 2147483648, %v1234_v8  ;;  %v1286_v20 = vand.u32 2147483647, %v1234_v8 }
 0x34f   : > { %v1276_v10 = vsel %vm1273_vm9, %v1275_v7, %v1271_v9  ;;  %vm1282_vm11 = vweird.f32 %v1234_v8  ;;  %vm1412_vm8 = vcmask 130048   ;;  %vm1414_vm9 = vcmask 195584  }
 0x350   : > { %v1293_v11 = vmul.f32 %v2708_v41, %v1276_v10  ;;  %v1289_v24 = vor.u32 1.1754944e-38, %v1288_v18  ;;  %vm1287_vm13 = vcmp.eq.f32.partialorder %v1286_v20, 8.507059e+37  ;;  %v3282_v6 = vmov 32.0   ;;  %v1494_v18 = vld [vmem:[%s4075_s29 + $0x18] sm:$0xff]  ;;  %v1492_v20 = vld [vmem:[%s4075_s29 + $0x8] sm:$0xff] }
 0x351   : > { %1545 = vmatpush.msrb.mxu0 %v1494_v18 }
 0x352   : > { %2470 = vmatmul.msk.f32.vlgmr.msra.gmra.mxu0 %vm1086_vm1, %v1293_v11  ;;  %1444 = vst.msk [vmem:[%s3668_s6 + $0x10] sm:$0xff] %vm1086_vm1, %v1293_v11 }
 0x354   : > { %v2718_v12 = vpop.eup %2717  ;;  %v1228_v13 = vpop.xlane.xlu1 %1227 }
 0x355   : > { %v1278_v14 = vmul.f32 %v2718_v12, %v1234_v8  ;;  %2719 = vrcp.f32 %v1228_v13  ;;  %v1225_v15 = vpop.xlane.xlu0 %1224  ;;  %vm1283_vm10 = vweird.f32 %v2718_v12  ;;  %v1260_v30 = vand.u32 2147483648, %v1228_v13 }
 0x356   : > { %2721 = vrcp.f32 %v1225_v15  ;;  %vm1284_vm12 = vmor %vm1282_vm11, %vm1283_vm10  ;;  %v1246_v34 = vand.u32 2147483648, %v1225_v15  ;;  %v1258_v35 = vand.u32 2147483647, %v1228_v13  ;;  %v1244_v37 = vand.u32 2147483647, %v1225_v15 }
 0x357   : > { %v1279_v16 = vsub.f32 1.0, %v1278_v14  ;;  %vm1254_vm2 = vweird.f32 %v1228_v13  ;;  %v1261_v39 = vor.u32 1.1754944e-38, %v1260_v30  ;;  %vm1240_vm3 = vweird.f32 %v1225_v15 }
 0x358   : > { %v1247_v41 = vor.u32 1.1754944e-38, %v1246_v34  ;;  %vm1259_vm6 = vcmp.eq.f32.partialorder %v1258_v35, 8.507059e+37  ;;  %vm1245_vm7 = vcmp.eq.f32.partialorder %v1244_v37, 8.507059e+37  ;;  %2723 = vrcp.f32 %v3282_v6 }
 0x359   : > { %v1280_v19 = vmul.f32 %v2718_v12, %v1279_v16 }
 0x35b   : > { %v2720_v21 = vpop.eup %2719  ;;  %v1281_v22 = vadd.f32 %v2718_v12, %v1280_v19  ;;  %v1493_v19 = vld [vmem:[%s4075_s29 + $0x10] sm:$0xff] }
 0x35c   : > { %v2722_v23 = vpop.eup %2721  ;;  %v1250_v25 = vmul.f32 %v2720_v21, %v1228_v13  ;;  %vm1255_vm14 = vweird.f32 %v2720_v21  ;;  %1546 = vmatpush.msrb.mxu0 %v1493_v19 }
 0x35d   : > { %v1285_v26 = vsel %vm1284_vm12, %v2718_v12, %v1281_v22  ;;  %v1236_v27 = vmul.f32 %v2722_v23, %v1225_v15  ;;  %vm1241_vm15 = vweird.f32 %v2722_v23  ;;  %vm1256_vm4 = vmor %vm1254_vm2, %vm1255_vm14 }
 0x35e   : > { %v1290_v28 = vsel %vm1287_vm13, %v1289_v24, %v1285_v26  ;;  %v1251_v29 = vsub.f32 1.0, %v1250_v25  ;;  %vm1242_vm5 = vmor %vm1240_vm3, %vm1241_vm15  ;;  %v2724_v7 = vpop.eup %2723  ;;  %1547 = vmatpush.msrb.mxu0 %v1492_v20  ;;  %v1488_v24 = vld [vmem:[%s4077_s13 + $0x10] sm:$0xff]  ;;  %v1487_v25 = vld [vmem:[%s4077_s13 + $0x8] sm:$0xff] }
 0x35f   : > { %v1237_v31 = vsub.f32 1.0, %v1236_v27  ;;  %v1294_v32 = vmul.f32 %v3645_v52, %v1290_v28  ;;  %v1453_v8 = vmul.f32 32.0, %v2724_v7  ;;  %vm1457_vm10 = vweird.f32 %v2724_v7  ;;  %v1486_v26 = vld [vmem:[%s4077_s13] sm:$0xff] }
 0x360   : > { %v1252_v33 = vmul.f32 %v2720_v21, %v1251_v29 }
 0x361   : > { %v1238_v36 = vmul.f32 %v2722_v23, %v1237_v31  ;;  %2471 = vmatmul.msk.f32.vlgmr.msra.gmra.mxu1 %vm1086_vm1, %v1294_v32  ;;  %1445 = vst.msk [vmem:[%s3668_s6 + $0x18] sm:$0xff] %vm1086_vm1, %v1294_v32  ;;  %v1454_v9 = vsub.f32 1.0, %v1453_v8 }
 0x362   : > { %v1253_v38 = vadd.f32 %v2720_v21, %v1252_v33 }
 0x363   : > { %v1239_v40 = vadd.f32 %v2722_v23, %v1238_v36  ;;  %v1455_v10 = vmul.f32 %v2724_v7, %v1454_v9  ;;  %v2696_v36 = vld [vmem:[#allocation13] ss:$0 sm:$0xff] }
 0x364   : > { %v1257_v42 = vsel %vm1256_vm4, %v2720_v21, %v1253_v38  ;;  %v1491_v21 = vld [vmem:[%s4075_s29] sm:$0xff] }
 0x365   : > { %v1243_v43 = vsel %vm1242_vm5, %v2722_v23, %v1239_v40  ;;  %v1262_v44 = vsel %vm1259_vm6, %v1261_v39, %v1257_v42  ;;  %v1456_v11 = vadd.f32 %v2724_v7, %v1455_v10  ;;  %1548 = vmatpush.msrb.mxu0 %v1491_v21  ;;  %v1489_v23 = vld [vmem:[%s4077_s13 + $0x18] sm:$0xff]  ;;  %v2697_v39 = vld [vmem:[#allocation14] ss:$0 sm:$0xff]  ;;  %v2698_v42 = vld [vmem:[#allocation7] ss:$0 sm:$0xff] }
 0x366   : > { %v1248_v45 = vsel %vm1245_vm7, %v1247_v41, %v1243_v43  ;;  %v1292_v46 = vmul.f32 %v3651_v55, %v1262_v44  ;;  %v1046_v55 = vld [vmem:[%s4074_s9 + $0x8] sm:$0xff] }
 0x367   : > { %v1291_v47 = vmul.f32 %v3649_v54, %v1248_v45  ;;  %v1047_v54 = vld [vmem:[%s4074_s9 + $0x10] sm:$0xff]  ;;  %v3705_v12 = vsel %vm1457_vm10, %v2724_v7, %v1456_v11  ;;  %s4079_s9 = smov 112   ;;  %v2699_v45 = vld [vmem:[#allocation5] ss:$0 sm:$0xff] }
 0x368   : > { %v1296_v48 = vpop.permute.xlu0 %1295  ;;  %1443 = vst.msk [vmem:[%s3668_s6 + $0x8] sm:$0xff] %vm1086_vm1, %v1292_v46 }
 0x369   : > { %1316 = vmatpush.msrb.mxu2 %v1296_v48  ;;  %1442 = vst.msk [vmem:[%s3668_s6] sm:$0xff] %vm1086_vm1, %v1291_v47  ;;  %s3129_s6 = scalar_lea.hbm %s4003_s25, 64 }
 0x36a   : > { %2468 = vmatmul.msk.f32.vlgmr.msrb.gmra.mxu2 %vm1086_vm1, %v1291_v47 }
 0x36b   : > { %1434 = vmatpush.msra.mxu2 %v1048_v53 }
 0x36c   : > { %v1322_v49 = vpop.permute.xlu1 %1321 }
 0x36d   : > { %1342 = vmatpush.msra.mxu3 %v1322_v49  ;;  %1435 = vmatpush.msra.mxu2 %v1047_v54 }
 0x36e   : > { %2469 = vmatmul.msk.f32.vlgmr.msra.gmra.mxu3 %vm1086_vm1, %v1292_v46 }
 0x36f   : > { %1436 = vmatpush.msra.mxu2 %v1046_v55  ;;  %1519 = vmatpush.msrb.mxu3 %v1489_v23 }
 0x371   : > { %1437 = vmatpush.msra.mxu2 %v1045_v56  ;;  %1520 = vmatpush.msrb.mxu3 %v1488_v24 }
 0x373   : > { %1521 = vmatpush.msrb.mxu3 %v1487_v25 }
 0x375   : > { %1522 = vmatpush.msrb.mxu3 %v1486_v26 }
 0x3cf   : > { %v1370_v50 = vpop.f32.mrf.mxu0 }
 0x3d0   : > { %1404 = vrot.lane.b32.xlu2 %v1370_v50, %s4026_s28  ;;  %s1024_s28 = scalar_lea.vmem %s4081_s4, %s3574_s27  ;;  %s4084_s27 = smov 96  }
 0x3d1   : > { %v1029_v55 = vld [vmem:[%s1024_s28] sm:$0x1] }
 0x3d2   : > { %vm1030_vm14 = vcmp.gt.f32.partialorder %v1029_v55, 0.0 }
 0x3d3   : > { %v1667_v56 = vsel %vm1030_vm14, 1, %v3277_v17 }
 0x3de   : > { %v1396_v52 = vpop.f32.mrf.mxu1 }
 0x3ed   : > { %v1318_v58 = vpop.f32.mrf.mxu2 }
 0x3f1   : > { %v1344_v51 = vpop.f32.mrf.mxu3 }
 0x3f2   : > { %1400 = vrot.lane.b32.xlu1 %v1344_v51, %s4027_s5  ;;  %s4085_s5 = sshll.u32 %s3662_s17, 5 }
 0x3fa   : > { %1408 = vrot.lane.b32.xlu1 %v1396_v52, %s4029_s24  ;;  %s1018_s24 = scalar_lea.vmem %s4076_s7, %s2457_s10  ;;  %s3815_s10 = scalar_lea.vmem [#allocation25], %s4085_s5 }
 0x3fb   : > { %v1026_v22 = vld [vmem:[%s1018_s24] sm:$0xff]  ;;  %s4078_s24 = smov 120   ;;  %s4091_s5 = sld [smem:[#allocation59_spill]] }
 0x3fc   : > { %2474 = vmatmul.msk.f32.vlgmr.msrb.gmra.mxu0 %vm1053_vm0, %v1026_v22 }
 0x42a   : > { %v1405_v60 = vpop.permute.xlu2 %1404 }
 0x464   : > { %v1401_v57 = vpop.permute.xlu1 %1400 }
 0x465   : > { %v1411_v59 = vsel %vm1086_vm1, %v1318_v58, %v1401_v57  ;;  %v1668_v57 = vperm.slane %v1667_v56, 0 }
 0x466   : > { %v1413_v62 = vsel %vm1412_vm8, %v1411_v59, %v1405_v60 }
 0x467   : > { %vm3777_vm15 = vcmp.eq.s32.totalorder %v1668_v57, 1 }
 0x46c   : > { %v1409_v61 = vpop.permute.xlu1 %1408 }
 0x46d   : > { %v1415_v63 = vsel %vm1414_vm9, %v1413_v62, %v1409_v61 }
 0x46e   : > { %2472 = vmatmul.msk.f32.vlgmr.msra.gmra.mxu2 %vm1053_vm0, %v1415_v63 }
 0x479   : > { %v1550_v43 = vpop.f32.mrf.mxu0 }
 0x47a   : > { %v3744_v44 = vadd.f32 %v2698_v42, %v1550_v43 }
 0x47c   : > { %1561 = vrot.lane.b32.xlu1 %v3744_v44, %s4078_s24  ;;  %2475 = vmatpush.xpose.msk.msrb.mxu1 %vm1086_vm1, %v3744_v44 }
 0x484   : > { %1563 = vrot.lane.b32.xlu1 %v3744_v44, %s4079_s9 }
 0x4ee   : > { %v3758_v48 = vpop.permute.xlu1 %1561 }
 0x4ef   : > { %2477 = vmatpush.xpose.msk.msrb.mxu2 %vm1086_vm1, %v3758_v48 }
 0x4f1   : > { %v1439_v1 = vpop.f32.mrf.mxu2 }
 0x4f2   : > { %v1440_v2 = vadd.f32 %v2695_v0, %v1439_v1 }
 0x4f4   : > { %v1446_v3 = vadd.f32 %v1440_v2, %v3594_v4 }
 0x4f6   : > { %v1449_v5 = vsel %vm1053_vm0, %v1446_v3, 0.0  ;;  %v3762_v49 = vpop.permute.xlu1 %1563 }
 0x4f7   : > { %1450 = vadd.xlane.f32.xlu0 %v1449_v5  ;;  %v2689_v50 = vpack.i.bf16 %v3762_v49, %v3758_v48  ;;  %2479 = vmatpush.xpose.msk.msra.mxu3 %vm1086_vm1, %v3762_v49 }
 0x56a   : > { %v1451_v13 = vpop.xlane.xlu0 %1450 }
 0x56b   : > { %v1459_v14 = vmul.f32 %v3705_v12, %v1451_v13 }
 0x56d   : > { %v1460_v15 = vsub.f32 %v1446_v3, %v1459_v14 }
 0x56f   : > { %v1461_v16 = vmul.f32 %v1460_v15, %v1460_v15 }
 0x571   : > { %v1462_v4 = vsel %vm1053_vm0, %v1461_v16, 0.0 }
 0x572   : > { %1463 = vadd.xlane.f32.xlu2 %v1462_v4 }
 0x5e5   : > { %v1464_v27 = vpop.xlane.xlu2 %1463 }
 0x5e6   : > { %v1465_v28 = vmul.f32 %v1464_v27, %v3705_v12 }
 0x5e8   : > { %v1466_v29 = vadd.f32 1e-12, %v1465_v28 }
 0x5ea   : > { %2725 = vrsqrt.f32 %v1466_v29  ;;  %vm1473_vm12 = vweird.f32 %v1466_v29 }
 0x5f0   : > { %v2726_v30 = vpop.eup %2725 }
 0x5f1   : > { %v1468_v31 = vmul.f32 %v2726_v30, %v1466_v29  ;;  %vm1474_vm11 = vweird.f32 %v2726_v30 }
 0x5f2   : > { %vm1475_vm13 = vmor %vm1473_vm12, %vm1474_vm11 }
 0x5f3   : > { %v1469_v32 = vmul.f32 %v2726_v30, %v1468_v31 }
 0x5f5   : > { %v1470_v33 = vmul.f32 0.5, %v1469_v32 }
 0x5f7   : > { %v1471_v34 = vsub.f32 1.5, %v1470_v33 }
 0x5f9   : > { %v1472_v35 = vmul.f32 %v2726_v30, %v1471_v34 }
 0x5fb   : > { %v1476_v37 = vsel %vm1475_vm13, %v2726_v30, %v1472_v35 }
 0x5fc   : > { %v1477_v38 = vmul.f32 %v1476_v37, %v1460_v15 }
 0x5fe   : > { %v1481_v40 = vmul.f32 %v2696_v36, %v1477_v38 }
 0x600   : > { %v3740_v41 = vadd.f32 %v2697_v39, %v1481_v40 }
 0x602   : > { %2473 = vmatmul.msk.f32.vlgmr.msrb.gmra.mxu3 %vm1053_vm0, %v3740_v41 }
 0x685   : > { %v1524_v46 = vpop.f32.mrf.mxu3 }
 0x686   : > { %v1525_v47 = vadd.f32 %v2699_v45, %v1524_v46 }
 0x688   : > { %1558 = vrot.lane.b32.xlu0 %v1525_v47, %s4080_s26  ;;  %1554 = vrot.lane.b32.xlu1 %v1525_v47, %s4078_s24  ;;  %s2501_s24 = sshll.u32 %s3440_s8, 5 }
 0x689   : > { %2476 = vmatmul.msk.f32.vlgmr.msrb.gmra.mxu1 %vm1086_vm1, %v1525_v47  ;;  %s2133_s7 = scalar_lea.hbm %s4003_s25, %s2501_s24 }
 0x68a   : > { %s2136_s4 = sshll.u32 %s2133_s7, 4  ;;  %s2137_s4 = int_to_ptr.hbm [resolvable:$true] %s2136_s4 }
 0x68b   : > { %s3123_s13 = sshra.s32 %s2137_s4, 4  ;;  %s3124_s13 = int_to_ptr.hbm [resolvable:$true] %s3123_s13 }
 0x68c   : > { %p3130_p3 = scmp.lt.s32.totalorder %s3124_s13, %s4003_s25 }
 0x690   : > { %1556 = vrot.lane.b32.xlu1 %v1525_v47, %s4079_s9 }
 0x698   : > { %1565 = vrot.lane.b32.xlu1 %v3744_v44, %s4080_s26 }
 0x6fa   : > { %v1555_v51 = vpop.permute.xlu1 %1554  ;;  %v1559_v54 = vpop.permute.xlu0 %1558 }
 0x6fb   : > { %2478 = vmatmul.msk.f32.vlgmr.msrb.gmra.mxu2 %vm1086_vm1, %v1555_v51 }
 0x702   : > { %v1557_v52 = vpop.permute.xlu1 %1556 }
 0x703   : > { %2480 = vmatmul.msk.f32.vlgmr.msra.gmra.mxu3 %vm1086_vm1, %v1557_v52 }
 0x706   : > { %v1588_v5 = vpop.f32.mrf.mxu1 }
 0x707   : > { %v1663_v8 = vmul.f32 0.35355338, %v1588_v5 }
 0x709   : > { %v1670_v9 = vsel %vm3777_vm15, -1e+09, %v1663_v8 }
 0x70a   : > { %v1566_v53 = vpop.permute.xlu1 %1565  ;;  %v1674_v10 = vsel %vm1086_vm1, %v1670_v9, -inf }
 0x70b   : > { %2481 = vmatpush.xpose.msk.msra.mxu0 %vm1086_vm1, %v1566_v53 }
 0x70e   : > { %2482 = vmatmul.msk.f32.vlgmr.msra.gmra.mxu0 %vm1086_vm1, %v1559_v54 }
 0x77e   : > { %v1612_v58 = vpop.f32.mrf.mxu2 }
 0x77f   : > { %v1664_v59 = vmul.f32 0.35355338, %v1612_v58 }
 0x781   : > { %v1671_v61 = vsel %vm3777_vm15, -1e+09, %v1664_v59 }
 0x782   : > { %v1677_v62 = vsel %vm1086_vm1, %v1671_v61, -inf }
 0x783   : > { %1678 = vmax.xlane.f32.xlu2 %v1677_v62 }
 0x786   : > { %v1636_v63 = vpop.f32.mrf.mxu3 }
 0x787   : > { %v1665_v0 = vmul.f32 0.35355338, %v1636_v63 }
 0x789   : > { %v1672_v1 = vsel %vm3777_vm15, -1e+09, %v1665_v0 }
 0x78a   : > { %v1680_v17 = vsel %vm1086_vm1, %v1672_v1, -inf }
 0x78b   : > { %1681 = vmax.xlane.f32.xlu1 %v1680_v17  ;;  %v1660_v2 = vpop.f32.mrf.mxu0 }
 0x78c   : > { %v1666_v3 = vmul.f32 0.35355338, %v1660_v2 }
 0x78e   : > { %v1673_v6 = vsel %vm3777_vm15, -1e+09, %v1666_v3 }
 0x78f   : > { %v1683_v7 = vsel %vm1086_vm1, %v1673_v6, -inf }
 0x790   : > { %1684 = vmax.xlane.f32.xlu2 %v1683_v7 }
 0x798   : > { %1675 = vmax.xlane.f32.xlu2 %v1674_v10 }
 0x7a4   : > { %1848 = vrot.lane.b32.xlu1 %v1566_v53, %s4084_s27 }
 0x7f6   : > { %v1679_v11 = vpop.xlane.xlu2 %1678 }
 0x7f7   : > { %v1687_v13 = vsub.f32 %v1671_v61, %v1679_v11 }
 0x7f9   : > { %v1692_v14 = vmul.f32 1.442695, %v1687_v13 }
 0x7fb   : > { %2727 = vpow2.f32 %v1692_v14 }
 0x7fe   : > { %v1682_v4 = vpop.xlane.xlu1 %1681 }
 0x7ff   : > { %v1688_v20 = vsub.f32 %v1672_v1, %v1682_v4 }
 0x801   : > { %v2728_v15 = vpop.eup %2727  ;;  %v1694_v22 = vmul.f32 1.442695, %v1688_v20 }
 0x802   : > { %v1701_v16 = vsel %vm1086_vm1, %v2728_v15, 0.0 }
 0x803   : > { %1702 = vadd.xlane.f32.xlu0 %v1701_v16  ;;  %v1685_v18 = vpop.xlane.xlu2 %1684 }
 0x804   : > { %v1689_v19 = vsub.f32 %v1673_v6, %v1685_v18 }
 0x806   : > { %v1696_v21 = vmul.f32 1.442695, %v1689_v19 }
 0x808   : > { %2729 = vpow2.f32 %v1696_v21 }
 0x809   : > { %2731 = vpow2.f32 %v1694_v22 }
 0x80b   : > { %v1676_v23 = vpop.xlane.xlu2 %1675 }
 0x80c   : > { %v1686_v24 = vsub.f32 %v1670_v9, %v1676_v23 }
 0x80e   : > { %v3795_v25 = vpop.eup %2729  ;;  %v1690_v26 = vmul.f32 1.442695, %v1686_v24 }
 0x80f   : > { %v1707_v27 = vsel %vm1086_vm1, %v3795_v25, 0.0  ;;  %v3799_v28 = vpop.eup %2731 }
 0x810   : > { %2733 = vpow2.f32 %v1690_v26  ;;  %1708 = vadd.xlane.f32.xlu2 %v1707_v27  ;;  %v1704_v31 = vsel %vm1086_vm1, %v3799_v28, 0.0  ;;  %v1499_v26 = vld [vmem:[%s4089_s12 + $0x18] sm:$0xff]  ;;  %v1498_v27 = vld [vmem:[%s4089_s12 + $0x10] sm:$0xff] }
 0x816   : > { %v3801_v29 = vpop.eup %2733  ;;  %v1849_v30 = vpop.permute.xlu1 %1848 }
 0x817   : > { %1869 = vmatpush.msrb.mxu0 %v1849_v30  ;;  %v1698_v32 = vsel %vm1086_vm1, %v3801_v29, 0.0 }
 0x818   : > { %1705 = vadd.xlane.f32.xlu2 %v1704_v31  ;;  %1699 = vadd.xlane.f32.xlu0 %v1698_v32 }
 0x830   : > { %2690 = vrot.lane.b32.xlu2 %v2689_v50, %s4084_s27 }
 0x838   : > { %1770 = vrot.lane.b32.xlu2 %v3744_v44, %s4084_s27 }
 0x876   : > { %v1703_v33 = vpop.xlane.xlu0 %1702 }
 0x877   : > { %2735 = vrcp.f32 %v1703_v33  ;;  %v1735_v37 = vand.u32 2147483648, %v1703_v33  ;;  %v1733_v39 = vand.u32 2147483647, %v1703_v33  ;;  %vm1729_vm3 = vweird.f32 %v1703_v33 }
 0x879   : > { %v1736_v43 = vor.u32 1.1754944e-38, %v1735_v37  ;;  %vm1734_vm5 = vcmp.eq.f32.partialorder %v1733_v39, 8.507059e+37  ;;  %v2700_v37 = vld [vmem:[#allocation8] ss:$0 sm:$0xff] }
 0x87d   : > { %v2736_v34 = vpop.eup %2735 }
 0x87e   : > { %v1725_v35 = vmul.f32 %v2736_v34, %v1703_v33  ;;  %vm1730_vm2 = vweird.f32 %v2736_v34 }
 0x87f   : > { %vm1731_vm4 = vmor %vm1729_vm3, %vm1730_vm2 }
 0x880   : > { %v1726_v36 = vsub.f32 1.0, %v1725_v35 }
 0x882   : > { %v1727_v38 = vmul.f32 %v2736_v34, %v1726_v36 }
 0x883   : > { %v1709_v40 = vpop.xlane.xlu2 %1708 }
 0x884   : > { %v1728_v42 = vadd.f32 %v2736_v34, %v1727_v38  ;;  %2737 = vrcp.f32 %v1709_v40  ;;  %v1763_v52 = vand.u32 2147483648, %v1709_v40  ;;  %v1761_v54 = vand.u32 2147483647, %v1709_v40 }
 0x885   : > { %vm1757_vm7 = vweird.f32 %v1709_v40 }
 0x886   : > { %v1732_v45 = vsel %vm1731_vm4, %v2736_v34, %v1728_v42  ;;  %v1764_v57 = vor.u32 1.1754944e-38, %v1763_v52  ;;  %vm1762_vm11 = vcmp.eq.f32.partialorder %v1761_v54, 8.507059e+37 }
 0x887   : > { %v1737_v46 = vsel %vm1734_vm5, %v1736_v43, %v1732_v45 }
 0x888   : > { %v1767_v44 = vmul.f32 %v2728_v15, %v1737_v46 }
 0x88a   : > { %v2738_v47 = vpop.eup %2737  ;;  %1916 = vst.msk [vmem:[%s3815_s10 + $0x8] sm:$0xff] %vm1086_vm1, %v1767_v44 }
 0x88b   : > { %v1753_v48 = vmul.f32 %v2738_v47, %v1709_v40  ;;  %v1700_v49 = vpop.xlane.xlu0 %1699  ;;  %v1706_v50 = vpop.xlane.xlu2 %1705  ;;  %vm1758_vm6 = vweird.f32 %v2738_v47 }
 0x88c   : > { %2739 = vrcp.f32 %v1700_v49  ;;  %vm1759_vm10 = vmor %vm1757_vm7, %vm1758_vm6  ;;  %v1721_v3 = vand.u32 2147483648, %v1700_v49  ;;  %v1719_v7 = vand.u32 2147483647, %v1700_v49  ;;  %v1749_v8 = vand.u32 2147483648, %v1706_v50 }
 0x88d   : > { %v1754_v51 = vsub.f32 1.0, %v1753_v48  ;;  %2741 = vrcp.f32 %v1706_v50  ;;  %v1747_v10 = vand.u32 2147483647, %v1706_v50  ;;  %vm1715_vm14 = vweird.f32 %v1700_v49  ;;  %v1955_v48 = vld [vmem:[%s4090_s14 + $0x18] sm:$0xff] }
 0x88e   : > { %v1722_v13 = vor.u32 1.1754944e-38, %v1721_v3  ;;  %vm1743_vm2 = vweird.f32 %v1706_v50  ;;  %vm1720_vm3 = vcmp.eq.f32.partialorder %v1719_v7, 8.507059e+37  ;;  %v1750_v16 = vor.u32 1.1754944e-38, %v1749_v8  ;;  %v1964_v8 = vld [vmem:[%s3994_s16 + $0x38] sm:$0xff] }
 0x88f   : > { %v1755_v53 = vmul.f32 %v2738_v47, %v1754_v51  ;;  %vm1748_vm5 = vcmp.eq.f32.partialorder %v1747_v10, 8.507059e+37 }
 0x891   : > { %v1756_v55 = vadd.f32 %v2738_v47, %v1755_v53 }
 0x892   : > { %v2740_v56 = vpop.eup %2739 }
 0x893   : > { %v2742_v58 = vpop.eup %2741  ;;  %v1760_v59 = vsel %vm1759_vm10, %v2738_v47, %v1756_v55  ;;  %v1711_v60 = vmul.f32 %v2740_v56, %v1700_v49  ;;  %v2691_v61 = vpop.permute.xlu2 %2690  ;;  %vm1716_vm12 = vweird.f32 %v2740_v56  ;;  %v1953_v49 = vld [vmem:[%s4090_s14 + $0x8] sm:$0xff] }
 0x894   : > { %v1765_v62 = vsel %vm1762_vm11, %v1764_v57, %v1760_v59  ;;  %v1739_v63 = vmul.f32 %v2742_v58, %v1706_v50  ;;  %v2693_v0 = vunpack.i.h.bf16 %v2691_v61  ;;  %v2692_v17 = vunpack.i.l.bf16 %v2691_v61  ;;  %vm1717_vm15 = vmor %vm1715_vm14, %vm1716_vm12  ;;  %v1952_v50 = vld [vmem:[%s4090_s14] sm:$0xff] }
 0x895   : > { %v1712_v1 = vsub.f32 1.0, %v1711_v60  ;;  %v1769_v2 = vmul.f32 %v3795_v25, %v1765_v62  ;;  %vm1744_vm13 = vweird.f32 %v2742_v58  ;;  %v2701_v60 = vld [vmem:[#allocation16] ss:$0 sm:$0xff]  ;;  %vm2039_vm12 = vcmask 523264  }
 0x896   : > { %v1740_v5 = vsub.f32 1.0, %v1739_v63  ;;  %1843 = vmatpush.msrb.mxu3 %v2693_v0  ;;  %1817 = vmatpush.msra.mxu2 %v2692_v17  ;;  %vm1745_vm4 = vmor %vm1743_vm2, %vm1744_vm13  ;;  %v2702_v63 = vld [vmem:[#allocation17] ss:$0 sm:$0xff]  ;;  %v2703_v17 = vld [vmem:[#allocation10] ss:$0 sm:$0xff] }
 0x897   : > { %v1713_v6 = vmul.f32 %v2740_v56, %v1712_v1  ;;  %2486 = vmatmul.msk.f32.vlgmr.msrb.gmra.mxu0 %vm1086_vm1, %v1769_v2  ;;  %1918 = vst.msk [vmem:[%s3815_s10 + $0x18] sm:$0xff] %vm1086_vm1, %v1769_v2  ;;  %2484 = vmatmul.msk.f32.vlgmr.msra.gmra.mxu2 %vm1086_vm1, %v1767_v44 }
 0x898   : > { %v1741_v9 = vmul.f32 %v2742_v58, %v1740_v5  ;;  %1984 = vmatpush.msrb.mxu2 %v1955_v48  ;;  %2051 = vmatpush.msra.mxu3 %v1964_v8 }
 0x899   : > { %v1714_v11 = vadd.f32 %v2740_v56, %v1713_v6 }
 0x89a   : > { %v1742_v14 = vadd.f32 %v2742_v58, %v1741_v9 }
 0x89b   : > { %v1718_v15 = vsel %vm1717_vm15, %v2740_v56, %v1714_v11  ;;  %v1771_v4 = vpop.permute.xlu2 %1770  ;;  %v1963_v11 = vld [vmem:[%s3994_s16 + $0x30] sm:$0xff] }
 0x89c   : > { %v1723_v18 = vsel %vm1720_vm3, %v1722_v13, %v1718_v15  ;;  %v1746_v19 = vsel %vm1745_vm4, %v2742_v58, %v1742_v14  ;;  %1791 = vmatpush.msra.mxu1 %v1771_v4  ;;  %2052 = vmatpush.msra.mxu3 %v1963_v11  ;;  %v1962_v15 = vld [vmem:[%s3994_s16 + $0x28] sm:$0xff] }
 0x89d   : > { %v1751_v20 = vsel %vm1748_vm5, %v1750_v16, %v1746_v19  ;;  %v1766_v21 = vmul.f32 %v3801_v29, %v1723_v18  ;;  %v1496_v29 = vld [vmem:[%s4089_s12] sm:$0xff] }
 0x89e   : > { %v1768_v22 = vmul.f32 %v3799_v28, %v1751_v20  ;;  %1907 = vmatpush.msrb.mxu1 %v1499_v26  ;;  %v1497_v28 = vld [vmem:[%s4089_s12 + $0x8] sm:$0xff]  ;;  %2053 = vmatpush.msra.mxu3 %v1962_v15  ;;  %v1961_v18 = vld [vmem:[%s3994_s16 + $0x20] sm:$0xff]  ;;  %v1960_v20 = vld [vmem:[%s3994_s16 + $0x18] sm:$0xff] }
 0x89f   : > { %2483 = vmatmul.msk.f32.vlgmr.msra.gmra.mxu1 %vm1086_vm1, %v1766_v21  ;;  %1915 = vst.msk [vmem:[%s3815_s10] sm:$0xff] %vm1086_vm1, %v1766_v21 }
 0x8a0   : > { %2485 = vmatmul.msk.f32.vlgmr.msrb.gmra.mxu3 %vm1086_vm1, %v1768_v22  ;;  %1917 = vst.msk [vmem:[%s3815_s10 + $0x10] sm:$0xff] %vm1086_vm1, %v1768_v22  ;;  %1908 = vmatpush.msrb.mxu1 %v1498_v27  ;;  %v1957_v27 = vld [vmem:[%s3994_s16] sm:$0xff] }
 0x8a1   : > { %2054 = vmatpush.msra.mxu3 %v1961_v18 }
 0x8a2   : > { %1909 = vmatpush.msrb.mxu1 %v1497_v28 }
 0x8a3   : > { %2055 = vmatpush.msra.mxu3 %v1960_v20 }
 0x8a4   : > { %1910 = vmatpush.msrb.mxu1 %v1496_v29 }
 0x914   : > { %v1871_v23 = vpop.f32.mrf.mxu0 }
 0x915   : > { %1883 = vrot.lane.b32.xlu2 %v1871_v23, %s4086_s1  ;;  %v1959_v23 = vld [vmem:[%s3994_s16 + $0x10] sm:$0xff]  ;;  %s2150_s1 = scalar_lea.hbm %s4091_s5, %s2501_s24 }
 0x916   : > { %2056 = vmatpush.msra.mxu3 %v1959_v23 }
 0x91a   : > { %v1819_v24 = vpop.f32.mrf.mxu2 }
 0x91b   : > { %1875 = vrot.lane.b32.xlu0 %v1819_v24, %s4087_s11 }
 0x91c   : > { %v1793_v31 = vpop.f32.mrf.mxu1 }
 0x923   : > { %v1845_v25 = vpop.f32.mrf.mxu3 }
 0x924   : > { %1879 = vrot.lane.b32.xlu1 %v1845_v25, %s4088_s30  ;;  %v1958_v25 = vld [vmem:[%s3994_s16 + $0x8] sm:$0xff]  ;;  %s2102_s30 = sand.u32 1, %s3440_s8  }
 0x925   : > { %2057 = vmatpush.msra.mxu3 %v1958_v25  ;;  %s3913_s12 = scalar_lea.sflag [#allocation24], %s2102_s30 }
 0x927   : > { %2058 = vmatpush.msra.mxu3 %v1957_v27 }
 0x96f   : > { %v1884_v34 = vpop.permute.xlu2 %1883 }
 0x98d   : > { %v1876_v30 = vpop.permute.xlu0 %1875 }
 0x98e   : > { %v1886_v32 = vsel %vm1086_vm1, %v1793_v31, %v1876_v30 }
 0x996   : > { %v1880_v33 = vpop.permute.xlu1 %1879 }
 0x997   : > { %v1887_v35 = vsel %vm1412_vm8, %v1886_v32, %v1880_v33 }
 0x998   : > { %v1888_v36 = vsel %vm1414_vm9, %v1887_v35, %v1884_v34 }
 0x999   : > { %2487 = vmatmul.msk.f32.vlgmr.msrb.gmra.mxu1 %vm1053_vm0, %v1888_v36 }
 0xa16   : > { %v1912_v38 = vpop.f32.mrf.mxu1 }
 0xa17   : > { %v1913_v39 = vadd.f32 %v2700_v37, %v1912_v38 }
 0xa19   : > { %v1919_v40 = vadd.f32 %v1913_v39, %v3740_v41  ;;  %v1954_v41 = vld [vmem:[%s4090_s14 + $0x10] sm:$0xff]  ;;  %s3125_s14 = scalar_lea.hbm %s3124_s13, 32 }
 0xa1a   : > { %1985 = vmatpush.msrb.mxu2 %v1954_v41  ;;  %p3126_p0 = scmp.ne.s32.totalorder %s3124_s13, %s3125_s14  ;;  %p3131_p4 = scmp.lt.s32.totalorder %s3129_s6, %s3125_s14 }
 0xa1b   : > { %v1922_v42 = vsel %vm1053_vm0, %v1919_v40, 0.0 }
 0xa1c   : > { %1923 = vadd.xlane.f32.xlu1 %v1922_v42  ;;  %1986 = vmatpush.msrb.mxu2 %v1953_v49  ;;  %p3127_p1 = pnand %p3126_p0, %p3459_p5  ;;  %p3132_p7 = por %p3131_p4, %p3130_p3 }
 0xa1e   : > { %1987 = vmatpush.msrb.mxu2 %v1952_v50  ;;  %p3128_p2 = pneg %p3127_p1 }
 0xa20   : > { %p3133_p8 = pnand %p3132_p7, %p3128_p2 }
 0xa8f   : > { %v1924_v43 = vpop.xlane.xlu1 %1923 }
 0xa90   : > { %v1925_v45 = vmul.f32 %v1924_v43, %v3705_v12 }
 0xa92   : > { %v1926_v46 = vsub.f32 %v1919_v40, %v1925_v45 }
 0xa94   : > { %v1927_v44 = vmul.f32 %v1926_v46, %v1926_v46 }
 0xa96   : > { %v1928_v47 = vsel %vm1053_vm0, %v1927_v44, 0.0 }
 0xa97   : > { %1929 = vadd.xlane.f32.xlu2 %v1928_v47 }
 0xb0a   : > { %v1930_v51 = vpop.xlane.xlu2 %1929 }
 0xb0b   : > { %v1931_v52 = vmul.f32 %v1930_v51, %v3705_v12 }
 0xb0d   : > { %v1932_v53 = vadd.f32 1e-12, %v1931_v52 }
 0xb0f   : > { %2743 = vrsqrt.f32 %v1932_v53  ;;  %vm1939_vm8 = vweird.f32 %v1932_v53 }
 0xb15   : > { %v2744_v54 = vpop.eup %2743 }
 0xb16   : > { %v1934_v55 = vmul.f32 %v2744_v54, %v1932_v53  ;;  %vm1940_vm1 = vweird.f32 %v2744_v54  ;;  %v2704_v53 = vld [vmem:[#allocation11] ss:$0 sm:$0xff] }
 0xb17   : > { %vm1941_vm9 = vmor %vm1939_vm8, %vm1940_vm1 }
 0xb18   : > { %v1935_v56 = vmul.f32 %v2744_v54, %v1934_v55 }
 0xb1a   : > { %v1936_v57 = vmul.f32 0.5, %v1935_v56 }
 0xb1c   : > { %v1937_v58 = vsub.f32 1.5, %v1936_v57 }
 0xb1e   : > { %v1938_v59 = vmul.f32 %v2744_v54, %v1937_v58 }
 0xb20   : > { %v1942_v61 = vsel %vm1941_vm9, %v2744_v54, %v1938_v59 }
 0xb21   : > { %v1943_v62 = vmul.f32 %v1942_v61, %v1926_v46 }
 0xb23   : > { %v1947_v0 = vmul.f32 %v2701_v60, %v1943_v62 }
 0xb25   : > { %v3868_v1 = vadd.f32 %v2702_v63, %v1947_v0 }
 0xb27   : > { %2488 = vmatmul.msk.f32.vlgmr.msrb.gmra.mxu2 %vm1053_vm0, %v3868_v1 }
 0xbaa   : > { %v1989_v2 = vpop.f32.mrf.mxu2 }
 0xbab   : > { %v1990_v3 = vadd.f32 %v2703_v17, %v1989_v2 }
 0xbad   : > { %v1993_v5 = vmul.f32 0.70710677, %v1990_v3  ;;  %v1992_v50 = vmul.f32 0.5, %v1990_v3 }
 0xbaf   : > { %v1994_v6 = vmul.f32 %v1993_v5, %v1993_v5 }
 0xbb1   : > { %v1995_v7 = vmin.f32 %v1994_v6, 16.0 }
 0xbb3   : > { %v1996_v9 = vmul.f32 2.1237322e-06, %v1995_v7  ;;  %v2007_v10 = vmul.f32 3.8918573e-05, %v1995_v7 }
 0xbb5   : > { %v1997_v13 = vadd.f32 0.00028619796, %v1996_v9  ;;  %v2008_v14 = vadd.f32 0.001143296, %v2007_v10 }
 0xbb7   : > { %v1998_v16 = vmul.f32 %v1997_v13, %v1995_v7  ;;  %v2009_v4 = vmul.f32 %v2008_v14, %v1995_v7 }
 0xbb9   : > { %v2010_v19 = vadd.f32 0.014752088, %v2009_v4  ;;  %v1999_v21 = vadd.f32 0.0036580483, %v1998_v16 }
 0xbbb   : > { %v2011_v22 = vmul.f32 %v2010_v19, %v1995_v7  ;;  %v2000_v26 = vmul.f32 %v1999_v21, %v1995_v7 }
 0xbbd   : > { %v2012_v24 = vadd.f32 0.112945676, %v2011_v22  ;;  %v2001_v30 = vadd.f32 0.05243302, %v2000_v26 }
 0xbbf   : > { %v2013_v28 = vmul.f32 %v2012_v24, %v1995_v7  ;;  %v2002_v33 = vmul.f32 %v2001_v30, %v1995_v7 }
 0xbc1   : > { %v2014_v29 = vadd.f32 0.4994258, %v2013_v28  ;;  %v2003_v34 = vadd.f32 0.18741608, %v2002_v33 }
 0xbc3   : > { %v2015_v31 = vmul.f32 %v2014_v29, %v1995_v7  ;;  %v2004_v36 = vmul.f32 %v2003_v34, %v1995_v7 }
 0xbc5   : > { %v2016_v32 = vadd.f32 1.0, %v2015_v31  ;;  %v2005_v40 = vadd.f32 1.1283791, %v2004_v36 }
 0xbc7   : > { %2745 = vrcp.f32 %v2016_v32  ;;  %v2028_v39 = vand.u32 2147483648, %v2016_v32  ;;  %v2026_v43 = vand.u32 2147483647, %v2016_v32  ;;  %vm2022_vm7 = vweird.f32 %v2016_v32 }
 0xbc8   : > { %v2006_v44 = vmul.f32 %v2005_v40, %v1993_v5 }
 0xbc9   : > { %v2029_v46 = vor.u32 1.1754944e-38, %v2028_v39  ;;  %vm2027_vm11 = vcmp.eq.f32.partialorder %v2026_v43, 8.507059e+37 }
 0xbcd   : > { %v2746_v35 = vpop.eup %2745 }
 0xbce   : > { %v2018_v37 = vmul.f32 %v2746_v35, %v2016_v32  ;;  %vm2023_vm6 = vweird.f32 %v2746_v35 }
 0xbcf   : > { %vm2024_vm10 = vmor %vm2022_vm7, %vm2023_vm6 }
 0xbd0   : > { %v2019_v38 = vsub.f32 1.0, %v2018_v37 }
 0xbd2   : > { %v2020_v42 = vmul.f32 %v2746_v35, %v2019_v38 }
 0xbd4   : > { %v2021_v45 = vadd.f32 %v2746_v35, %v2020_v42 }
 0xbd6   : > { %v2025_v47 = vsel %vm2024_vm10, %v2746_v35, %v2021_v45 }
 0xbd7   : > { %v2030_v48 = vsel %vm2027_vm11, %v2029_v46, %v2025_v47 }
 0xbd8   : > { %v2031_v41 = vmul.f32 %v2030_v48, %v2006_v44 }
 0xbda   : > { %v2489_v49 = vclamps-f32 %v2031_v41, 1.0 }
 0xbdc   : > { %v2034_v51 = vadd.f32 1.0, %v2489_v49 }
 0xbde   : > { %v2035_v52 = vmul.f32 %v2034_v51, %v1992_v50 }
 0xbe0   : > { %2490 = vmatmul.msk.f32.vlgmr.msra.gmra.mxu3 %vm2039_vm12, %v2035_v52 }
 0xc63   : > { %v2060_v54 = vpop.f32.mrf.mxu3 }
 0xc64   : > { %v2061_v55 = vadd.f32 %v2704_v53, %v2060_v54 }
 0xc66   : > { %v2063_v56 = vadd.f32 %v2061_v55, %v3868_v1 }
 0xc68   : > { %v2066_v57 = vsel %vm1053_vm0, %v2063_v56, 0.0 }
 0xc69   : > { %2067 = vadd.xlane.f32.xlu0 %v2066_v57 }
 0xcdc   : > { %v2068_v58 = vpop.xlane.xlu0 %2067 }
 0xcdd   : > { %v2069_v59 = vmul.f32 %v2068_v58, %v3705_v12 }
 0xcdf   : > { %v3899_v60 = vsub.f32 %v2063_v56, %v2069_v59 }
 0xce1   : > { %v2071_v61 = vmul.f32 %v3899_v60, %v3899_v60 }
 0xce3   : > { %v2072_v62 = vsel %vm1053_vm0, %v2071_v61, 0.0 }
 0xce4   : > { %2073 = vadd.xlane.f32.xlu1 %v2072_v62 }
 0xce5   : > { %3136 = shalt.err (!%p3133_p8)
}
 0xce6   : > { %s3283_s30 = smov 128   ;;  %s2153_s24 = sshll.u32 %s2150_s1, 4  ;;  %s2154_s24 = int_to_ptr.hbm [resolvable:$true] %s2153_s24 }
 0xce7   : > { %2552 = dma.vmem_to_hbm [thread:$0]  (%p3459_p5), %s2135_s0, 512, %s2137_s4, %s3913_s12, %s3283_s30, %s3283_s30, %s4087_s11  }
 0xce8   : > { %s2151_s15 = sshll.u32 %s3815_s10, 4  ;;  %s3151_s28 = sshra.s32 %s2154_s24, 4  ;;  %s2152_s15 = int_to_ptr.vmem [resolvable:$true] %s2151_s15  ;;  %s3152_s28 = int_to_ptr.hbm [resolvable:$true] %s3151_s28 }
 0xce9   : > { %s3153_s27 = scalar_lea.hbm %s3152_s28, 32  ;;  %s3157_s9 = scalar_lea.hbm %s4091_s5, 64 }
 0xcea   : > { %p3154_p9 = scmp.ne.s32.totalorder %s3152_s28, %s3153_s27  ;;  %p3158_p12 = scmp.lt.s32.totalorder %s3152_s28, %s4091_s5 }
 0xceb   : > { %p3159_p13 = scmp.lt.s32.totalorder %s3157_s9, %s3153_s27 }
 0xcec   : > { %p3155_p10 = pnand %p3154_p9, %p3459_p5 }
 0xced   : > { %p3160_p0 = por %p3159_p13, %p3158_p12 }
 0xcee   : > { %p3156_p11 = pneg %p3155_p10 }
 0xcf0   : > { %p3161_p1 = pnand %p3160_p0, %p3156_p11 }
 0xcf2   : > { %3164 = shalt.err (!%p3161_p1)
}
 0xcf3   : > { %2553 = dma.vmem_to_hbm [thread:$0]  (%p3459_p5), %s2152_s15, 512, %s2154_s24, %s3913_s12, %s3283_s30, %s3283_s30, %s4087_s11   ;;  %v2705_v8 = vld [vmem:[#allocation19] ss:$0 sm:$0xff]  ;;  %v2706_v10 = vld [vmem:[#allocation20] ss:$0 sm:$0xff] }
 0xcf4   : > { %s2454_s10 = sshll.u32 %s3662_s17, 3  ;;  %s2494_s0 = sshll.u32 %s3440_s8, 3 }
 0xcf5   : > { %s4092_s11 = sld [smem:[#allocation58_spill]]  ;;  %s996_s7 = scalar_lea.vmem [#allocation22], %s2454_s10 }
 0xcf6   : > { %s2120_s30 = sshll.u32 %s996_s7, 4  ;;  %s2098_s8 = scalar_lea.sflag [#allocation4], %s3662_s17  ;;  %s2121_s30 = int_to_ptr.vmem [resolvable:$true] %s2120_s30 }
 0xcfb   : > { %s2118_s1 = scalar_lea.hbm %s4092_s11, %s2494_s0  ;;  %s3185_s13 = scalar_lea.hbm %s4092_s11, 16 }
 0xcfc   : > { %s2122_s24 = sshll.u32 %s2118_s1, 4  ;;  %s2123_s24 = int_to_ptr.hbm [resolvable:$true] %s2122_s24 }
 0xcfd   : > { %s3179_s15 = sshra.s32 %s2123_s24, 4  ;;  %s3180_s15 = int_to_ptr.hbm [resolvable:$true] %s3179_s15 }
 0xcfe   : > { %s3181_s28 = scalar_lea.hbm %s3180_s15, 8  ;;  %p3186_p7 = scmp.lt.s32.totalorder %s3180_s15, %s4092_s11 }
 0xcff   : > { %p3182_p2 = scmp.ne.s32.totalorder %s3180_s15, %s3181_s28  ;;  %p3187_p8 = scmp.lt.s32.totalorder %s3185_s13, %s3181_s28 }
 0xd01   : > { %p3183_p3 = pnand %p3182_p2, %p3459_p5  ;;  %p3188_p9 = por %p3187_p8, %p3186_p7 }
 0xd03   : > { %p3184_p4 = pneg %p3183_p3 }
 0xd05   : > { %p3189_p10 = pnand %p3188_p9, %p3184_p4 }
 0xd57   : > { %v2074_v63 = vpop.xlane.xlu1 %2073 }
 0xd58   : > { %v2075_v0 = vmul.f32 %v2074_v63, %v3705_v12 }
 0xd5a   : > { %v2076_v1 = vadd.f32 1e-12, %v2075_v0 }
 0xd5c   : > { %2747 = vrsqrt.f32 %v2076_v1  ;;  %vm2083_vm14 = vweird.f32 %v2076_v1 }
 0xd62   : > { %v2748_v17 = vpop.eup %2747 }
 0xd63   : > { %v2078_v2 = vmul.f32 %v2748_v17, %v2076_v1  ;;  %vm2084_vm13 = vweird.f32 %v2748_v17 }
 0xd64   : > { %vm2085_vm15 = vmor %vm2083_vm14, %vm2084_vm13 }
 0xd65   : > { %v2079_v3 = vmul.f32 %v2748_v17, %v2078_v2 }
 0xd67   : > { %v2080_v5 = vmul.f32 0.5, %v2079_v3 }
 0xd69   : > { %v2081_v6 = vsub.f32 1.5, %v2080_v5 }
 0xd6b   : > { %v2082_v7 = vmul.f32 %v2748_v17, %v2081_v6 }
 0xd6d   : > { %v2086_v12 = vsel %vm2085_vm15, %v2748_v17, %v2082_v7 }
 0xd6e   : > { %v2087_v9 = vmul.f32 %v2086_v12, %v3899_v60 }
 0xd70   : > { %v2091_v11 = vmul.f32 %v2705_v8, %v2087_v9 }
 0xd72   : > { %v2095_v13 = vadd.f32 %v2706_v10, %v2091_v11 }
 0xd74   : > { %2096 = vst.msk [vmem:[%s996_s7] sm:$0xff] %vm1053_vm0, %v2095_v13 }
 0xd75   : > { %3192 = shalt.err (!%p3189_p10)
}
 0xd76   : > { %2551 = dma.vmem_to_hbm [thread:$0]  (%p3459_p5), %s2121_s30, 128, %s2123_s24, %s2098_s8  }
 0xd77 PF: > { %s4093_s17 = sld [smem:[#allocation37_spill]] }
 0xd78   : > { %s4094_s26 = sld [smem:[#allocation35_spill]] }
 0xd7d   : > { %p2628_p11 = scmp.ge.s32.totalorder %s4093_s17, 2 }
 0xd7e   : > { %s2168_s0 = sand.u32 1, %s4094_s26  }
 0xd7f   : > { %p2595_p12 = pnand %p2628_p11, %p3463_p6  ;;  %s2169_s4 = scalar_lea.sflag [#allocation4], %s2168_s0 }
 0xd81   : > { %p2596_p13 = pneg %p2595_p12 }
 0xd83   : > { %3238 = dma.done.wait (%p2596_p13), %s2169_s4, 128  }
 0xd84   : > { %3240 = vsyncadd (%p2596_p13), %s2169_s4, 4294967168  ;;  %s4096_s12 = sadd.s32 4294967294, %s4093_s17  }
 0xd85   : > { %s2178_s1 = sand.u32 1, %s4096_s12  }
 0xd86   : > { %s2179_s7 = scalar_lea.sflag [#allocation24], %s2178_s1 }
 0xd87   : > { %3242 = dma.done.wait (%p2596_p13), %s2179_s7, 1024  }
 0xd88   : > { %3244 = vsyncadd (%p2596_p13), %s2179_s7, 4294966272  ;;  %s4097_s28 = sld [smem:[#allocation38_spill]]  ;;  %s4100_s27 = smov %s3251_s3 }
 0xd89   : > { %s4098_s2 = sld [smem:[#allocation36_spill]] }
 0xd8a   : > { %s4099_s7 = sld [smem:[#allocation39_spill]] }
 0xd8e   : > { %p47_p5 = scmp.ge.s32.totalorder %s4097_s28, 4  }
 0xd8f   : > { %s4101_s3 = smov %s4098_s2 }
 0xd90   :  { %49 = sbr.rel (!%p47_p5) target bundleno = 32 (0x20), region = 241 }
 0xd95   :  { %2195 = vsyncpa [#allocation3], 1 }
 0xd96   :  { %2197 = vsyncpa [#allocation3 + $0x1], 1 }
 0xd97   :  { %2198 = vsyncpa [#allocation6], 1 }
 0xd98   :  { %2199 = vsyncpa [#allocation9], 1 }
 0xd99   :  { %2200 = vsyncpa [#allocation12], 1 }
 0xd9a   :  { %2201 = vsyncpa [#allocation15], 1 }
 0xd9b   :  { %2202 = vsyncpa [#allocation18], 1 }
 0xd9c   :  { %2203 = vsyncpa [#allocation21], 1 }
 0xd9d   :  { %2204 = vsyncpa [#allocation4], 1 }
 0xd9e   :  { %2206 = vsyncpa [#allocation4 + $0x1], 1 }
 0xd9f   :  { %2207 = vsyncpa [#allocation24], 1 }
 0xda0   :  { %2209 = vsyncpa [#allocation24 + $0x1], 1 }

</bundles_post_ra>
